<compile_context>
chip_gen: v5e
topology: v5e:2x2
jax: 0.10.0
libtpu: 0.0.40
codegen_flags: <defaults>
</compile_context>

<pallas_src>
import functools

import jax
import jax.numpy as jnp
import numpy as np
from jax.experimental import pallas as pl
from jax.experimental.pallas import tpu as pltpu

_NOUT_PAD = 128  # lane-dense head output; the real 14 logits live in [:, :14]


# ---------------------------------------------------------------------------
# Fused Pallas kernel: entire forward pass, intermediates in VMEM
# ---------------------------------------------------------------------------
def fused_resnext_kernel(x_ref, stem_w_ref, stem_b_ref,
                         c1_w_ref, c1_b_ref,
                         c2_w_ref, c2_b_ref,
                         c3_w_ref, c3_b_ref,
                         pool_ref, fc_w_ref, fc_b_ref,
                         out_ref, cat_ref, *, height, width):
    f32 = jnp.float32
    bf16 = jnp.bfloat16
    m_pad = x_ref.shape[0]
    cm = c1_w_ref.shape[1]                 # bottleneck channel width
    hw = height * width
    m_valid = pool_ref.shape[0] * hw       # B*H*W real rows

    # --- stem 1x1 conv (BN folded into bias) + ReLU -------------------------
    h = jnp.dot(x_ref[...].astype(bf16), stem_w_ref[...],
                preferred_element_type=f32)
    h = jnp.maximum(h + stem_b_ref[...], 0.0)

    # --- bottleneck reduce 1x1 + ReLU ---------------------------------------
    t = jnp.dot(h.astype(bf16), c1_w_ref[...], preferred_element_type=f32)
    t = jnp.maximum(t + c1_b_ref[...], 0.0)

    # --- grouped 3x3 conv (padding=1, stride=1) -----------------------------
    # Boundary masks built in-kernel (hoisted): decompose the row index m into
    # (image, hh, ww) with compares/adds only (no vector int div/mod).
    m_idx = jax.lax.broadcasted_iota(jnp.int32, (m_pad, 1), 0)
    p = m_idx
    for k in range(1, -(-m_pad // hw)):                     # p = m mod (H*W)
        p = p - hw * (m_idx >= k * hw).astype(jnp.int32)
    hh = jnp.zeros_like(p)
    for k in range(1, height):                              # hh = p // W
        hh = hh + (p >= k * width).astype(jnp.int32)
    ww = p - width * hh                                     # ww = p mod W
    row_valid = (m_idx < m_valid).astype(f32)

    # 9 taps = 9 sublane rolls (pltpu.roll(t, -off): shifted[m] == t[m + off];
    # masks zero every out-of-image / padded / wrapped position).  Taps are
    # written K-major into cat_ref so ONE K=9*Cm matmul does the whole conv.
    tap = 0
    for dh in (-1, 0, 1):
        for dw in (-1, 0, 1):
            off = dh * width + dw
            ok = ((hh + dh >= 0) & (hh + dh < height)
                  & (ww + dw >= 0) & (ww + dw < width))
            mask = row_valid * ok.astype(f32)
            shifted = t if off == 0 else pltpu.roll(
                t, shift=(-off) % m_pad, axis=0)
            cat_ref[:, tap * cm:(tap + 1) * cm] = shifted * mask
            tap += 1
    g = jnp.dot(cat_ref[...].astype(bf16), c2_w_ref[...],
                preferred_element_type=f32)
    g = jnp.maximum(g + c2_b_ref[...], 0.0)

    # --- bottleneck expand 1x1 + residual (VMEM-resident stem act) + ReLU ---
    feat = jnp.dot(g.astype(bf16), c3_w_ref[...], preferred_element_type=f32)
    feat = jnp.maximum(feat + c3_b_ref[...] + h, 0.0)

    # --- head: avg_pool2d(7,7) as a pooling matmul -> Linear -> Sigmoid -----
    pooled = jnp.dot(pool_ref[...], feat.astype(bf16),
                     preferred_element_type=f32)
    logits = jnp.dot(pooled.astype(bf16), fc_w_ref[...],
                     preferred_element_type=f32)
    out_ref[...] = jax.nn.sigmoid(logits + fc_b_ref[...]).astype(out_ref.dtype)


# ---------------------------------------------------------------------------
# pallas_call wrapper (single launch, full-array blocks)
# ---------------------------------------------------------------------------
def _full_block(a):
    return pl.BlockSpec(a.shape, lambda i, n=a.ndim: (0,) * n)


def fused_resnext(x2d, params, pool, height, width_sp):
    m_pad = x2d.shape[0]
    cm = params["c1_w"].shape[1]
    batch = pool.shape[0]

    args = (x2d,
            params["stem_w"], params["stem_b"],
            params["c1_w"], params["c1_b"],
            params["c2_w"], params["c2_b"],
            params["c3_w"], params["c3_b"],
            pool, params["fc_w"], params["fc_b"])

    return pl.pallas_call(
        functools.partial(fused_resnext_kernel, height=height, width=width_sp),
        out_shape=jax.ShapeDtypeStruct((batch, _NOUT_PAD), jnp.float32),
        grid=(1,),
        in_specs=[_full_block(a) for a in args],
        out_specs=pl.BlockSpec((batch, _NOUT_PAD), lambda i: (0, 0)),
        scratch_shapes=[pltpu.VMEM((m_pad, 9 * cm), jnp.float32)],
        compiler_params=pltpu.CompilerParams(
            dimension_semantics=("arbitrary",),
            vmem_limit_bytes=32 * 1024 * 1024),
    )(*args)


# ---------------------------------------------------------------------------
# Host-side pooling matrix (avg_pool2d(7,7) over each image's 49 rows)
# ---------------------------------------------------------------------------
def _pool_matrix(batch, hw, m_pad):
    pool = np.zeros((batch, m_pad), np.float32)
    for b in range(batch):
        pool[b, b * hw:(b + 1) * hw] = 1.0 / hw
    return jnp.asarray(pool, dtype=jnp.bfloat16)


# ---------------------------------------------------------------------------
# Full forward pass
# ---------------------------------------------------------------------------
def resnext_forward(x_nchw, params):
    B, c_in, H, W = x_nchw.shape
    assert H == 7 and W == 7, "head assumes 7x7 feature map (as in ResNeXt-101)"
    M = B * H * W
    m_pad = ((M + 127) // 128) * 128          # sublane/MXU-friendly row count

    x = jnp.transpose(x_nchw, (0, 2, 3, 1)).reshape(M, c_in)   # NCHW -> rows
    x = jnp.pad(x, ((0, m_pad - M), (0, 0)))

    pool = _pool_matrix(B, H * W, m_pad)
    out = fused_resnext(x, params, pool, H, W)
    return out[:, :14]                         # drop lane padding of the head


# ---------------------------------------------------------------------------
# Deterministic parameter init (BN folded into biases, bf16 matmul weights)
# ---------------------------------------------------------------------------
def make_params(key, c_in=8, width=32, groups=4):
    cg = width // groups
    ks = jax.random.split(key, 10)

    def init(k, shape, scale=0.1):
        return scale * jax.random.normal(k, shape, dtype=jnp.float32)

    def bf(a):
        return a.astype(jnp.bfloat16)

    # Grouped 3x3 weights, tap-major (kh, kw) order matching the kernel's
    # (dh, dw) loop, block-diagonal over groups, then stacked along K.
    # NOTE: real PyTorch Conv2d weights are (c_out, c_in/g, kh, kw); loading
    # pretrained weights requires permuting to (kh*kw, g, c_in/g, c_out/g)
    # before this packing, or results are silently wrong.
    c2_grouped = init(ks[4], (9, groups, cg, cg))
    eye_g = jnp.eye(groups, dtype=jnp.float32)
    c2_w = jnp.einsum("tgij,gh->tgihj", c2_grouped, eye_g)
    c2_w = c2_w.reshape(9, width, width).reshape(9 * width, width)  # (9*Cm,Cm)

    fc_w = jnp.pad(init(ks[8], (width, 14)), ((0, 0), (0, _NOUT_PAD - 14)))
    fc_b = jnp.pad(init(ks[9], (1, 14)), ((0, 0), (0, _NOUT_PAD - 14)))

    return {
        "stem_w": bf(init(ks[0], (c_in, width))),
        "stem_b": init(ks[1], (1, width)),
        "c1_w": bf(init(ks[2], (width, width))),
        "c1_b": init(ks[3], (1, width)),
        "c2_w": bf(c2_w),
        "c2_b": init(ks[5], (1, width)),
        "c3_w": bf(init(ks[6], (width, width))),
        "c3_b": init(ks[7], (1, width)),
        "fc_w": bf(fc_w),
        "fc_b": fc_b,
    }


if __name__ == "__main__":
    key = jax.random.PRNGKey(0)
    k_params, k_x = jax.random.split(key)

    params = make_params(k_params, c_in=8, width=32, groups=4)
    # NCHW input, 7x7 spatial so avg_pool2d(7,7) collapses to a single vector.
    x = jax.random.normal(k_x, (2, 8, 7, 7), dtype=jnp.float32)

    out = resnext_forward(x, params)
    out = jax.block_until_ready(out)

    assert out.shape == (2, 14), out.shape
    assert bool(jnp.all(jnp.isfinite(out)))
    assert bool(jnp.all((out > 0.0) & (out < 1.0)))  # sigmoid range
    print("KERNEL_OK")
</pallas_src>

<mosaic_0001>
module attributes {stable_mosaic.version = 11 : i64} {
  func.func @fused_resnext_kernel(%arg0: i32, %arg1: memref<128x8xf32, #tpu.memory_space<vmem>>, %arg2: memref<8x32xbf16, #tpu.memory_space<vmem>>, %arg3: memref<1x32xf32, #tpu.memory_space<vmem>>, %arg4: memref<32x32xbf16, #tpu.memory_space<vmem>>, %arg5: memref<1x32xf32, #tpu.memory_space<vmem>>, %arg6: memref<288x32xbf16, #tpu.memory_space<vmem>>, %arg7: memref<1x32xf32, #tpu.memory_space<vmem>>, %arg8: memref<32x32xbf16, #tpu.memory_space<vmem>>, %arg9: memref<1x32xf32, #tpu.memory_space<vmem>>, %arg10: memref<2x128xbf16, #tpu.memory_space<vmem>>, %arg11: memref<32x128xbf16, #tpu.memory_space<vmem>>, %arg12: memref<1x128xf32, #tpu.memory_space<vmem>>, %arg13: memref<2x128xf32, #tpu.memory_space<vmem>>, %arg14: memref<128x288xf32, #tpu.memory_space<vmem>>) attributes {dimension_semantics = [#tpu.dimension_semantics<arbitrary>], iteration_bounds = array<i64: 1>, scalar_prefetch = 0 : i64, scratch_operands = 1 : i64, tpu.core_type = #tpu.core_type<tc>, window_params = [{pipeline_mode = #tpu.pipeline_mode<synchronous>, transform_indices = @transform_0, window_bounds = array<i64: 128, 8>}, {pipeline_mode = #tpu.pipeline_mode<synchronous>, transform_indices = @transform_1, window_bounds = array<i64: 8, 32>}, {pipeline_mode = #tpu.pipeline_mode<synchronous>, transform_indices = @transform_2, window_bounds = array<i64: 1, 32>}, {pipeline_mode = #tpu.pipeline_mode<synchronous>, transform_indices = @transform_3, window_bounds = array<i64: 32, 32>}, {pipeline_mode = #tpu.pipeline_mode<synchronous>, transform_indices = @transform_4, window_bounds = array<i64: 1, 32>}, {pipeline_mode = #tpu.pipeline_mode<synchronous>, transform_indices = @transform_5, window_bounds = array<i64: 288, 32>}, {pipeline_mode = #tpu.pipeline_mode<synchronous>, transform_indices = @transform_6, window_bounds = array<i64: 1, 32>}, {pipeline_mode = #tpu.pipeline_mode<synchronous>, transform_indices = @transform_7, window_bounds = array<i64: 32, 32>}, {pipeline_mode = #tpu.pipeline_mode<synchronous>, transform_indices = @transform_8, window_bounds = array<i64: 1, 32>}, {pipeline_mode = #tpu.pipeline_mode<synchronous>, transform_indices = @transform_9, window_bounds = array<i64: 2, 128>}, {pipeline_mode = #tpu.pipeline_mode<synchronous>, transform_indices = @transform_10, window_bounds = array<i64: 32, 128>}, {pipeline_mode = #tpu.pipeline_mode<synchronous>, transform_indices = @transform_11, window_bounds = array<i64: 1, 128>}, {pipeline_mode = #tpu.pipeline_mode<synchronous>, transform_indices = @transform_12, window_bounds = array<i64: 2, 128>}]} {
    %c0 = arith.constant 0 : index
    %c0_0 = arith.constant 0 : index
    %0 = vector.load %arg1[%c0, %c0_0] : memref<128x8xf32, #tpu.memory_space<vmem>>, vector<128x8xf32>
    %1 = arith.truncf %0 : vector<128x8xf32> to vector<128x8xbf16>
    %c0_1 = arith.constant 0 : index
    %c0_2 = arith.constant 0 : index
    %2 = vector.load %arg2[%c0_1, %c0_2] : memref<8x32xbf16, #tpu.memory_space<vmem>>, vector<8x32xbf16>
    %cst = arith.constant dense<0.000000e+00> : vector<128x32xf32>
    %3 = tpu.matmul %1, %2, %cst {dimension_numbers = #tpu.dot_dimension_numbers<[1], [0], [0], [1], [0, 0, 1, 1], [], []>} : vector<128x8xbf16>, vector<8x32xbf16>, vector<128x32xf32> -> vector<128x32xf32>
    %c0_3 = arith.constant 0 : index
    %c0_4 = arith.constant 0 : index
    %4 = vector.load %arg3[%c0_3, %c0_4] : memref<1x32xf32, #tpu.memory_space<vmem>>, vector<1x32xf32>
    %5 = vector.broadcast %4 : vector<1x32xf32> to vector<128x32xf32>
    %6 = arith.addf %3, %5 : vector<128x32xf32>
    %cst_5 = arith.constant 0.000000e+00 : f32
    %7 = vector.broadcast %cst_5 : f32 to vector<128x32xf32>
    %8 = arith.maximumf %6, %7 : vector<128x32xf32>
    %9 = arith.truncf %8 : vector<128x32xf32> to vector<128x32xbf16>
    %c0_6 = arith.constant 0 : index
    %c0_7 = arith.constant 0 : index
    %10 = vector.load %arg4[%c0_6, %c0_7] : memref<32x32xbf16, #tpu.memory_space<vmem>>, vector<32x32xbf16>
    %cst_8 = arith.constant dense<0.000000e+00> : vector<128x32xf32>
    %11 = tpu.matmul %9, %10, %cst_8 {dimension_numbers = #tpu.dot_dimension_numbers<[1], [0], [0], [1], [0, 0, 1, 1], [], []>} : vector<128x32xbf16>, vector<32x32xbf16>, vector<128x32xf32> -> vector<128x32xf32>
    %c0_9 = arith.constant 0 : index
    %c0_10 = arith.constant 0 : index
    %12 = vector.load %arg5[%c0_9, %c0_10] : memref<1x32xf32, #tpu.memory_space<vmem>>, vector<1x32xf32>
    %13 = vector.broadcast %12 : vector<1x32xf32> to vector<128x32xf32>
    %14 = arith.addf %11, %13 : vector<128x32xf32>
    %cst_11 = arith.constant 0.000000e+00 : f32
    %15 = vector.broadcast %cst_11 : f32 to vector<128x32xf32>
    %16 = arith.maximumf %14, %15 : vector<128x32xf32>
    %17 = tpu.iota {dimensions = array<i32: 0>} : vector<128x1xi32>
    %c49_i32 = arith.constant 49 : i32
    %18 = vector.broadcast %c49_i32 : i32 to vector<128x1xi32>
    %19 = arith.cmpi sge, %17, %18 : vector<128x1xi32>
    %20 = arith.extui %19 : vector<128x1xi1> to vector<128x1xi32>
    %c49_i32_12 = arith.constant 49 : i32
    %21 = vector.broadcast %c49_i32_12 : i32 to vector<128x1xi32>
    %22 = arith.muli %21, %20 : vector<128x1xi32>
    %23 = arith.subi %17, %22 : vector<128x1xi32>
    %c98_i32 = arith.constant 98 : i32
    %24 = vector.broadcast %c98_i32 : i32 to vector<128x1xi32>
    %25 = arith.cmpi sge, %17, %24 : vector<128x1xi32>
    %26 = arith.extui %25 : vector<128x1xi1> to vector<128x1xi32>
    %c49_i32_13 = arith.constant 49 : i32
    %27 = vector.broadcast %c49_i32_13 : i32 to vector<128x1xi32>
    %28 = arith.muli %27, %26 : vector<128x1xi32>
    %29 = arith.subi %23, %28 : vector<128x1xi32>
    %c0_i32 = arith.constant 0 : i32
    %30 = vector.broadcast %c0_i32 : i32 to vector<128x1xi32>
    %c7_i32 = arith.constant 7 : i32
    %31 = vector.broadcast %c7_i32 : i32 to vector<128x1xi32>
    %32 = arith.cmpi sge, %29, %31 : vector<128x1xi32>
    %33 = arith.extui %32 : vector<128x1xi1> to vector<128x1xi32>
    %34 = arith.addi %30, %33 : vector<128x1xi32>
    %c14_i32 = arith.constant 14 : i32
    %35 = vector.broadcast %c14_i32 : i32 to vector<128x1xi32>
    %36 = arith.cmpi sge, %29, %35 : vector<128x1xi32>
    %37 = arith.extui %36 : vector<128x1xi1> to vector<128x1xi32>
    %38 = arith.addi %34, %37 : vector<128x1xi32>
    %c21_i32 = arith.constant 21 : i32
    %39 = vector.broadcast %c21_i32 : i32 to vector<128x1xi32>
    %40 = arith.cmpi sge, %29, %39 : vector<128x1xi32>
    %41 = arith.extui %40 : vector<128x1xi1> to vector<128x1xi32>
    %42 = arith.addi %38, %41 : vector<128x1xi32>
    %c28_i32 = arith.constant 28 : i32
    %43 = vector.broadcast %c28_i32 : i32 to vector<128x1xi32>
    %44 = arith.cmpi sge, %29, %43 : vector<128x1xi32>
    %45 = arith.extui %44 : vector<128x1xi1> to vector<128x1xi32>
    %46 = arith.addi %42, %45 : vector<128x1xi32>
    %c35_i32 = arith.constant 35 : i32
    %47 = vector.broadcast %c35_i32 : i32 to vector<128x1xi32>
    %48 = arith.cmpi sge, %29, %47 : vector<128x1xi32>
    %49 = arith.extui %48 : vector<128x1xi1> to vector<128x1xi32>
    %50 = arith.addi %46, %49 : vector<128x1xi32>
    %c42_i32 = arith.constant 42 : i32
    %51 = vector.broadcast %c42_i32 : i32 to vector<128x1xi32>
    %52 = arith.cmpi sge, %29, %51 : vector<128x1xi32>
    %53 = arith.extui %52 : vector<128x1xi1> to vector<128x1xi32>
    %54 = arith.addi %50, %53 : vector<128x1xi32>
    %c7_i32_14 = arith.constant 7 : i32
    %55 = vector.broadcast %c7_i32_14 : i32 to vector<128x1xi32>
    %56 = arith.muli %55, %54 : vector<128x1xi32>
    %57 = arith.subi %29, %56 : vector<128x1xi32>
    %c98_i32_15 = arith.constant 98 : i32
    %58 = vector.broadcast %c98_i32_15 : i32 to vector<128x1xi32>
    %59 = arith.cmpi slt, %17, %58 : vector<128x1xi32>
    %60 = arith.extui %59 : vector<128x1xi1> to vector<128x1xi32>
    %61 = arith.sitofp %60 : vector<128x1xi32> to vector<128x1xf32>
    %c-1_i32 = arith.constant -1 : i32
    %62 = vector.broadcast %c-1_i32 : i32 to vector<128x1xi32>
    %63 = arith.addi %54, %62 : vector<128x1xi32>
    %c0_i32_16 = arith.constant 0 : i32
    %64 = vector.broadcast %c0_i32_16 : i32 to vector<128x1xi32>
    %65 = arith.cmpi sge, %63, %64 : vector<128x1xi32>
    %c-1_i32_17 = arith.constant -1 : i32
    %66 = vector.broadcast %c-1_i32_17 : i32 to vector<128x1xi32>
    %67 = arith.addi %54, %66 : vector<128x1xi32>
    %c7_i32_18 = arith.constant 7 : i32
    %68 = vector.broadcast %c7_i32_18 : i32 to vector<128x1xi32>
    %69 = arith.cmpi slt, %67, %68 : vector<128x1xi32>
    %70 = arith.andi %65, %69 : vector<128x1xi1>
    %c-1_i32_19 = arith.constant -1 : i32
    %71 = vector.broadcast %c-1_i32_19 : i32 to vector<128x1xi32>
    %72 = arith.addi %57, %71 : vector<128x1xi32>
    %c0_i32_20 = arith.constant 0 : i32
    %73 = vector.broadcast %c0_i32_20 : i32 to vector<128x1xi32>
    %74 = arith.cmpi sge, %72, %73 : vector<128x1xi32>
    %75 = arith.andi %70, %74 : vector<128x1xi1>
    %c-1_i32_21 = arith.constant -1 : i32
    %76 = vector.broadcast %c-1_i32_21 : i32 to vector<128x1xi32>
    %77 = arith.addi %57, %76 : vector<128x1xi32>
    %c7_i32_22 = arith.constant 7 : i32
    %78 = vector.broadcast %c7_i32_22 : i32 to vector<128x1xi32>
    %79 = arith.cmpi slt, %77, %78 : vector<128x1xi32>
    %80 = arith.andi %75, %79 : vector<128x1xi1>
    %81 = arith.extui %80 : vector<128x1xi1> to vector<128x1xi32>
    %82 = arith.sitofp %81 : vector<128x1xi32> to vector<128x1xf32>
    %83 = arith.mulf %61, %82 : vector<128x1xf32>
    %c8_i32 = arith.constant 8 : i32
    %84 = tpu.dynamic_rotate %16 by %c8_i32 dim 0 : vector<128x32xf32>, i32 -> vector<128x32xf32>
    %85 = vector.broadcast %83 : vector<128x1xf32> to vector<128x32xf32>
    %86 = arith.mulf %84, %85 : vector<128x32xf32>
    %c0_23 = arith.constant 0 : index
    %c0_24 = arith.constant 0 : index
    %87 = vector.load %arg14[%c0_23, %c0_24] : memref<128x288xf32, #tpu.memory_space<vmem>>, vector<128x32xf32>
    tpu.vector_store %arg14[%c0_23, %c0_24], %86 {strides = array<i32>} : memref<128x288xf32, #tpu.memory_space<vmem>>, vector<128x32xf32>,
    %c-1_i32_25 = arith.constant -1 : i32
    %88 = vector.broadcast %c-1_i32_25 : i32 to vector<128x1xi32>
    %89 = arith.addi %54, %88 : vector<128x1xi32>
    %c0_i32_26 = arith.constant 0 : i32
    %90 = vector.broadcast %c0_i32_26 : i32 to vector<128x1xi32>
    %91 = arith.cmpi sge, %89, %90 : vector<128x1xi32>
    %c-1_i32_27 = arith.constant -1 : i32
    %92 = vector.broadcast %c-1_i32_27 : i32 to vector<128x1xi32>
    %93 = arith.addi %54, %92 : vector<128x1xi32>
    %c7_i32_28 = arith.constant 7 : i32
    %94 = vector.broadcast %c7_i32_28 : i32 to vector<128x1xi32>
    %95 = arith.cmpi slt, %93, %94 : vector<128x1xi32>
    %96 = arith.andi %91, %95 : vector<128x1xi1>
    %c0_i32_29 = arith.constant 0 : i32
    %97 = vector.broadcast %c0_i32_29 : i32 to vector<128x1xi32>
    %98 = arith.addi %57, %97 : vector<128x1xi32>
    %c0_i32_30 = arith.constant 0 : i32
    %99 = vector.broadcast %c0_i32_30 : i32 to vector<128x1xi32>
    %100 = arith.cmpi sge, %98, %99 : vector<128x1xi32>
    %101 = arith.andi %96, %100 : vector<128x1xi1>
    %c0_i32_31 = arith.constant 0 : i32
    %102 = vector.broadcast %c0_i32_31 : i32 to vector<128x1xi32>
    %103 = arith.addi %57, %102 : vector<128x1xi32>
    %c7_i32_32 = arith.constant 7 : i32
    %104 = vector.broadcast %c7_i32_32 : i32 to vector<128x1xi32>
    %105 = arith.cmpi slt, %103, %104 : vector<128x1xi32>
    %106 = arith.andi %101, %105 : vector<128x1xi1>
    %107 = arith.extui %106 : vector<128x1xi1> to vector<128x1xi32>
    %108 = arith.sitofp %107 : vector<128x1xi32> to vector<128x1xf32>
    %109 = arith.mulf %61, %108 : vector<128x1xf32>
    %c7_i32_33 = arith.constant 7 : i32
    %110 = tpu.dynamic_rotate %16 by %c7_i32_33 dim 0 : vector<128x32xf32>, i32 -> vector<128x32xf32>
    %111 = vector.broadcast %109 : vector<128x1xf32> to vector<128x32xf32>
    %112 = arith.mulf %110, %111 : vector<128x32xf32>
    %c0_34 = arith.constant 0 : index
    %c32 = arith.constant 32 : index
    %113 = vector.load %arg14[%c0_34, %c32] : memref<128x288xf32, #tpu.memory_space<vmem>>, vector<128x32xf32>
    tpu.vector_store %arg14[%c0_34, %c32], %112 {strides = array<i32>} : memref<128x288xf32, #tpu.memory_space<vmem>>, vector<128x32xf32>,
    %c-1_i32_35 = arith.constant -1 : i32
    %114 = vector.broadcast %c-1_i32_35 : i32 to vector<128x1xi32>
    %115 = arith.addi %54, %114 : vector<128x1xi32>
    %c0_i32_36 = arith.constant 0 : i32
    %116 = vector.broadcast %c0_i32_36 : i32 to vector<128x1xi32>
    %117 = arith.cmpi sge, %115, %116 : vector<128x1xi32>
    %c-1_i32_37 = arith.constant -1 : i32
    %118 = vector.broadcast %c-1_i32_37 : i32 to vector<128x1xi32>
    %119 = arith.addi %54, %118 : vector<128x1xi32>
    %c7_i32_38 = arith.constant 7 : i32
    %120 = vector.broadcast %c7_i32_38 : i32 to vector<128x1xi32>
    %121 = arith.cmpi slt, %119, %120 : vector<128x1xi32>
    %122 = arith.andi %117, %121 : vector<128x1xi1>
    %c1_i32 = arith.constant 1 : i32
    %123 = vector.broadcast %c1_i32 : i32 to vector<128x1xi32>
    %124 = arith.addi %57, %123 : vector<128x1xi32>
    %c0_i32_39 = arith.constant 0 : i32
    %125 = vector.broadcast %c0_i32_39 : i32 to vector<128x1xi32>
    %126 = arith.cmpi sge, %124, %125 : vector<128x1xi32>
    %127 = arith.andi %122, %126 : vector<128x1xi1>
    %c1_i32_40 = arith.constant 1 : i32
    %128 = vector.broadcast %c1_i32_40 : i32 to vector<128x1xi32>
    %129 = arith.addi %57, %128 : vector<128x1xi32>
    %c7_i32_41 = arith.constant 7 : i32
    %130 = vector.broadcast %c7_i32_41 : i32 to vector<128x1xi32>
    %131 = arith.cmpi slt, %129, %130 : vector<128x1xi32>
    %132 = arith.andi %127, %131 : vector<128x1xi1>
    %133 = arith.extui %132 : vector<128x1xi1> to vector<128x1xi32>
    %134 = arith.sitofp %133 : vector<128x1xi32> to vector<128x1xf32>
    %135 = arith.mulf %61, %134 : vector<128x1xf32>
    %c6_i32 = arith.constant 6 : i32
    %136 = tpu.dynamic_rotate %16 by %c6_i32 dim 0 : vector<128x32xf32>, i32 -> vector<128x32xf32>
    %137 = vector.broadcast %135 : vector<128x1xf32> to vector<128x32xf32>
    %138 = arith.mulf %136, %137 : vector<128x32xf32>
    %c0_42 = arith.constant 0 : index
    %c64 = arith.constant 64 : index
    %139 = vector.load %arg14[%c0_42, %c64] : memref<128x288xf32, #tpu.memory_space<vmem>>, vector<128x32xf32>
    tpu.vector_store %arg14[%c0_42, %c64], %138 {strides = array<i32>} : memref<128x288xf32, #tpu.memory_space<vmem>>, vector<128x32xf32>,
    %c0_i32_43 = arith.constant 0 : i32
    %140 = vector.broadcast %c0_i32_43 : i32 to vector<128x1xi32>
    %141 = arith.addi %54, %140 : vector<128x1xi32>
    %c0_i32_44 = arith.constant 0 : i32
    %142 = vector.broadcast %c0_i32_44 : i32 to vector<128x1xi32>
    %143 = arith.cmpi sge, %141, %142 : vector<128x1xi32>
    %c0_i32_45 = arith.constant 0 : i32
    %144 = vector.broadcast %c0_i32_45 : i32 to vector<128x1xi32>
    %145 = arith.addi %54, %144 : vector<128x1xi32>
    %c7_i32_46 = arith.constant 7 : i32
    %146 = vector.broadcast %c7_i32_46 : i32 to vector<128x1xi32>
    %147 = arith.cmpi slt, %145, %146 : vector<128x1xi32>
    %148 = arith.andi %143, %147 : vector<128x1xi1>
    %c-1_i32_47 = arith.constant -1 : i32
    %149 = vector.broadcast %c-1_i32_47 : i32 to vector<128x1xi32>
    %150 = arith.addi %57, %149 : vector<128x1xi32>
    %c0_i32_48 = arith.constant 0 : i32
    %151 = vector.broadcast %c0_i32_48 : i32 to vector<128x1xi32>
    %152 = arith.cmpi sge, %150, %151 : vector<128x1xi32>
    %153 = arith.andi %148, %152 : vector<128x1xi1>
    %c-1_i32_49 = arith.constant -1 : i32
    %154 = vector.broadcast %c-1_i32_49 : i32 to vector<128x1xi32>
    %155 = arith.addi %57, %154 : vector<128x1xi32>
    %c7_i32_50 = arith.constant 7 : i32
    %156 = vector.broadcast %c7_i32_50 : i32 to vector<128x1xi32>
    %157 = arith.cmpi slt, %155, %156 : vector<128x1xi32>
    %158 = arith.andi %153, %157 : vector<128x1xi1>
    %159 = arith.extui %158 : vector<128x1xi1> to vector<128x1xi32>
    %160 = arith.sitofp %159 : vector<128x1xi32> to vector<128x1xf32>
    %161 = arith.mulf %61, %160 : vector<128x1xf32>
    %c1_i32_51 = arith.constant 1 : i32
    %162 = tpu.dynamic_rotate %16 by %c1_i32_51 dim 0 : vector<128x32xf32>, i32 -> vector<128x32xf32>
    %163 = vector.broadcast %161 : vector<128x1xf32> to vector<128x32xf32>
    %164 = arith.mulf %162, %163 : vector<128x32xf32>
    %c0_52 = arith.constant 0 : index
    %c96 = arith.constant 96 : index
    %165 = vector.load %arg14[%c0_52, %c96] : memref<128x288xf32, #tpu.memory_space<vmem>>, vector<128x32xf32>
    tpu.vector_store %arg14[%c0_52, %c96], %164 {strides = array<i32>} : memref<128x288xf32, #tpu.memory_space<vmem>>, vector<128x32xf32>,
    %c0_i32_53 = arith.constant 0 : i32
    %166 = vector.broadcast %c0_i32_53 : i32 to vector<128x1xi32>
    %167 = arith.addi %54, %166 : vector<128x1xi32>
    %c0_i32_54 = arith.constant 0 : i32
    %168 = vector.broadcast %c0_i32_54 : i32 to vector<128x1xi32>
    %169 = arith.cmpi sge, %167, %168 : vector<128x1xi32>
    %c0_i32_55 = arith.constant 0 : i32
    %170 = vector.broadcast %c0_i32_55 : i32 to vector<128x1xi32>
    %171 = arith.addi %54, %170 : vector<128x1xi32>
    %c7_i32_56 = arith.constant 7 : i32
    %172 = vector.broadcast %c7_i32_56 : i32 to vector<128x1xi32>
    %173 = arith.cmpi slt, %171, %172 : vector<128x1xi32>
    %174 = arith.andi %169, %173 : vector<128x1xi1>
    %c0_i32_57 = arith.constant 0 : i32
    %175 = vector.broadcast %c0_i32_57 : i32 to vector<128x1xi32>
    %176 = arith.addi %57, %175 : vector<128x1xi32>
    %c0_i32_58 = arith.constant 0 : i32
    %177 = vector.broadcast %c0_i32_58 : i32 to vector<128x1xi32>
    %178 = arith.cmpi sge, %176, %177 : vector<128x1xi32>
    %179 = arith.andi %174, %178 : vector<128x1xi1>
    %c0_i32_59 = arith.constant 0 : i32
    %180 = vector.broadcast %c0_i32_59 : i32 to vector<128x1xi32>
    %181 = arith.addi %57, %180 : vector<128x1xi32>
    %c7_i32_60 = arith.constant 7 : i32
    %182 = vector.broadcast %c7_i32_60 : i32 to vector<128x1xi32>
    %183 = arith.cmpi slt, %181, %182 : vector<128x1xi32>
    %184 = arith.andi %179, %183 : vector<128x1xi1>
    %185 = arith.extui %184 : vector<128x1xi1> to vector<128x1xi32>
    %186 = arith.sitofp %185 : vector<128x1xi32> to vector<128x1xf32>
    %187 = arith.mulf %61, %186 : vector<128x1xf32>
    %188 = vector.broadcast %187 : vector<128x1xf32> to vector<128x32xf32>
    %189 = arith.mulf %16, %188 : vector<128x32xf32>
    %c0_61 = arith.constant 0 : index
    %c128 = arith.constant 128 : index
    %190 = vector.load %arg14[%c0_61, %c128] : memref<128x288xf32, #tpu.memory_space<vmem>>, vector<128x32xf32>
    tpu.vector_store %arg14[%c0_61, %c128], %189 {strides = array<i32>} : memref<128x288xf32, #tpu.memory_space<vmem>>, vector<128x32xf32>,
    %c0_i32_62 = arith.constant 0 : i32
    %191 = vector.broadcast %c0_i32_62 : i32 to vector<128x1xi32>
    %192 = arith.addi %54, %191 : vector<128x1xi32>
    %c0_i32_63 = arith.constant 0 : i32
    %193 = vector.broadcast %c0_i32_63 : i32 to vector<128x1xi32>
    %194 = arith.cmpi sge, %192, %193 : vector<128x1xi32>
    %c0_i32_64 = arith.constant 0 : i32
    %195 = vector.broadcast %c0_i32_64 : i32 to vector<128x1xi32>
    %196 = arith.addi %54, %195 : vector<128x1xi32>
    %c7_i32_65 = arith.constant 7 : i32
    %197 = vector.broadcast %c7_i32_65 : i32 to vector<128x1xi32>
    %198 = arith.cmpi slt, %196, %197 : vector<128x1xi32>
    %199 = arith.andi %194, %198 : vector<128x1xi1>
    %c1_i32_66 = arith.constant 1 : i32
    %200 = vector.broadcast %c1_i32_66 : i32 to vector<128x1xi32>
    %201 = arith.addi %57, %200 : vector<128x1xi32>
    %c0_i32_67 = arith.constant 0 : i32
    %202 = vector.broadcast %c0_i32_67 : i32 to vector<128x1xi32>
    %203 = arith.cmpi sge, %201, %202 : vector<128x1xi32>
    %204 = arith.andi %199, %203 : vector<128x1xi1>
    %c1_i32_68 = arith.constant 1 : i32
    %205 = vector.broadcast %c1_i32_68 : i32 to vector<128x1xi32>
    %206 = arith.addi %57, %205 : vector<128x1xi32>
    %c7_i32_69 = arith.constant 7 : i32
    %207 = vector.broadcast %c7_i32_69 : i32 to vector<128x1xi32>
    %208 = arith.cmpi slt, %206, %207 : vector<128x1xi32>
    %209 = arith.andi %204, %208 : vector<128x1xi1>
    %210 = arith.extui %209 : vector<128x1xi1> to vector<128x1xi32>
    %211 = arith.sitofp %210 : vector<128x1xi32> to vector<128x1xf32>
    %212 = arith.mulf %61, %211 : vector<128x1xf32>
    %c127_i32 = arith.constant 127 : i32
    %213 = tpu.dynamic_rotate %16 by %c127_i32 dim 0 : vector<128x32xf32>, i32 -> vector<128x32xf32>
    %214 = vector.broadcast %212 : vector<128x1xf32> to vector<128x32xf32>
    %215 = arith.mulf %213, %214 : vector<128x32xf32>
    %c0_70 = arith.constant 0 : index
    %c160 = arith.constant 160 : index
    %216 = vector.load %arg14[%c0_70, %c160] : memref<128x288xf32, #tpu.memory_space<vmem>>, vector<128x32xf32>
    tpu.vector_store %arg14[%c0_70, %c160], %215 {strides = array<i32>} : memref<128x288xf32, #tpu.memory_space<vmem>>, vector<128x32xf32>,
    %c1_i32_71 = arith.constant 1 : i32
    %217 = vector.broadcast %c1_i32_71 : i32 to vector<128x1xi32>
    %218 = arith.addi %54, %217 : vector<128x1xi32>
    %c0_i32_72 = arith.constant 0 : i32
    %219 = vector.broadcast %c0_i32_72 : i32 to vector<128x1xi32>
    %220 = arith.cmpi sge, %218, %219 : vector<128x1xi32>
    %c1_i32_73 = arith.constant 1 : i32
    %221 = vector.broadcast %c1_i32_73 : i32 to vector<128x1xi32>
    %222 = arith.addi %54, %221 : vector<128x1xi32>
    %c7_i32_74 = arith.constant 7 : i32
    %223 = vector.broadcast %c7_i32_74 : i32 to vector<128x1xi32>
    %224 = arith.cmpi slt, %222, %223 : vector<128x1xi32>
    %225 = arith.andi %220, %224 : vector<128x1xi1>
    %c-1_i32_75 = arith.constant -1 : i32
    %226 = vector.broadcast %c-1_i32_75 : i32 to vector<128x1xi32>
    %227 = arith.addi %57, %226 : vector<128x1xi32>
    %c0_i32_76 = arith.constant 0 : i32
    %228 = vector.broadcast %c0_i32_76 : i32 to vector<128x1xi32>
    %229 = arith.cmpi sge, %227, %228 : vector<128x1xi32>
    %230 = arith.andi %225, %229 : vector<128x1xi1>
    %c-1_i32_77 = arith.constant -1 : i32
    %231 = vector.broadcast %c-1_i32_77 : i32 to vector<128x1xi32>
    %232 = arith.addi %57, %231 : vector<128x1xi32>
    %c7_i32_78 = arith.constant 7 : i32
    %233 = vector.broadcast %c7_i32_78 : i32 to vector<128x1xi32>
    %234 = arith.cmpi slt, %232, %233 : vector<128x1xi32>
    %235 = arith.andi %230, %234 : vector<128x1xi1>
    %236 = arith.extui %235 : vector<128x1xi1> to vector<128x1xi32>
    %237 = arith.sitofp %236 : vector<128x1xi32> to vector<128x1xf32>
    %238 = arith.mulf %61, %237 : vector<128x1xf32>
    %c122_i32 = arith.constant 122 : i32
    %239 = tpu.dynamic_rotate %16 by %c122_i32 dim 0 : vector<128x32xf32>, i32 -> vector<128x32xf32>
    %240 = vector.broadcast %238 : vector<128x1xf32> to vector<128x32xf32>
    %241 = arith.mulf %239, %240 : vector<128x32xf32>
    %c0_79 = arith.constant 0 : index
    %c192 = arith.constant 192 : index
    %242 = vector.load %arg14[%c0_79, %c192] : memref<128x288xf32, #tpu.memory_space<vmem>>, vector<128x32xf32>
    tpu.vector_store %arg14[%c0_79, %c192], %241 {strides = array<i32>} : memref<128x288xf32, #tpu.memory_space<vmem>>, vector<128x32xf32>,
    %c1_i32_80 = arith.constant 1 : i32
    %243 = vector.broadcast %c1_i32_80 : i32 to vector<128x1xi32>
    %244 = arith.addi %54, %243 : vector<128x1xi32>
    %c0_i32_81 = arith.constant 0 : i32
    %245 = vector.broadcast %c0_i32_81 : i32 to vector<128x1xi32>
    %246 = arith.cmpi sge, %244, %245 : vector<128x1xi32>
    %c1_i32_82 = arith.constant 1 : i32
    %247 = vector.broadcast %c1_i32_82 : i32 to vector<128x1xi32>
    %248 = arith.addi %54, %247 : vector<128x1xi32>
    %c7_i32_83 = arith.constant 7 : i32
    %249 = vector.broadcast %c7_i32_83 : i32 to vector<128x1xi32>
    %250 = arith.cmpi slt, %248, %249 : vector<128x1xi32>
    %251 = arith.andi %246, %250 : vector<128x1xi1>
    %c0_i32_84 = arith.constant 0 : i32
    %252 = vector.broadcast %c0_i32_84 : i32 to vector<128x1xi32>
    %253 = arith.addi %57, %252 : vector<128x1xi32>
    %c0_i32_85 = arith.constant 0 : i32
    %254 = vector.broadcast %c0_i32_85 : i32 to vector<128x1xi32>
    %255 = arith.cmpi sge, %253, %254 : vector<128x1xi32>
    %256 = arith.andi %251, %255 : vector<128x1xi1>
    %c0_i32_86 = arith.constant 0 : i32
    %257 = vector.broadcast %c0_i32_86 : i32 to vector<128x1xi32>
    %258 = arith.addi %57, %257 : vector<128x1xi32>
    %c7_i32_87 = arith.constant 7 : i32
    %259 = vector.broadcast %c7_i32_87 : i32 to vector<128x1xi32>
    %260 = arith.cmpi slt, %258, %259 : vector<128x1xi32>
    %261 = arith.andi %256, %260 : vector<128x1xi1>
    %262 = arith.extui %261 : vector<128x1xi1> to vector<128x1xi32>
    %263 = arith.sitofp %262 : vector<128x1xi32> to vector<128x1xf32>
    %264 = arith.mulf %61, %263 : vector<128x1xf32>
    %c121_i32 = arith.constant 121 : i32
    %265 = tpu.dynamic_rotate %16 by %c121_i32 dim 0 : vector<128x32xf32>, i32 -> vector<128x32xf32>
    %266 = vector.broadcast %264 : vector<128x1xf32> to vector<128x32xf32>
    %267 = arith.mulf %265, %266 : vector<128x32xf32>
    %c0_88 = arith.constant 0 : index
    %c224 = arith.constant 224 : index
    %268 = vector.load %arg14[%c0_88, %c224] : memref<128x288xf32, #tpu.memory_space<vmem>>, vector<128x32xf32>
    tpu.vector_store %arg14[%c0_88, %c224], %267 {strides = array<i32>} : memref<128x288xf32, #tpu.memory_space<vmem>>, vector<128x32xf32>,
    %c1_i32_89 = arith.constant 1 : i32
    %269 = vector.broadcast %c1_i32_89 : i32 to vector<128x1xi32>
    %270 = arith.addi %54, %269 : vector<128x1xi32>
    %c0_i32_90 = arith.constant 0 : i32
    %271 = vector.broadcast %c0_i32_90 : i32 to vector<128x1xi32>
    %272 = arith.cmpi sge, %270, %271 : vector<128x1xi32>
    %c1_i32_91 = arith.constant 1 : i32
    %273 = vector.broadcast %c1_i32_91 : i32 to vector<128x1xi32>
    %274 = arith.addi %54, %273 : vector<128x1xi32>
    %c7_i32_92 = arith.constant 7 : i32
    %275 = vector.broadcast %c7_i32_92 : i32 to vector<128x1xi32>
    %276 = arith.cmpi slt, %274, %275 : vector<128x1xi32>
    %277 = arith.andi %272, %276 : vector<128x1xi1>
    %c1_i32_93 = arith.constant 1 : i32
    %278 = vector.broadcast %c1_i32_93 : i32 to vector<128x1xi32>
    %279 = arith.addi %57, %278 : vector<128x1xi32>
    %c0_i32_94 = arith.constant 0 : i32
    %280 = vector.broadcast %c0_i32_94 : i32 to vector<128x1xi32>
    %281 = arith.cmpi sge, %279, %280 : vector<128x1xi32>
    %282 = arith.andi %277, %281 : vector<128x1xi1>
    %c1_i32_95 = arith.constant 1 : i32
    %283 = vector.broadcast %c1_i32_95 : i32 to vector<128x1xi32>
    %284 = arith.addi %57, %283 : vector<128x1xi32>
    %c7_i32_96 = arith.constant 7 : i32
    %285 = vector.broadcast %c7_i32_96 : i32 to vector<128x1xi32>
    %286 = arith.cmpi slt, %284, %285 : vector<128x1xi32>
    %287 = arith.andi %282, %286 : vector<128x1xi1>
    %288 = arith.extui %287 : vector<128x1xi1> to vector<128x1xi32>
    %289 = arith.sitofp %288 : vector<128x1xi32> to vector<128x1xf32>
    %290 = arith.mulf %61, %289 : vector<128x1xf32>
    %c120_i32 = arith.constant 120 : i32
    %291 = tpu.dynamic_rotate %16 by %c120_i32 dim 0 : vector<128x32xf32>, i32 -> vector<128x32xf32>
    %292 = vector.broadcast %290 : vector<128x1xf32> to vector<128x32xf32>
    %293 = arith.mulf %291, %292 : vector<128x32xf32>
    %c0_97 = arith.constant 0 : index
    %c256 = arith.constant 256 : index
    %294 = vector.load %arg14[%c0_97, %c256] : memref<128x288xf32, #tpu.memory_space<vmem>>, vector<128x32xf32>
    tpu.vector_store %arg14[%c0_97, %c256], %293 {strides = array<i32>} : memref<128x288xf32, #tpu.memory_space<vmem>>, vector<128x32xf32>,
    %c0_98 = arith.constant 0 : index
    %c0_99 = arith.constant 0 : index
    %295 = vector.load %arg14[%c0_98, %c0_99] : memref<128x288xf32, #tpu.memory_space<vmem>>, vector<128x288xf32>
    %296 = arith.truncf %295 : vector<128x288xf32> to vector<128x288xbf16>
    %c0_100 = arith.constant 0 : index
    %c0_101 = arith.constant 0 : index
    %297 = vector.load %arg6[%c0_100, %c0_101] : memref<288x32xbf16, #tpu.memory_space<vmem>>, vector<288x32xbf16>
    %cst_102 = arith.constant dense<0.000000e+00> : vector<128x32xf32>
    %298 = tpu.matmul %296, %297, %cst_102 {dimension_numbers = #tpu.dot_dimension_numbers<[1], [0], [0], [1], [0, 0, 1, 1], [], []>} : vector<128x288xbf16>, vector<288x32xbf16>, vector<128x32xf32> -> vector<128x32xf32>
    %c0_103 = arith.constant 0 : index
    %c0_104 = arith.constant 0 : index
    %299 = vector.load %arg7[%c0_103, %c0_104] : memref<1x32xf32, #tpu.memory_space<vmem>>, vector<1x32xf32>
    %300 = vector.broadcast %299 : vector<1x32xf32> to vector<128x32xf32>
    %301 = arith.addf %298, %300 : vector<128x32xf32>
    %cst_105 = arith.constant 0.000000e+00 : f32
    %302 = vector.broadcast %cst_105 : f32 to vector<128x32xf32>
    %303 = arith.maximumf %301, %302 : vector<128x32xf32>
    %304 = arith.truncf %303 : vector<128x32xf32> to vector<128x32xbf16>
    %c0_106 = arith.constant 0 : index
    %c0_107 = arith.constant 0 : index
    %305 = vector.load %arg8[%c0_106, %c0_107] : memref<32x32xbf16, #tpu.memory_space<vmem>>, vector<32x32xbf16>
    %cst_108 = arith.constant dense<0.000000e+00> : vector<128x32xf32>
    %306 = tpu.matmul %304, %305, %cst_108 {dimension_numbers = #tpu.dot_dimension_numbers<[1], [0], [0], [1], [0, 0, 1, 1], [], []>} : vector<128x32xbf16>, vector<32x32xbf16>, vector<128x32xf32> -> vector<128x32xf32>
    %c0_109 = arith.constant 0 : index
    %c0_110 = arith.constant 0 : index
    %307 = vector.load %arg9[%c0_109, %c0_110] : memref<1x32xf32, #tpu.memory_space<vmem>>, vector<1x32xf32>
    %308 = vector.broadcast %307 : vector<1x32xf32> to vector<128x32xf32>
    %309 = arith.addf %306, %308 : vector<128x32xf32>
    %310 = arith.addf %309, %8 : vector<128x32xf32>
    %cst_111 = arith.constant 0.000000e+00 : f32
    %311 = vector.broadcast %cst_111 : f32 to vector<128x32xf32>
    %312 = arith.maximumf %310, %311 : vector<128x32xf32>
    %c0_112 = arith.constant 0 : index
    %c0_113 = arith.constant 0 : index
    %313 = vector.load %arg10[%c0_112, %c0_113] : memref<2x128xbf16, #tpu.memory_space<vmem>>, vector<2x128xbf16>
    %314 = arith.truncf %312 : vector<128x32xf32> to vector<128x32xbf16>
    %cst_114 = arith.constant dense<0.000000e+00> : vector<2x32xf32>
    %315 = tpu.matmul %313, %314, %cst_114 {dimension_numbers = #tpu.dot_dimension_numbers<[1], [0], [0], [1], [0, 0, 1, 1], [], []>} : vector<2x128xbf16>, vector<128x32xbf16>, vector<2x32xf32> -> vector<2x32xf32>
    %316 = arith.truncf %315 : vector<2x32xf32> to vector<2x32xbf16>
    %c0_115 = arith.constant 0 : index
    %c0_116 = arith.constant 0 : index
    %317 = vector.load %arg11[%c0_115, %c0_116] : memref<32x128xbf16, #tpu.memory_space<vmem>>, vector<32x128xbf16>
    %cst_117 = arith.constant dense<0.000000e+00> : vector<2x128xf32>
    %318 = tpu.matmul %316, %317, %cst_117 {dimension_numbers = #tpu.dot_dimension_numbers<[1], [0], [0], [1], [0, 0, 1, 1], [], []>} : vector<2x32xbf16>, vector<32x128xbf16>, vector<2x128xf32> -> vector<2x128xf32>
    %c0_118 = arith.constant 0 : index
    %c0_119 = arith.constant 0 : index
    %319 = vector.load %arg12[%c0_118, %c0_119] : memref<1x128xf32, #tpu.memory_space<vmem>>, vector<1x128xf32>
    %320 = vector.broadcast %319 : vector<1x128xf32> to vector<2x128xf32>
    %321 = arith.addf %318, %320 : vector<2x128xf32>
    %322 = arith.negf %321 : vector<2x128xf32>
    %323 = math.exp %322 : vector<2x128xf32>
    %cst_120 = arith.constant 1.000000e+00 : f32
    %324 = vector.broadcast %cst_120 : f32 to vector<2x128xf32>
    %325 = arith.addf %324, %323 : vector<2x128xf32>
    %326 = arith.divf %324, %325 : vector<2x128xf32>
    %c0_121 = arith.constant 0 : index
    %c0_122 = arith.constant 0 : index
    %327 = vector.load %arg13[%c0_121, %c0_122] : memref<2x128xf32, #tpu.memory_space<vmem>>, vector<2x128xf32>
    tpu.vector_store %arg13[%c0_121, %c0_122], %326 {strides = array<i32>} : memref<2x128xf32, #tpu.memory_space<vmem>>, vector<2x128xf32>,
    return
  }
  func.func @transform_0(%arg0: i32) -> (i32, i32) {
    %c0_i32 = arith.constant 0 : i32
    %c0_i32_0 = arith.constant 0 : i32
    %c0_i32_1 = arith.constant 0 : i32
    return %c0_i32, %c0_i32_0 : i32, i32
  }
  func.func @transform_1(%arg0: i32) -> (i32, i32) {
    %c0_i32 = arith.constant 0 : i32
    %c0_i32_0 = arith.constant 0 : i32
    %c0_i32_1 = arith.constant 0 : i32
    return %c0_i32, %c0_i32_0 : i32, i32
  }
  func.func @transform_2(%arg0: i32) -> (i32, i32) {
    %c0_i32 = arith.constant 0 : i32
    %c0_i32_0 = arith.constant 0 : i32
    %c0_i32_1 = arith.constant 0 : i32
    return %c0_i32, %c0_i32_0 : i32, i32
  }
  func.func @transform_3(%arg0: i32) -> (i32, i32) {
    %c0_i32 = arith.constant 0 : i32
    %c0_i32_0 = arith.constant 0 : i32
    %c0_i32_1 = arith.constant 0 : i32
    return %c0_i32, %c0_i32_0 : i32, i32
  }
  func.func @transform_4(%arg0: i32) -> (i32, i32) {
    %c0_i32 = arith.constant 0 : i32
    %c0_i32_0 = arith.constant 0 : i32
    %c0_i32_1 = arith.constant 0 : i32
    return %c0_i32, %c0_i32_0 : i32, i32
  }
  func.func @transform_5(%arg0: i32) -> (i32, i32) {
    %c0_i32 = arith.constant 0 : i32
    %c0_i32_0 = arith.constant 0 : i32
    %c0_i32_1 = arith.constant 0 : i32
    return %c0_i32, %c0_i32_0 : i32, i32
  }
  func.func @transform_6(%arg0: i32) -> (i32, i32) {
    %c0_i32 = arith.constant 0 : i32
    %c0_i32_0 = arith.constant 0 : i32
    %c0_i32_1 = arith.constant 0 : i32
    return %c0_i32, %c0_i32_0 : i32, i32
  }
  func.func @transform_7(%arg0: i32) -> (i32, i32) {
    %c0_i32 = arith.constant 0 : i32
    %c0_i32_0 = arith.constant 0 : i32
    %c0_i32_1 = arith.constant 0 : i32
    return %c0_i32, %c0_i32_0 : i32, i32
  }
  func.func @transform_8(%arg0: i32) -> (i32, i32) {
    %c0_i32 = arith.constant 0 : i32
    %c0_i32_0 = arith.constant 0 : i32
    %c0_i32_1 = arith.constant 0 : i32
    return %c0_i32, %c0_i32_0 : i32, i32
  }
  func.func @transform_9(%arg0: i32) -> (i32, i32) {
    %c0_i32 = arith.constant 0 : i32
    %c0_i32_0 = arith.constant 0 : i32
    %c0_i32_1 = arith.constant 0 : i32
    return %c0_i32, %c0_i32_0 : i32, i32
  }
  func.func @transform_10(%arg0: i32) -> (i32, i32) {
    %c0_i32 = arith.constant 0 : i32
    %c0_i32_0 = arith.constant 0 : i32
    %c0_i32_1 = arith.constant 0 : i32
    return %c0_i32, %c0_i32_0 : i32, i32
  }
  func.func @transform_11(%arg0: i32) -> (i32, i32) {
    %c0_i32 = arith.constant 0 : i32
    %c0_i32_0 = arith.constant 0 : i32
    %c0_i32_1 = arith.constant 0 : i32
    return %c0_i32, %c0_i32_0 : i32, i32
  }
  func.func @transform_12(%arg0: i32) -> (i32, i32) {
    %c0_i32 = arith.constant 0 : i32
    %c0_i32_0 = arith.constant 0 : i32
    %c0_i32_1 = arith.constant 0 : i32
    return %c0_i32, %c0_i32_0 : i32, i32
  }
}

</mosaic_0001>

<bundles_post_ra>
// kernel: tpu_custom_call.1
= control target key start
LH: loop header
LB: loop body
LE: loop exit
PB: predicated region body
PF: predicated region fallthrough
CT: control target
= control target key end

     0   :  { %vm97_vm0 = vcmask 1043456   ;;  %vm72_vm1 = vcmask 64512   ;;  %s7347_s0 = inlined_call_operand.vmem [shape: f32[128,8], index: 0, kind: input, shape index: {}]   ;;  %s7348_s1 = inlined_call_operand.vmem [shape: bf16[8,32], index: 1, kind: input, shape index: {}]   ;;  %s7349_s2 = inlined_call_operand.vmem [shape: f32[1,32], index: 2, kind: input, shape index: {}]   ;;  %s7350_s3 = inlined_call_operand.vmem [shape: bf16[32,32], index: 3, kind: input, shape index: {}]   ;;  %s7351_s4 = inlined_call_operand.vmem [shape: f32[1,32], index: 4, kind: input, shape index: {}]   ;;  %s7352_s5 = inlined_call_operand.vmem [shape: bf16[288,32], index: 5, kind: input, shape index: {}]   ;;  %s7353_s6 = inlined_call_operand.vmem [shape: f32[1,32], index: 6, kind: input, shape index: {}]   ;;  %s7354_s7 = inlined_call_operand.vmem [shape: bf16[32,32], index: 7, kind: input, shape index: {}]   ;;  %s7355_s8 = inlined_call_operand.vmem [shape: f32[1,32], index: 8, kind: input, shape index: {}]   ;;  %s7356_s9 = inlined_call_operand.vmem [shape: bf16[2,128], index: 9, kind: input, shape index: {}]   ;;  %s7357_s10 = inlined_call_operand.vmem [shape: bf16[32,128], index: 10, kind: input, shape index: {}]   ;;  %s7358_s11 = inlined_call_operand.vmem [shape: f32[1,128], index: 11, kind: input, shape index: {}]   ;;  %s7359_s12 = inlined_call_operand.hbm [shape: f32[2,128], index: 12, kind: output, shape index: {}]  }
   0x1   :  { %v67_v0 = vld [vmem:[%s7348_s1] sm:$0xf]  ;;  %v44_v2 = vld [vmem:[%s7347_s0 + $0x8] sm:$0xff]  ;;  %v53_v5 = vld [vmem:[%s7347_s0 + $0x50] sm:$0xff] }
   0x2   :  { %v43_v1 = vld [vmem:[%s7347_s0] sm:$0xff]  ;;  %v99_v3 = vsel %vm97_vm0, %v67_v0, 0  ;;  %v54_v6 = vld [vmem:[%s7347_s0 + $0x58] sm:$0xff] }
   0x3   :  { %v59_v4 = vpack.c.bf16 %v44_v2, %v43_v1  ;;  %108 = vmatpush.bf16.msra.mxu0 %v99_v3  ;;  %3558 = vmatpush.bf16.msra.mxu3 %v99_v3  ;;  %v64_v7 = vpack.c.bf16 %v54_v6, %v53_v5 }
   0x6   :  { %3247 = vmatmul.msk.bf16.vlgmr.msra.gmra.mxu0 %vm72_vm1, %v59_v4  ;;  %3252 = vmatmul.msk.bf16.vlgmr.msra.gmra.mxu3 %vm72_vm1, %v64_v7 }
   0x7   :  { %17 = vsyncpa [#allocation4], 0  ;;  %v45_v8 = vld [vmem:[%s7347_s0 + $0x10] sm:$0xff]  ;;  %v46_v9 = vld [vmem:[%s7347_s0 + $0x18] sm:$0xff]  ;;  %vm7362_vm2 = vcmask 261120   ;;  %s3605_s26 = smov 96  }
   0x8   :  { %v55_v10 = vld [vmem:[%s7347_s0 + $0x60] sm:$0xff]  ;;  %v56_v11 = vld [vmem:[%s7347_s0 + $0x68] sm:$0xff]  ;;  %v60_v12 = vpack.c.bf16 %v46_v9, %v45_v8  ;;  %v57_v16 = vld [vmem:[%s7347_s0 + $0x70] sm:$0xff]  ;;  %s3606_s27 = smov 64   ;;  %s3607_s28 = smov 32  }
   0x9   :  { %v65_v13 = vpack.c.bf16 %v56_v11, %v55_v10  ;;  %v47_v14 = vld [vmem:[%s7347_s0 + $0x20] sm:$0xff]  ;;  %v48_v15 = vld [vmem:[%s7347_s0 + $0x28] sm:$0xff]  ;;  %v58_v17 = vld [vmem:[%s7347_s0 + $0x78] sm:$0xff] }
   0xa   :  { %v61_v18 = vpack.c.bf16 %v48_v15, %v47_v14  ;;  %v66_v19 = vpack.c.bf16 %v58_v17, %v57_v16  ;;  %v49_v20 = vld [vmem:[%s7347_s0 + $0x30] sm:$0xff]  ;;  %v50_v21 = vld [vmem:[%s7347_s0 + $0x38] sm:$0xff]  ;;  %v51_v23 = vld [vmem:[%s7347_s0 + $0x40] sm:$0xff] }
   0xb   :  { %v62_v22 = vpack.c.bf16 %v50_v21, %v49_v20  ;;  %v52_v24 = vld [vmem:[%s7347_s0 + $0x48] sm:$0xff]  ;;  %v3534_v27 = vld [vmem:[%s7350_s3] sm:$0xff]  ;;  %v284_v21 = vlaneseq }
   0xc   :  { %v63_v25 = vpack.c.bf16 %v52_v24, %v51_v23  ;;  %v3535_v26 = vld [vmem:[%s7350_s3 + $0x8] sm:$0xff]  ;;  %v3567_v29 = vld [vmem:[%s7349_s2] ss:$0 sm:$0xff] }
   0xd   :  { %225 = vmatpush.bf16.msra.mxu1 %v3535_v26  ;;  %3559 = vmatpush.bf16.msra.mxu2 %v3535_v26 }
  0x11   :  { %226 = vmatpush.bf16.msra.mxu1 %v3534_v27  ;;  %3560 = vmatpush.bf16.msra.mxu2 %v3534_v27  ;;  %v7391_v27 = vmov 0  }
  0x16   :  { %3248 = vmatmul.msk.bf16.gmra.mxu0 %vm72_vm1, %v60_v12  ;;  %3253 = vmatmul.msk.bf16.gmra.mxu3 %vm72_vm1, %v65_v13 }
  0x26   :  { %3249 = vmatmul.msk.bf16.gmra.mxu0 %vm72_vm1, %v61_v18  ;;  %3254 = vmatmul.msk.bf16.gmra.mxu3 %vm72_vm1, %v66_v19 }
  0x36   :  { %3250 = vmatmul.msk.bf16.gmra.mxu0 %vm72_vm1, %v62_v22  ;;  %v3830_v22 = vshrl.u32 %v284_v21, 7 }
  0x38   :  { %v300_v23 = vadd.s32 120, %v3830_v22  ;;  %v286_v26 = vadd.s32 8, %v3830_v22  ;;  %vm429_vm5 = vcmp.ge.s32.totalorder %v3830_v22, 7 }
  0x3a   :  { %v3279_v24 = vadd.s32 4294967247, %v300_v23  ;;  %vm462_vm4 = vcmp.ge.s32.totalorder %v286_v26, 14  ;;  %v7670_v23 = vmov 0 }
  0x46   :  { %3251 = vmatmul.msk.bf16.gmra.mxu0 %vm72_vm1, %v63_v25  ;;  %v3282_v25 = vadd.s32 4294967247, %v3279_v24 }
  0x48   :  { %vm572_vm3 = vcmp.ge.s32.totalorder %v3282_v25, 28 }
  0x83   :  { %v110_v28 = vpop.f32.mrf.mxu0 }
  0x84   :  { %v3742_v31 = vadd.f32 %v3567_v29, %v110_v28  ;;  %v588_v28 = vsel %vm572_vm3, 1, %v7391_v27 }
  0x86   :  { %7639 = vst [vmem:[#allocation6_spill] sm:$0xff] %v3742_v31  ;;  %v7380_v34 = vmax.f32 %v3742_v31, 0.0 }
  0x89   :  { %v135_v30 = vpop.f32.mrf.mxu3 }
  0x8a   :  { %v3747_v35 = vadd.f32 %v3567_v29, %v135_v30  ;;  %v478_v30 = vsel %vm462_vm4, 1, %v7391_v27 }
  0x8b   :  { %v112_v32 = vpop.f32.mrf.mxu0 }
  0x8c   :  { %v3744_v33 = vadd.f32 %v3567_v29, %v112_v32  ;;  %7641 = vst [vmem:[#allocation8_spill] sm:$0xff] %v3747_v35  ;;  %v7370_v39 = vmax.f32 %v3747_v35, 0.0 }
  0x8e   :  { %7640 = vst [vmem:[#allocation7_spill] sm:$0xff] %v3744_v33  ;;  %v7381_v36 = vmax.f32 %v3744_v33, 0.0 }
  0x90   :  { %v166_v37 = vpack.c.bf16 %v7381_v36, %v7380_v34 }
  0x91   :  { %v137_v38 = vpop.f32.mrf.mxu3 }
  0x92   :  { %v3755_v40 = vadd.f32 %v3567_v29, %v137_v38  ;;  %3263 = vmatmul.msk.bf16.vlgmr.msra.gmra.mxu1 %vm7362_vm2, %v166_v37  ;;  %v494_v37 = vadd.s32 1, %v478_v30 }
  0x93   :  { %v115_v41 = vpop.f32.mrf.mxu0 }
  0x94   :  { %7642 = vst [vmem:[#allocation9_spill] sm:$0xff] %v3755_v40  ;;  %v7371_v42 = vmax.f32 %v3755_v40, 0.0  ;;  %v3763_v44 = vadd.f32 %v3567_v29, %v115_v41  ;;  %vm1506_vm15 = vcmp.ge.s32.totalorder %v494_v37, 0  ;;  %vm1522_vm0 = vcmp.lt.s32.totalorder %v494_v37, 7 }
  0x96   :  { %v171_v43 = vpack.c.bf16 %v7371_v42, %v7370_v39  ;;  %7643 = vst [vmem:[#allocation10_spill] sm:$0xff] %v3763_v44  ;;  %v7384_v47 = vmax.f32 %v3763_v44, 0.0 }
  0x98   :  { %3268 = vmatmul.msk.bf16.vlgmr.msra.gmra.mxu2 %vm7362_vm2, %v171_v43  ;;  %v702_v43 = vmul.u32 7, %v494_v37 }
  0x99   :  { %v140_v45 = vpop.f32.mrf.mxu3 }
  0x9a   :  { %v3769_v49 = vadd.f32 %v3567_v29, %v140_v45 }
  0x9b   :  { %v117_v46 = vpop.f32.mrf.mxu0 }
  0x9c   :  { %v3767_v48 = vadd.f32 %v3567_v29, %v117_v46  ;;  %7645 = vst [vmem:[#allocation12_spill] sm:$0xff] %v3769_v49  ;;  %v7372_v53 = vmax.f32 %v3769_v49, 0.0  ;;  %v3847_v46 = vsel %vm429_vm5, 1, %v7391_v27 }
  0x9d   :  { %7658 = vst [vmem:[#allocation25_spill] sm:$0xff] %v3847_v46 }
  0x9e   :  { %7644 = vst [vmem:[#allocation11_spill] sm:$0xff] %v3767_v48  ;;  %v7386_v50 = vmax.f32 %v3767_v48, 0.0 }
  0xa0   :  { %v167_v51 = vpack.c.bf16 %v7386_v50, %v7384_v47 }
  0xa1   :  { %v142_v52 = vpop.f32.mrf.mxu3 }
  0xa2   :  { %v3777_v54 = vadd.f32 %v3567_v29, %v142_v52  ;;  %3264 = vmatmul.msk.bf16.gmra.mxu1 %vm7362_vm2, %v167_v51  ;;  %v3850_v51 = vadd.s32 16, %v3830_v22  ;;  %v3852_v52 = vsub.s32 %v286_v26, %v702_v43 }
  0xa3   :  { %v120_v55 = vpop.f32.mrf.mxu0 }
  0xa4   :  { %7646 = vst [vmem:[#allocation13_spill] sm:$0xff] %v3777_v54  ;;  %v7378_v56 = vmax.f32 %v3777_v54, 0.0  ;;  %v3785_v58 = vadd.f32 %v3567_v29, %v120_v55  ;;  %v701_v55 = vmul.u32 7, %v3847_v46  ;;  %vm511_vm10 = vcmp.ge.s32.totalorder %v3850_v51, 21 }
  0xa5   :  { %7659 = vst [vmem:[#allocation26_spill] sm:$0xff] %v3852_v52  ;;  %v7741_v54 = vmov 0.0  }
  0xa6   :  { %v172_v57 = vpack.c.bf16 %v7378_v56, %v7372_v53  ;;  %7647 = vst [vmem:[#allocation14_spill] sm:$0xff] %v3785_v58  ;;  %v7387_v61 = vmax.f32 %v3785_v58, 0.0 }
  0xa8   :  { %3269 = vmatmul.msk.bf16.gmra.mxu2 %vm7362_vm2, %v172_v57  ;;  %v782_v57 = vadd.s32 4294967295, %v494_v37 }
  0xa9   :  { %v145_v59 = vpop.f32.mrf.mxu3 }
  0xaa   :  { %v3791_v63 = vadd.f32 %v3567_v29, %v145_v59  ;;  %v7660_v59 = vmov 0  ;;  %vm798_vm13 = vcmp.ge.s32.totalorder %v782_v57, 0  ;;  %vm814_vm14 = vcmp.lt.s32.totalorder %v782_v57, 7 }
  0xab   :  { %v122_v60 = vpop.f32.mrf.mxu0  ;;  %vm3887_vm5 = vmand %vm798_vm13, %vm814_vm14 }
  0xac   :  { %v3789_v62 = vadd.f32 %v3567_v29, %v122_v60  ;;  %7649 = vst [vmem:[#allocation16_spill] sm:$0xff] %v3791_v63  ;;  %v7379_v3 = vmax.f32 %v3791_v63, 0.0  ;;  %v294_v60 = vadd.s32 72, %v3830_v22 }
  0xae   :  { %7648 = vst [vmem:[#allocation15_spill] sm:$0xff] %v3789_v62  ;;  %v7388_v0 = vmax.f32 %v3789_v62, 0.0 }
  0xb0   :  { %v168_v1 = vpack.c.bf16 %v7388_v0, %v7387_v61  ;;  %v3552_v0 = vld [vmem:[%s7352_s5 + $0x80] sm:$0xff] }
  0xb1   :  { %v147_v2 = vpop.f32.mrf.mxu3 }
  0xb2   :  { %v3799_v4 = vadd.f32 %v3567_v29, %v147_v2  ;;  %3265 = vmatmul.msk.bf16.gmra.mxu1 %vm7362_vm2, %v168_v1  ;;  %v3864_v1 = vadd.s32 4294967295, %v3852_v52  ;;  %v3867_v2 = vadd.s32 1, %v3852_v52 }
  0xb3   :  { %v125_v5 = vpop.f32.mrf.mxu0 }
  0xb4   :  { %7650 = vst [vmem:[#allocation17_spill] sm:$0xff] %v3799_v4  ;;  %v7376_v6 = vmax.f32 %v3799_v4, 0.0  ;;  %v3807_v8 = vadd.f32 %v3567_v29, %v125_v5  ;;  %v3874_v5 = vsub.s32 %v3830_v22, %v701_v55  ;;  %vm7363_vm4 = vcmp.ge.s32.totalorder %v3864_v1, 0 }
  0xb5   :  { %7663 = vst [vmem:[#allocation28_spill] sm:$0xff] %v3864_v1 }
  0xb6   :  { %v173_v7 = vpack.c.bf16 %v7376_v6, %v7379_v3  ;;  %7651 = vst [vmem:[#allocation18_spill] sm:$0xff] %v3807_v8  ;;  %v7389_v10 = vmax.f32 %v3807_v8, 0.0  ;;  %v3930_v55 = vadd.s32 1, %v3874_v5 }
  0xb7   :  { %7664 = vst [vmem:[#allocation29_spill] sm:$0xff] %v3874_v5 }
  0xb8   :  { %3270 = vmatmul.msk.bf16.gmra.mxu2 %vm7362_vm2, %v173_v7  ;;  %v527_v7 = vsel %vm511_vm10, 1, %v7391_v27  ;;  %vm7367_vm10 = vcmp.lt.s32.totalorder %v3874_v5, 7  ;;  %7680 = vst [vmem:[#allocation33_spill] sm:$0xff] %v3930_v55 }
  0xb9   :  { %v3899_v24 = vadd.s32 2, %v527_v7  ;;  %v3943_v7 = vadd.s32 32, %v3830_v22 }
  0xbb   :  { %v127_v9 = vpop.f32.mrf.mxu0  ;;  %v783_v30 = vadd.s32 4294967295, %v3899_v24  ;;  %v2053_v40 = vadd.s32 1, %v3899_v24 }
  0xbc   :  { %v3811_v11 = vadd.f32 %v3567_v29, %v127_v9  ;;  %v3273_v9 = vadd.s32 4294967247, %v294_v60 }
  0xbe   :  { %7652 = vst [vmem:[#allocation19_spill] sm:$0xff] %v3811_v11  ;;  %v7390_v12 = vmax.f32 %v3811_v11, 0.0  ;;  %vm566_vm3 = vcmp.ge.s32.totalorder %v3273_v9, 28 }
  0xbf   :  { %v582_v21 = vsel %vm566_vm3, 1, %v7391_v27 }
  0xc0   :  { %v169_v13 = vpack.c.bf16 %v7390_v12, %v7389_v10 }
  0xc2   :  { %3266 = vmatmul.msk.bf16.gmra.mxu1 %vm7362_vm2, %v169_v13  ;;  %v3878_v13 = vadd.s32 24, %v3830_v22 }
  0xc3   :  { %v130_v14 = vpop.f32.mrf.mxu0 }
  0xc4   :  { %v3819_v15 = vadd.f32 %v3567_v29, %v130_v14 }
  0xc6   :  { %7653 = vst [vmem:[#allocation20_spill] sm:$0xff] %v3819_v15  ;;  %v7365_v17 = vmax.f32 %v3819_v15, 0.0 }
  0xcb   :  { %v132_v16 = vpop.f32.mrf.mxu0 }
  0xcc   :  { %v3822_v18 = vadd.f32 %v3567_v29, %v132_v16  ;;  %v3835_v29 = vadd.s32 3, %v588_v28  ;;  %v7667_v16 = vmov 0 }
  0xcd   :  { %v7668_v16 = vsel %vm3887_vm5, 4294967295, %v7667_v16 }
  0xce   :  { %7654 = vst [vmem:[#allocation21_spill] sm:$0xff] %v3822_v18  ;;  %v7366_v19 = vmax.f32 %v3822_v18, 0.0  ;;  %v716_v32 = vmul.u32 7, %v3835_v29  ;;  %v2066_v41 = vadd.s32 1, %v3835_v29 }
  0xcf   :  { %7655 = vst [vmem:[#allocation22_spill] sm:$0xff] %v3835_v29 }
  0xd0   :  { %v170_v20 = vpack.c.bf16 %v7366_v19, %v7365_v17  ;;  %v3839_v38 = vsub.s32 %v3282_v25, %v716_v32  ;;  %vm2082_vm6 = vcmp.ge.s32.totalorder %v2066_v41, 0  ;;  %vm2098_vm7 = vcmp.lt.s32.totalorder %v2066_v41, 7  ;;  %7669 = vst [vmem:[#allocation30_spill] sm:$0xff] %v7668_v16 }
  0xd1   :  { %vm3856_vm9 = vmand %vm2082_vm6, %vm2098_vm7  ;;  %vm7364_vm6 = vcmp.ge.s32.totalorder %v3867_v2, 0  ;;  %vm7368_vm7 = vcmp.ge.s32.totalorder %v3874_v5, 0  ;;  %v3901_v25 = vadd.s32 3, %v582_v21  ;;  %v296_v32 = vadd.s32 88, %v3830_v22 }
  0xd2   :  { %3267 = vmatmul.msk.bf16.gmra.mxu1 %vm7362_vm2, %v170_v20  ;;  %7656 = vst [vmem:[#allocation23_spill] sm:$0xff] %v3839_v38  ;;  %v3844_v45 = vadd.s32 1, %v3839_v38  ;;  %v7661_v59 = vsel %vm3856_vm9, 4294967295, %v7660_v59  ;;  %v2052_v20 = vadd.s32 1, %v494_v37  ;;  %vm7369_vm2 = vcmp.lt.s32.totalorder %v3864_v1, 7 }
  0xd3   :  { %7662 = vst [vmem:[#allocation27_spill] sm:$0xff] %v7661_v59  ;;  %v710_v37 = vmul.u32 7, %v3901_v25  ;;  %v2060_v41 = vadd.s32 1, %v3901_v25  ;;  %v7684_v17 = vmov 0  ;;  %v3957_v19 = vadd.s32 4294967295, %v3874_v5 }
  0xd4   :  { %7657 = vst [vmem:[#allocation24_spill] sm:$0xff] %v3844_v45  ;;  %vm7361_vm8 = vcmp.ge.s32.totalorder %v3844_v45, 0  ;;  %vm7360_vm11 = vcmp.lt.s32.totalorder %v3844_v45, 7  ;;  %vm2068_vm14 = vcmp.ge.s32.totalorder %v2052_v20, 0  ;;  %vm2084_vm3 = vcmp.lt.s32.totalorder %v2052_v20, 7 }
  0xd5   :  { %vm2515_vm12 = vmand %vm3856_vm9, %vm7361_vm8  ;;  %7673 = vst [vmem:[#allocation32_spill] sm:$0xff] %v3901_v25  ;;  %v295_v20 = vadd.s32 80, %v3830_v22  ;;  %v3946_v21 = vsub.s32 %v3273_v9, %v710_v37  ;;  %v7687_v9 = vmov 0  ;;  %v703_v37 = vmul.u32 7, %v3899_v24 }
  0xd6   :  { %vm3882_vm1 = vmand %vm2515_vm12, %vm7360_vm11  ;;  %vm560_vm11 = vcmp.ge.s32.totalorder %v3878_v13, 28  ;;  %7686 = vst [vmem:[#allocation35_spill] sm:$0xff] %v3957_v19  ;;  %v3977_v39 = vadd.s32 4294967247, %v296_v32  ;;  %v7695_v32 = vmov 0  ;;  %vm7385_vm9 = vcmp.lt.s32.totalorder %v3930_v55, 7 }
  0xd7   :  { %vm3895_vm12 = vmand %vm1506_vm15, %vm1522_vm0  ;;  %vm7373_vm0 = vcmp.lt.s32.totalorder %v3867_v2, 7  ;;  %v576_v60 = vsel %vm560_vm11, 1, %v7391_v27  ;;  %7683 = vst [vmem:[#allocation34_spill] sm:$0xff] %v3946_v21  ;;  %v3980_v28 = vadd.s32 1, %v3946_v21  ;;  %v4001_v6 = vadd.s32 4294967247, %v295_v20 }
  0xd8   :  { %v7671_v23 = vsel %vm3895_vm12, 4294967295, %v7670_v23  ;;  %vm3907_vm13 = vmand %vm3895_vm12, %vm7363_vm4  ;;  %v3991_v53 = vadd.s32 3, %v576_v60  ;;  %v3553_v60 = vld [vmem:[%s7352_s5 + $0x88] sm:$0xff]  ;;  %v7403_v20 = vmov 0.0   ;;  %v4048_v36 = vsub.s32 %v3850_v51, %v703_v37  ;;  %v4070_v51 = vld [vmem:[%s7351_s4] ss:$0 sm:$0xff] }
  0xd9   :  { %7672 = vst [vmem:[#allocation31_spill] sm:$0xff] %v7671_v23  ;;  %vm3916_vm15 = vmand %vm3887_vm5, %vm7364_vm6  ;;  %v3427_v56 = vsel %vm3882_vm1, 1.0, %v7403_v20  ;;  %vm7703_vm1 = vcmp.ge.s32.totalorder %v3930_v55, 0  ;;  %2960 = vmatpush.bf16.msrb.mxu0 %v3553_v60  ;;  %v7714_v60 = vmov 0 }
  0xda   :  { %vm3925_vm8 = vmand %vm2068_vm14, %vm2084_vm3  ;;  %vm2076_vm14 = vcmp.ge.s32.totalorder %v2060_v41, 0  ;;  %vm2092_vm3 = vcmp.lt.s32.totalorder %v2060_v41, 7  ;;  %7692 = vst [vmem:[#allocation36_spill] sm:$0xff] %v3980_v28  ;;  %v704_v42 = vmul.u32 7, %v3991_v53  ;;  %v4111_v15 = vadd.s32 4294967295, %v4048_v36 }
  0xdb   :  { %vm3937_vm4 = vmand %vm7368_vm7, %vm7367_vm10  ;;  %vm7689_vm10 = vcmp.ge.s32.totalorder %v3867_v2, 0  ;;  %7707 = vst [vmem:[#allocation38_spill] sm:$0xff] %v4048_v36 }
  0xdc   :  { %vm3952_vm6 = vmand %vm3907_vm13, %vm7369_vm2  ;;  %vm7377_vm13 = vcmp.ge.s32.totalorder %v3852_v52, 0  ;;  %v4097_v12 = vsel %vm3937_vm4, 1.0, %v7403_v20 }
  0xdd   :  { %v7685_v17 = vsel %vm3952_vm6, 4294967295, %v7684_v17  ;;  %vm3963_vm11 = vmand %vm3916_vm15, %vm7373_vm0  ;;  %vm664_vm6 = vcmp.ge.s32.totalorder %v3977_v39, 42  ;;  %2961 = vmatpush.bf16.msrb.mxu0 %v3552_v0 }
  0xde   :  { %v7688_v9 = vsel %vm3963_vm11, 4294967295, %v7687_v9  ;;  %vm3971_vm7 = vmand %vm3925_vm8, %vm7689_vm10  ;;  %vm7698_vm10 = vcmp.lt.s32.totalorder %v3867_v2, 7  ;;  %v680_v3 = vsel %vm664_vm6, 1, %v7391_v27  ;;  %vm7706_vm6 = vcmp.ge.s32.totalorder %v3943_v7, 35 }
  0xdf   :  { %vm3986_vm15 = vmand %vm3887_vm5, %vm7377_vm13  ;;  %vm7382_vm13 = vcmp.ge.s32.totalorder %v3980_v28, 0  ;;  %v625_v34 = vsel %vm7706_vm6, 1, %v7391_v27  ;;  %v4064_v50 = vadd.s32 5, %v680_v3  ;;  %vm615_vm6 = vcmp.ge.s32.totalorder %v4001_v6, 35 }
  0xe0   :  { %vm3994_vm2 = vmand %vm2076_vm14, %vm2092_vm3  ;;  %vm7383_vm14 = vcmp.lt.s32.totalorder %v3852_v52, 7  ;;  %v2579_v3 = vmul.f32 0.0, %v3427_v56  ;;  %v4092_v10 = vadd.s32 4, %v625_v34  ;;  %v4100_v27 = vsub.s32 %v3878_v13, %v704_v42 }
  0xe1   :  { %v7696_v32 = vsel %vm3994_vm2, 4294967295, %v7695_v32  ;;  %vm4008_vm0 = vmand %vm3971_vm7, %vm7698_vm10  ;;  %v7727_v34 = vmov 0   ;;  %vm7728_vm4 = vnez %v7685_v17  ;;  %v2054_v13 = vadd.s32 1, %v3991_v53 }
  0xe2   :  { %7697 = vst [vmem:[#allocation37_spill] sm:$0xff] %v7696_v32  ;;  %vm4025_vm7 = vmand %vm3986_vm15, %vm7383_vm14  ;;  %vm7708_vm15 = vcmp.lt.s32.totalorder %v3957_v19, 7  ;;  %v631_v18 = vsel %vm615_vm6, 1, %v7727_v34  ;;  %v4117_v57 = vsel %vm7728_vm4, 1.0, %v7403_v20  ;;  %v712_v49 = vmul.u32 7, %v4064_v50 }
  0xe3   :  { %vm2509_vm3 = vmand %vm3994_vm2, %vm7382_vm13  ;;  %vm7709_vm13 = vcmp.ge.s32.totalorder %v3957_v19, 0  ;;  %7723 = vst [vmem:[#allocation40_spill] sm:$0xff] %v4100_v27  ;;  %vm7732_vm6 = vnez %v7688_v9  ;;  %v4137_v17 = vadd.s32 1, %v4100_v27  ;;  %vm7733_vm4 = vcmp.ge.s32.totalorder %v3864_v1, 0 }
  0xe4   :  { %vm4039_vm11 = vmand %vm7703_vm1, %vm7385_vm9  ;;  %vm7712_vm1 = vcmp.lt.s32.totalorder %v783_v30, 7  ;;  %vm7713_vm9 = vcmp.ge.s32.totalorder %v783_v30, 0  ;;  %v4081_v30 = vadd.s32 1, %v4048_v36  ;;  %v4134_v0 = vsel %vm7732_vm6, 1.0, %v7403_v20 }
  0xe5   :  { %vm4054_vm14 = vmand %vm7709_vm13, %vm7708_vm15  ;;  %vm7717_vm13 = vcmp.ge.s32.totalorder %v3852_v52, 0  ;;  %vm2070_vm2 = vcmp.ge.s32.totalorder %v2054_v13, 0  ;;  %vm7736_vm5 = vcmp.lt.s32.totalorder %v3867_v2, 7  ;;  %v705_v9 = vmul.u32 7, %v4092_v10 }
  0xe6   :  { %vm4060_vm10 = vmand %vm7713_vm9, %vm7712_vm1  ;;  %vm7720_vm9 = vcmp.lt.s32.totalorder %v3980_v28, 7  ;;  %v4157_v20 = vadd.s32 4, %v631_v18  ;;  %v4164_v63 = vsel %vm4008_vm0, 1.0, %v7741_v54  ;;  %vm7748_vm0 = vcmp.ge.s32.totalorder %v4081_v30, 0 }
  0xe7   :  { %v7715_v60 = vsel %vm4060_vm10, 4294967295, %v7714_v60  ;;  %vm4076_vm15 = vmand %vm3925_vm8, %vm7717_vm13  ;;  %vm7724_vm13 = vcmp.ge.s32.totalorder %v3867_v2, 0  ;;  %v4190_v2 = vsub.s32 %v3977_v39, %v712_v49  ;;  %v4209_v39 = vsel %vm4039_vm11, 1.0, %v7741_v54 }
  0xe8   :  { %7716 = vst [vmem:[#allocation39_spill] sm:$0xff] %v7715_v60  ;;  %vm4085_vm1 = vmand %vm2509_vm3, %vm7720_vm9  ;;  %vm7729_vm9 = vcmp.lt.s32.totalorder %v3852_v52, 7  ;;  %v4214_v49 = vsel %vm4054_vm14, 1.0, %v7741_v54  ;;  %v4225_v37 = vsub.s32 %v3943_v7, %v705_v9  ;;  %v711_v14 = vmul.u32 7, %v4157_v20 }
  0xe9   :  { %vm4106_vm3 = vmand %vm3895_vm12, %vm7724_vm13  ;;  %vm2086_vm12 = vcmp.lt.s32.totalorder %v2054_v13, 7  ;;  %7739 = vst [vmem:[#allocation41_spill] sm:$0xff] %v4157_v20  ;;  %v7742_v13 = vmov 0  ;;  %vm7755_vm11 = vcmask 261120   ;;  %v4232_v47 = vsel %vm4085_vm1, 1.0, %v7741_v54 }
  0xea   :  { %vm4124_vm13 = vmand %vm4076_vm15, %vm7729_vm9  ;;  %7747 = vst [vmem:[#allocation43_spill] sm:$0xff] %v4190_v2  ;;  %v4246_v7 = vadd.s32 40, %v3830_v22  ;;  %v4249_v9 = vadd.s32 4294967295, %v4064_v50  ;;  %v4254_v42 = vadd.s32 1, %v4225_v37  ;;  %v4308_v8 = vadd.s32 1, %v4190_v2 }
  0xeb   :  { %vm4143_vm15 = vmand %vm3925_vm8, %vm7733_vm4  ;;  %vm7430_vm4 = vcmp.ge.s32.totalorder %v4111_v15, 0  ;;  %7751 = vst [vmem:[#allocation44_spill] sm:$0xff] %v4214_v49  ;;  %v4237_v31 = vsel %vm4124_vm13, 1.0, %v7741_v54  ;;  %vm7759_vm13 = vcmp.ge.s32.totalorder %v4081_v30, 0  ;;  %v4311_v11 = vsub.s32 %v4001_v6, %v711_v14 }
  0xec   :  { %vm4152_vm6 = vmand %vm4106_vm3, %vm7736_vm5  ;;  %vm2069_vm5 = vcmp.ge.s32.totalorder %v2053_v40, 0  ;;  %vm2085_vm3 = vcmp.lt.s32.totalorder %v2053_v40, 7  ;;  %7754 = vst [vmem:[#allocation45_spill] sm:$0xff] %v4225_v37  ;;  %v2055_v59 = vadd.s32 1, %v4092_v10  ;;  %vm7769_vm9 = vcmp.lt.s32.totalorder %v3899_v24, 7 }
  0xed   :  { %vm4166_vm8 = vmand %vm2070_vm2, %vm2086_vm12  ;;  %vm7744_vm2 = vcmp.lt.s32.totalorder %v3864_v1, 7  ;;  %v4284_v58 = vsel %vm4152_vm6, 1.0, %v7741_v54  ;;  %v7771_v14 = vmov 0  ;;  %v299_v40 = vadd.s32 112, %v3830_v22 }
  0xee   :  { %v7743_v13 = vsel %vm4166_vm8, 4294967295, %v7742_v13  ;;  %vm4184_vm12 = vmand %vm4143_vm15, %vm7744_vm2  ;;  %vm7429_vm2 = vcmp.lt.s32.totalorder %v4081_v30, 7  ;;  %v4341_v18 = vadd.s32 4294967295, %v4311_v11  ;;  %v7788_v52 = vmov 0 }
  0xef   :  { %vm4200_vm15 = vmand %vm4060_vm10, %vm7748_vm0  ;;  %v4297_v62 = vsel %vm4184_vm12, 1.0, %v7741_v54 }
  0xf0   :  { %vm4241_vm14 = vmand %vm2069_vm5, %vm2085_vm3  ;;  %vm658_vm3 = vcmp.ge.s32.totalorder %v4246_v7, 42  ;;  %7774 = vst [vmem:[#allocation48_spill] sm:$0xff] %v4341_v18 }
  0xf1   :  { %vm7758_vm1 = vmmov %vm7755_vm11  ;;  %v674_v45 = vsel %vm658_vm3, 1, %v7727_v34  ;;  %vm2071_vm3 = vcmp.ge.s32.totalorder %v2055_v59, 0 }
  0xf2   :  { %vm4260_vm5 = vmand %vm4241_vm14, %vm7759_vm13  ;;  %v4365_v29 = vadd.s32 5, %v674_v45 }
  0xf3   :  { %vm4303_vm6 = vmand %vm4200_vm15, %vm7429_vm2 }
  0xf4   :  { %vm4321_vm12 = vmand %vm4260_vm5, %vm7429_vm2  ;;  %vm7777_vm2 = vcmp.ge.s32.totalorder %v4048_v36, 0 }
  0xf5   :  { %vm4361_vm15 = vmand %vm4060_vm10, %vm7777_vm2  ;;  %vm7784_vm2 = vcmp.lt.s32.totalorder %v3830_v22, 6 }
 0x10f   :  { %v228_v35 = vpop.f32.mrf.mxu1 }
 0x110   :  { %v229_v4 = vadd.f32 %v4070_v51, %v228_v35  ;;  %v7805_v35 = vmov 0 }
 0x112   :  { %v4159_v43 = vmax.f32 %v229_v4, 0.0  ;;  %v4177_v4 = vsel %vm4025_vm7, 1.0, %v7741_v54  ;;  %vm7412_vm7 = vcmp.ge.s32.totalorder %v4137_v17, 0 }
 0x113   :  { %vm4220_vm0 = vmand %vm4166_vm8, %vm7412_vm7 }
 0x114   :  { %7740 = vst [vmem:[#allocation42_spill] sm:$0xff] %v4159_v43  ;;  %v2595_v41 = vmul.f32 %v2579_v3, %v4159_v43  ;;  %v1843_v26 = vmul.f32 %v4097_v12, %v4159_v43  ;;  %v7780_v28 = vrot.slane %v4159_v43, 7  ;;  %v7783_v25 = vrot.slane %v4159_v43, 2 }
 0x115   :  { %v7786_v23 = vrot.slane %v4159_v43, 1 }
 0x116   :  { %2611 = vst.msk [vmem:[#allocation2 + $0x178] sm:$0xff] %vm7755_vm11, %v2595_v41  ;;  %vm7420_vm11 = vcmp.lt.s32.totalorder %v4137_v17, 7  ;;  %v4266_v41 = vadd.s32 4294967295, %v4190_v2 }
 0x117   :  { %v230_v61 = vpop.f32.mrf.mxu1  ;;  %1859 = vst.msk [vmem:[#allocation2 + $0x8] sm:$0xff] %vm7758_vm1, %v1843_v26  ;;  %v4269_v26 = vadd.s32 1, %v4157_v20  ;;  %vm4277_vm13 = vmand %vm4220_vm0, %vm7420_vm11  ;;  %vm7446_vm11 = vcmp.ge.s32.totalorder %v4254_v42, 0  ;;  %vm7770_vm1 = vcmp.ge.s32.totalorder %v3899_v24, 0  ;;  %vm7781_vm0 = vcmp.lt.s32.totalorder %v3830_v22, 1 }
 0x118   :  { %v231_v44 = vadd.f32 %v4070_v51, %v230_v61  ;;  %v4291_v61 = vadd.s32 4294967295, %v4100_v27  ;;  %vm4334_vm7 = vmand %vm7770_vm1, %vm7769_vm9  ;;  %vm2087_vm1 = vcmp.lt.s32.totalorder %v2055_v59, 7  ;;  %v4455_v24 = vsel %vm4303_vm6, 1.0, %v7741_v54 }
 0x119   :  { %v7772_v14 = vsel %vm4334_vm7, 4294967295, %v7771_v14  ;;  %vm4351_vm9 = vmand %vm4334_vm7, %vm7430_vm4  ;;  %vm7787_vm4 = vcmp.lt.s32.totalorder %v3830_v22, 7  ;;  %vm7804_vm6 = vcmp.ge.s32.totalorder %v4064_v50, 0 }
 0x11a   :  { %v4313_v3 = vmax.f32 %v231_v44, 0.0  ;;  %7773 = vst [vmem:[#allocation47_spill] sm:$0xff] %v7772_v14  ;;  %vm4388_vm5 = vmand %vm2071_vm3, %vm2087_vm1  ;;  %vm7793_vm1 = vcmp.lt.s32.totalorder %v4111_v15, 7  ;;  %vm7812_vm3 = vcmp.ge.s32.totalorder %v4249_v9, 0  ;;  %v5139_v14 = vadd.s32 96, %v3830_v22 }
 0x11b   :  { %v253_v44 = vpop.f32.mrf.mxu2  ;;  %v7789_v52 = vsel %vm4388_vm5, 4294967295, %v7788_v52 }
 0x11c   :  { %7766 = vst [vmem:[#allocation46_spill] sm:$0xff] %v4313_v3  ;;  %v254_v19 = vadd.f32 %v4070_v51, %v253_v44  ;;  %v7443_v6 = vrot.slane %v4313_v3, 7  ;;  %v2580_v32 = vmul.f32 %v4209_v39, %v4313_v3  ;;  %v7782_v21 = vrot.slane %v4313_v3, 2 }
 0x11d   :  { %v7785_v45 = vrot.slane %v4313_v3, 1  ;;  %v7827_v56 = vrot.slane %v4313_v3, 1 }
 0x11e   :  { %v4368_v38 = vmax.f32 %v254_v19, 0.0  ;;  %v1664_v59 = vsel %vm7781_vm0, %v7780_v28, %v7443_v6  ;;  %v1406_v60 = vsel %vm7784_vm2, %v7783_v25, %v7782_v21  ;;  %vm7790_vm0 = vcmask 261120   ;;  %vm4413_vm2 = vmand %vm4351_vm9, %vm7793_vm1 }
 0x11f   :  { %v1148_v19 = vsel %vm7787_vm4, %v7786_v23, %v7785_v45  ;;  %v233_v5 = vpop.f32.mrf.mxu1  ;;  %v1667_v28 = vmul.f32 %v4117_v57, %v1664_v59  ;;  %v1409_v6 = vmul.f32 %v4134_v0, %v1406_v60  ;;  %2596 = vst.msk [vmem:[#allocation2 + $0x10] sm:$0xff] %vm7790_vm0, %v2580_v32  ;;  %v7450_v25 = vrot.slane %v4313_v3, 6  ;;  %vm4401_vm4 = vmand %vm4388_vm5, %vm7446_vm11 }
 0x120   :  { %v1151_v55 = vmul.f32 %v4177_v4, %v1148_v19  ;;  %v2589_v21 = vmul.f32 %v4232_v47, %v4368_v38  ;;  %v234_v60 = vadd.f32 %v4070_v51, %v233_v5  ;;  %v3278_v57 = vadd.s32 4294967247, %v299_v40  ;;  %vm7799_vm10 = vmmov %vm7790_vm0 }
 0x121   :  { %v4419_v0 = vadd.s32 48, %v3830_v22  ;;  %1700 = vrot.lane.b32.xlu2 %v1667_v28, %s3605_s26  ;;  %1442 = vrot.lane.b32.xlu1 %v1409_v6, %s3606_s27  ;;  %v7449_v5 = vrot.slane %v4159_v43, 6  ;;  %vm7448_vm11 = vcmp.lt.s32.totalorder %v4254_v42, 7  ;;  %vm7796_vm9 = vcmp.lt.s32.totalorder %v4048_v36, 7 }
 0x122   :  { %vm4429_vm1 = vmand %vm4361_vm15, %vm7796_vm9  ;;  %2605 = vst.msk [vmem:[#allocation2 + $0xe8] sm:$0xff] %vm7799_vm10, %v2589_v21  ;;  %v4436_v47 = vmax.f32 %v234_v60, 0.0  ;;  %1184 = vrot.lane.b32.xlu0 %v1151_v55, %s3607_s28  ;;  %v4442_v6 = vsel %vm4277_vm13, 1.0, %v7741_v54  ;;  %v706_v55 = vmul.u32 7, %v4365_v29  ;;  %vm7802_vm10 = vcmp.lt.s32.totalorder %v3830_v22, 2 }
 0x123   :  { %vm4448_vm15 = vmand %vm4401_vm4, %vm7448_vm11  ;;  %v255_v44 = vpop.f32.mrf.mxu2  ;;  %v2226_v48 = vsel %vm7802_vm10, %v7449_v5, %v7450_v25  ;;  %v3414_v45 = vsel %vm4321_vm12, 1.0, %v7741_v54  ;;  %v2056_v28 = vadd.s32 1, %v4365_v29  ;;  %vm7803_vm13 = vcmp.lt.s32.totalorder %v4064_v50, 7 }
 0x124   :  { %vm4472_vm4 = vmand %vm7804_vm6, %vm7803_vm13  ;;  %v2581_v23 = vmul.f32 %v4164_v63, %v4436_v47  ;;  %vm7808_vm10 = vcmp.ge.s32.totalorder %v4266_v41, 0  ;;  %v4488_v21 = vadd.s32 4294967247, %v3278_v57  ;;  %v7453_v60 = vrot.slane %v4436_v47, 7 }
 0x125   :  { %v7806_v35 = vsel %vm4472_vm4, 4294967295, %v7805_v35  ;;  %vm4483_vm12 = vmand %vm4472_vm4, %vm7808_vm10  ;;  %v4495_v5 = vsub.s32 %v4246_v7, %v706_v55  ;;  %vm7811_vm10 = vcmp.lt.s32.totalorder %v4249_v9, 7  ;;  %v7813_v25 = vmov 0 }
 0x126   :  { %7807 = vst [vmem:[#allocation49_spill] sm:$0xff] %v7806_v35  ;;  %vm4501_vm9 = vmand %vm7812_vm3, %vm7811_vm10  ;;  %v4506_v57 = vadd.s32 1, %v4311_v11  ;;  %v2404_v43 = vmul.f32 %v4097_v12, %v1664_v59  ;;  %v1955_v63 = vmul.f32 %v4209_v39, %v1148_v19  ;;  %v2228_v7 = vmul.f32 %v4214_v49, %v2226_v48 }
 0x127   :  { %v7814_v25 = vsel %vm4501_vm9, 4294967295, %v7813_v25  ;;  %vm7817_vm11 = vmmov %vm7790_vm0  ;;  %vm7818_vm6 = vcmp.ge.s32.totalorder %v4190_v2, 0  ;;  %v256_v12 = vadd.f32 %v4070_v51, %v255_v44  ;;  %v235_v59 = vpop.f32.mrf.mxu1  ;;  %vm2088_vm0 = vcmp.lt.s32.totalorder %v2056_v28, 7 }
 0x128   :  { %7815 = vst [vmem:[#allocation50_spill] sm:$0xff] %v7814_v25  ;;  %vm4517_vm3 = vmand %vm4501_vm9, %vm7818_vm6  ;;  %v236_v39 = vadd.f32 %v4070_v51, %v235_v59  ;;  %v4528_v19 = vsel %vm4448_vm15, 1.0, %v7741_v54  ;;  %v3334_v48 = vsel %vm4413_vm2, 1.0, %v7741_v54  ;;  %v4536_v44 = vsel %vm4429_vm1, 1.0, %v7741_v54 }
 0x129   :  { %7816 = vst [vmem:[#allocation51_spill] sm:$0xff] %v4506_v57  ;;  %vm7821_vm6 = vcmp.lt.s32.totalorder %v4266_v41, 7  ;;  %2260 = vrot.lane.b32.xlu2 %v2228_v7, %s3606_s27  ;;  %2436 = vrot.lane.b32.xlu1 %v2404_v43, %s3605_s26  ;;  %v7824_v32 = vrot.slane %v4313_v3, 7  ;;  %vm7825_vm2 = vcmp.lt.s32.totalorder %v3830_v22, 1  ;;  %v7826_v40 = vrot.slane %v4436_v47, 1 }
 0x12a   :  { %2597 = vst.msk [vmem:[#allocation2 + $0x28] sm:$0xff] %vm7817_vm11, %v2581_v23  ;;  %vm2072_vm11 = vcmp.ge.s32.totalorder %v2056_v28, 0  ;;  %vm4542_vm10 = vmand %vm4483_vm12, %vm7821_vm6  ;;  %vm7828_vm1 = vcmp.lt.s32.totalorder %v3830_v22, 7  ;;  %v4565_v55 = vadd.s32 1, %v4495_v5  ;;  %vm7829_vm12 = vcmp.lt.s32.totalorder %v4190_v2, 7  ;;  %1987 = vrot.lane.b32.xlu0 %v1955_v63, %s3607_s28 }
 0x12b   :  { %v1663_v4 = vsel %vm7825_vm2, %v7824_v32, %v7453_v60  ;;  %v4562_v23 = vsel %vm7828_vm1, %v7827_v56, %v7826_v40  ;;  %vm4572_vm6 = vmand %vm4517_vm3, %vm7829_vm12  ;;  %v4577_v32 = vmax.f32 %v236_v39, 0.0  ;;  %v7832_v40 = vrot.slane %v4436_v47, 6  ;;  %v4598_v43 = vpop.f32.mrf.mxu2 }
 0x12c   :  { %v7833_v56 = vrot.slane %v4313_v3, 6  ;;  %vm7834_vm1 = vcmp.lt.s32.totalorder %v3830_v22, 2  ;;  %vm4588_vm15 = vmand %vm2072_vm11, %vm2088_vm0  ;;  %v7835_v9 = vmov 0  ;;  %vm7838_vm12 = vcmp.ge.s32.totalorder %v4419_v0, 49 }
 0x12d   :  { %v7836_v9 = vsel %vm4588_vm15, 4294967295, %v7835_v9  ;;  %v323_v39 = vsel %vm7838_vm12, 1, %v7727_v34  ;;  %v4596_v63 = vmax.f32 %v256_v12, 0.0  ;;  %v7840_v49 = vrot.slane %v4436_v47, 2 }
 0x12e   :  { %v2225_v60 = vsel %vm7834_vm1, %v7833_v56, %v7832_v40  ;;  %7837 = vst [vmem:[#allocation52_spill] sm:$0xff] %v7836_v9  ;;  %v7841_v40 = vrot.slane %v4313_v3, 2  ;;  %vm7842_vm1 = vcmp.lt.s32.totalorder %v3830_v22, 6  ;;  %vm7462_vm0 = vcmp.ge.s32.totalorder %v4565_v55, 0  ;;  %v2614_v56 = vld [vmem:[#allocation2 + $0x10] sm:$0xff] }
 0x12f   :  { %7839 = vst [vmem:[#allocation53_spill] sm:$0xff] %v4596_v63  ;;  %vm7843_vm11 = vcmp.ge.s32.totalorder %v4308_v8, 0  ;;  %v2405_v46 = vmul.f32 %v4237_v31, %v1663_v4  ;;  %v1956_v3 = vmul.f32 %v4284_v58, %v4562_v23  ;;  %v2582_v16 = vmul.f32 %v3414_v45, %v4577_v32  ;;  %vm4635_vm3 = vmand %vm4588_vm15, %vm7462_vm0 }
 0x130   :  { %v1405_v28 = vsel %vm7842_vm1, %v7841_v40, %v7840_v49  ;;  %vm4612_vm12 = vmand %vm4501_vm9, %vm7843_vm11  ;;  %vm7846_vm1 = vcmp.lt.s32.totalorder %v4269_v26, 7  ;;  %vm7847_vm13 = vcmp.ge.s32.totalorder %v4269_v26, 0  ;;  %v2229_v1 = vmul.f32 %v4297_v62, %v2225_v60 }
 0x131   :  { %vm4625_vm2 = vmand %vm7847_vm13, %vm7846_vm1  ;;  %v2617_v25 = vld [vmem:[#allocation2 + $0x28] sm:$0xff]  ;;  %vm7852_vm13 = vcmp.ge.s32.totalorder %v4488_v21, 21  ;;  %v339_v26 = vmul.u32 49, %v323_v39  ;;  %v4643_v49 = vmul.f32 %v4455_v24, %v1405_v28  ;;  %vm7853_vm1 = vcmask 261120   ;;  %2438 = vrot.lane.b32.xlu2 %v2405_v46, %s3605_s26  ;;  %1989 = vrot.lane.b32.xlu1 %v1956_v3, %s3607_s28 }
 0x132   :  { %v539_v58 = vsel %vm7852_vm13, 1, %v7727_v34  ;;  %v2662_v45 = vpack.c.bf16 %v2617_v25, %v2614_v56  ;;  %2598 = vst.msk [vmem:[#allocation2 + $0x40] sm:$0xff] %vm7853_vm1, %v2582_v16  ;;  %v1668_v62 = vmul.f32 %v3334_v48, %v1663_v4  ;;  %v4649_v60 = vsel %vm4542_vm10, 1.0, %v7741_v54  ;;  %v238_v25 = vpop.f32.mrf.mxu1  ;;  %2262 = vrot.lane.b32.xlu0 %v2229_v1, %s3606_s27 }
 0x133   :  { %vm7854_vm0 = vcmp.ge.s32.totalorder %v4341_v18, 0  ;;  %v7472_v24 = vrot.slane %v4596_v63, 7  ;;  %v3311_v16 = vsel %vm4572_vm6, 1.0, %v7741_v54  ;;  %vm7857_vm13 = vcmp.lt.s32.totalorder %v4308_v8, 7 }
 0x134   :  { %vm4655_vm11 = vmand %vm4625_vm2, %vm7854_vm0  ;;  %v4671_v59 = vadd.s32 2, %v539_v58  ;;  %v4674_v4 = vsub.s32 %v4419_v0, %v339_v26  ;;  %v239_v39 = vadd.f32 %v4070_v51, %v238_v25  ;;  %v4718_v58 = vpop.f32.mrf.mxu2  ;;  %v7877_v28 = vmov 0 }
 0x135   :  { %vm4667_vm10 = vmand %vm4612_vm12, %vm7857_vm13  ;;  %vm7868_vm13 = vcmp.ge.s32.totalorder %v4311_v11, 0  ;;  %v292_v9 = vadd.s32 56, %v3830_v22  ;;  %v7940_v12 = vmov 0 }
 0x136   :  { %7860 = vst [vmem:[#allocation54_spill] sm:$0xff] %v4671_v59  ;;  %vm7861_vm0 = vmmov %vm7853_vm1  ;;  %vm7862_vm1 = vcmp.lt.s32.totalorder %v4565_v55, 7  ;;  %v715_v0 = vmul.u32 7, %v4671_v59  ;;  %v2065_v56 = vadd.s32 1, %v4671_v59  ;;  %v4704_v31 = vmax.f32 %v239_v39, 0.0 }
 0x137   :  { %3500 = vmatmul.msk.bf16.vlgmr.msrb.gmra.mxu0 %vm7861_vm0, %v2662_v45  ;;  %vm4682_vm6 = vmand %vm4635_vm3, %vm7862_vm1  ;;  %vm435_vm3 = vcmp.ge.s32.totalorder %v4674_v4, 7  ;;  %vm467_vm0 = vcmp.ge.s32.totalorder %v4674_v4, 14  ;;  %vm7865_vm1 = vcmp.lt.s32.totalorder %v4341_v18, 7  ;;  %vm515_vm9 = vcmp.ge.s32.totalorder %v4674_v4, 21 }
 0x138   :  { %vm4700_vm12 = vmand %vm4655_vm11, %vm7865_vm1  ;;  %v451_v46 = vsel %vm435_vm3, 1, %v7727_v34  ;;  %v483_v3 = vsel %vm467_vm0, 1, %v7727_v34  ;;  %v4721_v26 = vsub.s32 %v4488_v21, %v715_v0  ;;  %vm2081_vm11 = vcmp.ge.s32.totalorder %v2065_v56, 0 }
 0x139   :  { %vm4714_vm15 = vmand %vm4625_vm2, %vm7868_vm13  ;;  %vm2097_vm1 = vcmp.lt.s32.totalorder %v2065_v56, 7  ;;  %v499_v1 = vadd.s32 %v483_v3, %v451_v46  ;;  %vm7872_vm3 = vcmp.lt.s32.totalorder %v4157_v20, 7  ;;  %vm7873_vm0 = vcmp.ge.s32.totalorder %v4157_v20, 0  ;;  %1444 = vrot.lane.b32.xlu2 %v4643_v49, %s3606_s27  ;;  %1702 = vrot.lane.b32.xlu1 %v1668_v62, %s3605_s26 }
 0x13a   :  { %7871 = vst [vmem:[#allocation55_spill] sm:$0xff] %v4721_v26  ;;  %vm4727_vm5 = vmand %vm7873_vm0, %vm7872_vm3  ;;  %v7874_v45 = vmov 0  ;;  %v2583_v25 = vmul.f32 %v4442_v6, %v4704_v31  ;;  %v531_v21 = vsel %vm515_vm9, 1, %v7727_v34  ;;  %vm563_vm8 = vcmp.ge.s32.totalorder %v4674_v4, 28 }
 0x13b   :  { %v7875_v45 = vsel %vm4727_vm5, 4294967295, %v7874_v45  ;;  %vm4734_vm13 = vmand %vm2081_vm11, %vm2097_vm1  ;;  %v4741_v0 = vadd.s32 1, %v4721_v26  ;;  %v547_v56 = vadd.s32 %v531_v21, %v499_v1  ;;  %v579_v46 = vsel %vm563_vm8, 1, %v7727_v34 }
 0x13c   :  { %7876 = vst [vmem:[#allocation56_spill] sm:$0xff] %v7875_v45  ;;  %v7878_v28 = vsel %vm4734_vm13, 4294967295, %v7877_v28  ;;  %vm611_vm3 = vcmp.ge.s32.totalorder %v4674_v4, 35  ;;  %vm7881_vm0 = vcmp.ge.s32.totalorder %v4506_v57, 0  ;;  %vm7882_vm1 = vcmask 261120  }
 0x13d   :  { %7879 = vst [vmem:[#allocation57_spill] sm:$0xff] %v7878_v28  ;;  %vm2510_vm11 = vmand %vm4625_vm2, %vm7881_vm0  ;;  %v7883_v6 = vrot.slane %v4368_v38, 7  ;;  %vm7884_vm9 = vcmp.lt.s32.totalorder %v3830_v22, 1  ;;  %v7885_v1 = vrot.slane %v4596_v63, 1  ;;  %v7886_v21 = vrot.slane %v4368_v38, 1 }
 0x13e   :  { %7880 = vst [vmem:[#allocation58_spill] sm:$0xff] %v4741_v0  ;;  %vm7887_vm8 = vcmp.lt.s32.totalorder %v3830_v22, 7  ;;  %v627_v40 = vsel %vm611_vm3, 1, %v7727_v34  ;;  %vm659_vm2 = vcmp.ge.s32.totalorder %v4674_v4, 42  ;;  %vm7888_vm0 = vcmp.lt.s32.totalorder %v4506_v57, 7 }
 0x13f   :  { %2599 = vst.msk [vmem:[#allocation2 + $0x58] sm:$0xff] %vm7882_vm1, %v2583_v25  ;;  %v4756_v3 = vsel %vm7884_vm9, %v7883_v6, %v7472_v24  ;;  %v4764_v39 = vsel %vm7887_vm8, %v7886_v21, %v7885_v1  ;;  %vm4770_vm1 = vmand %vm2510_vm11, %vm7888_vm0  ;;  %v240_v6 = vpop.f32.mrf.mxu1  ;;  %v1152_v24 = vmul.f32 %v4536_v44, %v4562_v23  ;;  %vm7486_vm9 = vcmp.ge.s32.totalorder %v4741_v0, 0  ;;  %v2620_v21 = vld [vmem:[#allocation2 + $0x40] sm:$0xff] }
 0x140   :  { %vm7481_vm4 = vcmp.lt.s32.totalorder %v4741_v0, 7  ;;  %v595_v1 = vadd.s32 %v579_v46, %v547_v56  ;;  %vm7891_vm8 = vcmp.ge.s32.totalorder %v4506_v57, 0  ;;  %v241_v26 = vadd.f32 %v4070_v51, %v240_v6  ;;  %vm2514_vm0 = vmand %vm4734_vm13, %vm7486_vm9 }
 0x141   :  { %vm4782_vm3 = vmand %vm4727_vm5, %vm7891_vm8  ;;  %v3327_v59 = vsel %vm4667_vm10, 1.0, %v7741_v54  ;;  %v7894_v23 = vrot.slane %v4596_v63, 2  ;;  %v7895_v44 = vrot.slane %v4368_v38, 2  ;;  %vm7896_vm11 = vcmp.lt.s32.totalorder %v3830_v22, 6  ;;  %1186 = vrot.lane.b32.xlu0 %v1152_v24, %s3607_s28 }
 0x142   :  { %v675_v46 = vsel %vm659_vm2, 1, %v7727_v34  ;;  %v1677_v48 = vmul.f32 %v4649_v60, %v4756_v3  ;;  %v1161_v6 = vmul.f32 %v3311_v16, %v4764_v39  ;;  %v643_v18 = vadd.s32 %v627_v40, %v595_v1  ;;  %vm4826_vm2 = vmand %vm2514_vm0, %vm7481_vm4  ;;  %v4832_v40 = vpop.f32.mrf.mxu2 }
 0x143   :  { %v1396_v56 = vsel %vm7896_vm11, %v7895_v44, %v7894_v23  ;;  %vm7897_vm10 = vcmp.lt.s32.totalorder %v4311_v11, 7  ;;  %v3422_v49 = vsel %vm4770_vm1, 1.0, %v7741_v54  ;;  %v4818_v44 = vmax.f32 %v241_v26, 0.0 }
 0x144   :  { %vm4811_vm8 = vmand %vm4714_vm15, %vm7897_vm10  ;;  %v3417_v62 = vsel %vm4682_vm6, 1.0, %v7741_v54  ;;  %v2590_v16 = vmul.f32 %v3422_v49, %v4596_v63  ;;  %v1419_v26 = vmul.f32 %v3327_v59, %v1396_v56  ;;  %v4834_v25 = vadd.s32 %v675_v46, %v643_v18  ;;  %1720 = vrot.lane.b32.xlu2 %v1677_v48, %s3605_s26  ;;  %1204 = vrot.lane.b32.xlu1 %v1161_v6, %s3607_s28 }
 0x145   :  { %v3390_v24 = vsel %vm4700_vm12, 1.0, %v7741_v54  ;;  %vm7902_vm15 = vcmp.lt.s32.totalorder %v4506_v57, 7  ;;  %v2584_v49 = vmul.f32 %v4528_v19, %v4818_v44  ;;  %vm7905_vm1 = vcmask 261120  }
 0x146   :  { %vm4844_vm6 = vmand %vm4782_vm3, %vm7902_vm15  ;;  %2606 = vst.msk [vmem:[#allocation2 + $0x100] sm:$0xff] %vm7905_vm1, %v2590_v16  ;;  %v3271_v59 = vadd.s32 4294967247, %v292_v9  ;;  %vm1508_vm12 = vcmp.ge.s32.totalorder %v3991_v53, 0  ;;  %vm7906_vm11 = vcmp.ge.s32.totalorder %v4111_v15, 0  ;;  %v2623_v56 = vld [vmem:[#allocation2 + $0x58] sm:$0xff]  ;;  %v3426_v19 = vsel %vm4826_vm2, 1.0, %v7741_v54 }
 0x147   :  { %vm4857_vm0 = vmand %vm4241_vm14, %vm7906_vm11  ;;  %v707_v46 = vmul.u32 7, %v4834_v25  ;;  %v2057_v16 = vadd.s32 1, %v4834_v25  ;;  %vm1524_vm3 = vcmp.lt.s32.totalorder %v3991_v53, 7  ;;  %vm7909_vm10 = vcmp.ge.s32.totalorder %v4048_v36, 0  ;;  %2600 = vst.msk [vmem:[#allocation2 + $0x70] sm:$0xff] %vm7905_vm1, %v2584_v49  ;;  %v243_v28 = vpop.f32.mrf.mxu1 }
 0x148   :  { %vm4871_vm15 = vmand %vm4241_vm14, %vm7909_vm10  ;;  %v2665_v7 = vpack.c.bf16 %v2623_v56, %v2620_v21  ;;  %vm468_vm11 = vcmp.ge.s32.totalorder %v3271_v59, 14  ;;  %vm7493_vm2 = vcmp.ge.s32.totalorder %v4291_v61, 0  ;;  %v7912_v60 = vmov 0 }
 0x149   :  { %vm4877_vm4 = vmand %vm1508_vm12, %vm1524_vm3  ;;  %v784_v18 = vadd.s32 4294967295, %v3991_v53  ;;  %v4883_v0 = vsub.s32 %v4674_v4, %v707_v46  ;;  %vm2073_vm14 = vcmp.ge.s32.totalorder %v2057_v16, 0  ;;  %vm2089_vm10 = vcmp.lt.s32.totalorder %v2057_v16, 7  ;;  %1462 = vrot.lane.b32.xlu0 %v1419_v26, %s3606_s27 }
 0x14a   :  { %v7913_v60 = vsel %vm4877_vm4, 4294967295, %v7912_v60  ;;  %v484_v33 = vsel %vm468_vm11, 1, %v7727_v34  ;;  %vm1556_vm1 = vmand %vm4877_vm4, %vm7493_vm2  ;;  %v244_v49 = vadd.f32 %v4070_v51, %v243_v28  ;;  %vm7915_vm12 = vcmask 261120   ;;  %v265_v23 = vpop.f32.mrf.mxu2 }
 0x14b   :  { %7914 = vst [vmem:[#allocation59_spill] sm:$0xff] %v7913_v60  ;;  %3501 = vmatmul.msk.bf16.gmra.mxu0 %vm7915_vm12, %v2665_v7  ;;  %vm4892_vm3 = vmand %vm2073_vm14, %vm2089_vm10  ;;  %v7916_v21 = vmov 0  ;;  %v4896_v53 = vadd.s32 1, %v484_v33  ;;  %vm7491_vm9 = vcmp.lt.s32.totalorder %v4291_v61, 7  ;;  %vm800_vm13 = vcmp.ge.s32.totalorder %v784_v18, 0 }
 0x14c   :  { %v7917_v21 = vsel %vm4892_vm3, 4294967295, %v7916_v21  ;;  %v4902_v4 = vadd.s32 1, %v4883_v0  ;;  %v7919_v28 = vrot.slane %v4596_v63, 6  ;;  %v7920_v7 = vrot.slane %v4368_v38, 6  ;;  %vm4915_vm14 = vmand %vm1556_vm1, %vm7491_vm9 }
 0x14d   :  { %7918 = vst [vmem:[#allocation60_spill] sm:$0xff] %v7917_v21  ;;  %vm7921_vm11 = vcmp.lt.s32.totalorder %v3830_v22, 2  ;;  %v3406_v46 = vsel %vm4811_vm8, 1.0, %v7741_v54  ;;  %vm816_vm10 = vcmp.lt.s32.totalorder %v784_v18, 7  ;;  %v4919_v6 = vmax.f32 %v244_v49, 0.0 }
 0x14e   :  { %v2216_v56 = vsel %vm7921_vm11, %v7920_v7, %v7919_v28  ;;  %v708_v16 = vmul.u32 7, %v4896_v53  ;;  %v2058_v33 = vadd.s32 1, %v4896_v53  ;;  %vm4924_vm12 = vmand %vm800_vm13, %vm816_vm10  ;;  %v7925_v28 = vmov 0 }
 0x14f   :  { %7924 = vst [vmem:[#allocation61_spill] sm:$0xff] %v4919_v6  ;;  %v7926_v28 = vsel %vm4924_vm12, 4294967295, %v7925_v28  ;;  %vm7494_vm8 = vcmp.ge.s32.totalorder %v4100_v27, 0  ;;  %v2578_v7 = vmul.f32 0.0, %v3426_v19  ;;  %vm7495_vm1 = vcmp.ge.s32.totalorder %v4902_v4, 0  ;;  %v245_v9 = vpop.f32.mrf.mxu1 }
 0x150   :  { %7927 = vst [vmem:[#allocation62_spill] sm:$0xff] %v7926_v28  ;;  %vm7498_vm11 = vcmp.lt.s32.totalorder %v4902_v4, 7  ;;  %v3374_v26 = vsel %vm4844_vm6, 1.0, %v7741_v54  ;;  %vm4938_vm13 = vmand %vm4924_vm12, %vm7494_vm8  ;;  %v2585_v49 = vmul.f32 %v3417_v62, %v4919_v6  ;;  %v266_v19 = vadd.f32 %v4070_v51, %v265_v23 }
 0x151   :  { %vm2506_vm10 = vmand %vm4892_vm3, %vm7495_vm1  ;;  %v4948_v57 = vsub.s32 %v3271_v59, %v708_v16  ;;  %vm2074_vm6 = vcmp.ge.s32.totalorder %v2058_v33, 0  ;;  %v259_v1 = vadd.f32 %v4070_v51, %v4598_v43  ;;  %v2238_v62 = vmul.f32 %v3390_v24, %v2216_v56 }
 0x152   :  { %vm4954_vm9 = vmand %vm2506_vm10, %vm7498_vm11  ;;  %vm2090_vm2 = vcmp.lt.s32.totalorder %v2058_v33, 7  ;;  %v293_v23 = vadd.s32 64, %v3830_v22  ;;  %vm7933_vm8 = vcmp.lt.s32.totalorder %v4111_v15, 7  ;;  %vm7936_vm3 = vcmp.lt.s32.totalorder %v4048_v36, 7 }
 0x153   :  { %7930 = vst [vmem:[#allocation63_spill] sm:$0xff] %v4948_v57  ;;  %vm4963_vm1 = vmand %vm4857_vm0, %vm7933_vm8  ;;  %vm7939_vm11 = vcmask 261120   ;;  %v4976_v24 = vmax.f32 %v266_v19, 0.0  ;;  %v4979_v56 = vadd.s32 1, %v4948_v57  ;;  %vm7516_vm0 = vcmp.lt.s32.totalorder %v4100_v27, 7  ;;  %2280 = vrot.lane.b32.xlu2 %v2238_v62, %s3606_s27 }
 0x154   :  { %vm4971_vm10 = vmand %vm4871_vm15, %vm7936_vm3  ;;  %2601 = vst.msk [vmem:[#allocation2 + $0x88] sm:$0xff] %vm7939_vm11, %v2585_v49  ;;  %v2414_v33 = vmul.f32 %v3406_v46, %v4756_v3  ;;  %v1965_v36 = vmul.f32 %v3374_v26, %v4764_v39  ;;  %v7509_v19 = vrot.slane %v4577_v32, 1  ;;  %v3272_v21 = vadd.s32 4294967247, %v293_v23 }
 0x155   :  { %vm4981_vm5 = vmand %vm2074_vm6, %vm2090_vm2  ;;  %v2594_v16 = vmul.f32 %v2578_v7, %v4976_v24  ;;  %v246_v45 = vadd.f32 %v4070_v51, %v245_v9  ;;  %vm7507_vm2 = vcmp.ge.s32.totalorder %v4979_v56, 0  ;;  %vm7945_vm3 = vcmp.ge.s32.totalorder %v4137_v17, 0 }
 0x156   :  { %v7941_v12 = vsel %vm4981_vm5, 4294967295, %v7940_v12  ;;  %vm4993_vm15 = vmand %vm4938_vm13, %vm7516_vm0  ;;  %v3418_v46 = vsel %vm4954_vm9, 1.0, %v7741_v54  ;;  %2456 = vrot.lane.b32.xlu1 %v2414_v33, %s3605_s26  ;;  %vm7513_vm11 = vcmp.lt.s32.totalorder %v4979_v56, 7  ;;  %vm517_vm6 = vcmp.ge.s32.totalorder %v3272_v21, 21  ;;  %2007 = vrot.lane.b32.xlu0 %v1965_v36, %s3607_s28 }
 0x157   :  { %7942 = vst [vmem:[#allocation64_spill] sm:$0xff] %v7941_v12  ;;  %vm5005_vm8 = vmand %vm4924_vm12, %vm7945_vm3  ;;  %vm7950_vm3 = vcmask 261120   ;;  %v5025_v26 = vmax.f32 %v246_v45, 0.0  ;;  %v3335_v20 = vsel %vm4915_vm14, 1.0, %v7741_v54  ;;  %v7951_v18 = vrot.slane %v4577_v32, 7  ;;  %v2626_v45 = vld [vmem:[#allocation2 + $0x70] sm:$0xff]  ;;  %v248_v7 = vpop.f32.mrf.mxu1 }
 0x158   :  { %vm5020_vm13 = vmand %vm4981_vm5, %vm7507_vm2  ;;  %2610 = vst.msk [vmem:[#allocation2 + $0x160] sm:$0xff] %vm7950_vm3, %v2594_v16  ;;  %v7952_v62 = vrot.slane %v4436_v47, 7  ;;  %vm7953_vm9 = vcmp.lt.s32.totalorder %v3830_v22, 1  ;;  %v533_v9 = vsel %vm517_vm6, 1, %v7727_v34  ;;  %vm7954_vm3 = vcmp.ge.s32.totalorder %v4081_v30, 0 }
 0x159   :  { %vm5044_vm2 = vmand %vm4334_vm7, %vm7954_vm3  ;;  %v3303_v48 = vsel %vm4993_vm15, 1.0, %v7741_v54  ;;  %v7957_v16 = vrot.slane %v4436_v47, 1  ;;  %vm7958_vm14 = vcmp.lt.s32.totalorder %v3830_v22, 7  ;;  %vm7959_vm6 = vcmp.lt.s32.totalorder %v4137_v17, 7 }
 0x15a   :  { %v5037_v23 = vsel %vm7953_vm9, %v7952_v62, %v7951_v18  ;;  %vm1314_vm9 = vmand %vm5005_vm8, %vm7959_vm6  ;;  %v5061_v18 = vadd.s32 2, %v533_v9  ;;  %v2062_v62 = vadd.s32 1, %v4064_v50  ;;  %v5064_v3 = vmax.f32 %v259_v1, 0.0 }
 0x15b   :  { %v1146_v33 = vsel %vm7958_vm14, %v7957_v16, %v7509_v19  ;;  %v2586_v49 = vmul.f32 %v3418_v46, %v5025_v26  ;;  %vm5071_vm15 = vmand %vm5020_vm13, %vm7513_vm11  ;;  %v7963_v16 = vrot.slane %v4577_v32, 2  ;;  %v7964_v39 = vrot.slane %v4436_v47, 2  ;;  %v2629_v50 = vld [vmem:[#allocation2 + $0x88] sm:$0xff] }
 0x15c   :  { %7960 = vst [vmem:[#allocation65_spill] sm:$0xff] %v5061_v18  ;;  %vm7965_vm8 = vcmp.lt.s32.totalorder %v3830_v22, 6  ;;  %v3319_v1 = vsel %vm1314_vm9, 1.0, %v7741_v54  ;;  %v709_v46 = vmul.u32 7, %v5061_v18  ;;  %v2059_v19 = vadd.s32 1, %v5061_v18 }
 0x15d   :  { %v1404_v9 = vsel %vm7965_vm8, %v7964_v39, %v7963_v16  ;;  %vm7966_vm13 = vcmp.ge.s32.totalorder %v4308_v8, 0  ;;  %vm7967_vm3 = vnez %v7806_v35  ;;  %vm7968_vm6 = vcmask 261120  }
 0x15e   :  { %vm1886_vm14 = vmand %vm7967_vm3, %vm7966_vm13  ;;  %2602 = vst.msk [vmem:[#allocation2 + $0xa0] sm:$0xff] %vm7968_vm6, %v2586_v49  ;;  %v2668_v12 = vpack.c.bf16 %v2629_v50, %v2626_v45  ;;  %v1669_v28 = vmul.f32 %v3335_v20, %v5037_v23  ;;  %v1153_v16 = vmul.f32 %v3303_v48, %v1146_v33  ;;  %vm7969_vm8 = vcmp.lt.s32.totalorder %v4081_v30, 7 }
 0x15f   :  { %vm5095_vm9 = vmand %vm5044_vm2, %vm7969_vm8  ;;  %vm2078_vm11 = vcmp.ge.s32.totalorder %v2062_v62, 0  ;;  %v5099_v18 = vsub.s32 %v3272_v21, %v709_v46  ;;  %vm2075_vm0 = vcmp.ge.s32.totalorder %v2059_v19, 0  ;;  %vm2091_vm13 = vcmp.lt.s32.totalorder %v2059_v19, 7 }
 0x160   :  { %vm2094_vm3 = vcmp.lt.s32.totalorder %v2062_v62, 7  ;;  %vm7972_vm6 = vcmp.lt.s32.totalorder %v4308_v8, 7  ;;  %v249_v30 = vadd.f32 %v4070_v51, %v248_v7  ;;  %vm7975_vm5 = vcmask 261120   ;;  %vm5109_vm2 = vmand %vm2075_vm0, %vm2091_vm13  ;;  %1704 = vrot.lane.b32.xlu2 %v1669_v28, %s3605_s26  ;;  %1188 = vrot.lane.b32.xlu1 %v1153_v16, %s3607_s28 }
 0x161   :  { %vm5103_vm7 = vmand %vm1886_vm14, %vm7972_vm6  ;;  %3502 = vmatmul.msk.bf16.gmra.mxu0 %vm7975_vm5, %v2668_v12  ;;  %v1411_v36 = vmul.f32 %v3319_v1, %v1404_v9  ;;  %v7976_v45 = vmov 0  ;;  %v3382_v21 = vsel %vm4963_vm1, 1.0, %v7741_v54  ;;  %v3398_v19 = vsel %vm4971_vm10, 1.0, %v7741_v54 }
 0x162   :  { %v7977_v45 = vsel %vm5109_vm2, 4294967295, %v7976_v45  ;;  %v3419_v48 = vsel %vm5071_vm15, 1.0, %v7741_v54  ;;  %v5125_v12 = vadd.s32 1, %v5099_v18  ;;  %v7980_v49 = vrot.slane %v4577_v32, 6  ;;  %vm5134_vm1 = vmand %vm2078_vm11, %vm2094_vm3 }
 0x163   :  { %7978 = vst [vmem:[#allocation66_spill] sm:$0xff] %v7977_v45  ;;  %v7981_v59 = vrot.slane %v4436_v47, 6  ;;  %vm7982_vm5 = vcmp.lt.s32.totalorder %v3830_v22, 2  ;;  %v5141_v28 = vmax.f32 %v249_v30, 0.0  ;;  %1446 = vrot.lane.b32.xlu0 %v1411_v36, %s3606_s27  ;;  %v3366_v50 = vsel %vm5095_vm9, 1.0, %v7741_v54 }
 0x164   :  { %7979 = vst [vmem:[#allocation67_spill] sm:$0xff] %v5125_v12  ;;  %v7522_v1 = vrot.slane %v5064_v3, 7  ;;  %vm7985_vm10 = vcmp.ge.s32.totalorder %v4190_v2, 0  ;;  %vm7524_vm11 = vcmp.ge.s32.totalorder %v5125_v12, 0  ;;  %vm7523_vm15 = vcmp.lt.s32.totalorder %v5125_v12, 7 }
 0x165   :  { %v2224_v9 = vsel %vm7982_vm5, %v7981_v59, %v7980_v49  ;;  %vm2335_vm0 = vmand %vm5134_vm1, %vm7985_vm10  ;;  %vm7986_vm3 = vcmp.lt.s32.totalorder %v4190_v2, 7  ;;  %v3276_v7 = vadd.s32 4294967247, %v5139_v14  ;;  %vm377_vm8 = vcmp.ge.s32.totalorder %v5139_v14, 98 }
 0x166   :  { %vm5157_vm14 = vmand %vm2335_vm0, %vm7986_vm3  ;;  %v2587_v16 = vmul.f32 %v3419_v48, %v5141_v28  ;;  %v393_v30 = vsel %vm377_vm8, 1, %v7727_v34  ;;  %vm7989_vm6 = vcmask 261120   ;;  %v2230_v49 = vmul.f32 %v3382_v21, %v2224_v9  ;;  %v250_v48 = vpop.f32.mrf.mxu1 }
 0x167   :  { %vm2508_vm9 = vmand %vm5109_vm2, %vm7524_vm11  ;;  %v409_v36 = vmul.u32 49, %v393_v30  ;;  %v2406_v59 = vmul.f32 %v3398_v19, %v5037_v23  ;;  %v1957_v62 = vmul.f32 %v3366_v50, %v1146_v33  ;;  %vm7990_vm5 = vcmp.ge.s32.totalorder %v4308_v8, 0 }
 0x168   :  { %vm2524_vm13 = vmand %vm2508_vm9, %vm7523_vm15  ;;  %2603 = vst.msk [vmem:[#allocation2 + $0xb8] sm:$0xff] %vm7989_vm6, %v2587_v16  ;;  %v7991_v39 = vrot.slane %v4596_v63, 7  ;;  %vm7992_vm0 = vcmp.lt.s32.totalorder %v3830_v22, 1  ;;  %vm7993_vm3 = vcmp.lt.s32.totalorder %v4308_v8, 7  ;;  %v7994_v23 = vrot.slane %v5064_v3, 1  ;;  %2264 = vrot.lane.b32.xlu2 %v2230_v49, %s3606_s27 }
 0x169   :  { %vm2511_vm10 = vmand %vm5134_vm1, %vm7990_vm5  ;;  %v7995_v33 = vrot.slane %v4596_v63, 1  ;;  %vm7996_vm9 = vcmp.lt.s32.totalorder %v3830_v22, 7  ;;  %v3375_v19 = vsel %vm5103_vm7, 1.0, %v7741_v54  ;;  %v5199_v9 = vsub.s32 %v3276_v7, %v409_v36  ;;  %2440 = vrot.lane.b32.xlu1 %v2406_v59, %s3605_s26  ;;  %v2632_v59 = vld [vmem:[#allocation2 + $0xa0] sm:$0xff] }
 0x16a   :  { %v5184_v45 = vsel %vm7992_vm0, %v7991_v39, %v7522_v1  ;;  %vm2527_vm8 = vmand %vm2511_vm10, %vm7993_vm3  ;;  %v251_v50 = vadd.f32 %v4070_v51, %v250_v48  ;;  %v3420_v16 = vsel %vm2524_vm13, 1.0, %v7741_v54  ;;  %vm7997_vm6 = vcmp.ge.s32.totalorder %v4266_v41, 0 }
 0x16b   :  { %v5194_v21 = vsel %vm7996_vm9, %v7995_v33, %v7994_v23  ;;  %v3423_v8 = vsel %vm2527_vm8, 1.0, %v7741_v54  ;;  %vm2126_vm5 = vmand %vm5134_vm1, %vm7997_vm6  ;;  %v7998_v39 = vrot.slane %v5064_v3, 6  ;;  %v7999_v30 = vrot.slane %v4596_v63, 6  ;;  %1991 = vrot.lane.b32.xlu0 %v1957_v62, %s3607_s28 }
 0x16c   :  { %vm8000_vm10 = vcmp.lt.s32.totalorder %v3830_v22, 2  ;;  %v2591_v51 = vmul.f32 %v3423_v8, %v5064_v3  ;;  %vm441_vm7 = vcmp.ge.s32.totalorder %v5199_v9, 7  ;;  %vm473_vm13 = vcmp.ge.s32.totalorder %v5199_v9, 14 }
 0x16d   :  { %v2215_v20 = vsel %vm8000_vm10, %v7999_v30, %v7998_v39  ;;  %vm521_vm0 = vcmp.ge.s32.totalorder %v5199_v9, 21  ;;  %v5220_v43 = vmax.f32 %v251_v50, 0.0  ;;  %v3407_v7 = vsel %vm5157_vm14, 1.0, %v7741_v54 }
 0x16e   :  { %vm8002_vm1 = vcmp.lt.s32.totalorder %v4266_v41, 7  ;;  %v457_v36 = vsel %vm441_vm7, 1, %v7727_v34  ;;  %v489_v49 = vsel %vm473_vm13, 1, %v7727_v34  ;;  %vm8003_vm8 = vcmask 261120  }
 0x16f   :  { %8001 = vst [vmem:[#allocation68_spill] sm:$0xff] %v5220_v43  ;;  %vm2142_vm3 = vmand %vm2126_vm5, %vm8002_vm1  ;;  %v505_v48 = vadd.s32 %v489_v49, %v457_v36  ;;  %v537_v23 = vsel %vm521_vm0, 1, %v7727_v34  ;;  %vm569_vm9 = vcmp.ge.s32.totalorder %v5199_v9, 28  ;;  %vm1509_vm6 = vcmp.ge.s32.totalorder %v4092_v10, 0  ;;  %v2635_v33 = vld [vmem:[#allocation2 + $0xb8] sm:$0xff] }
 0x170   :  { %2607 = vst.msk [vmem:[#allocation2 + $0x118] sm:$0xff] %vm8003_vm8, %v2591_v51  ;;  %v2588_v62 = vmul.f32 %v3420_v16, %v5220_v43  ;;  %v585_v46 = vsel %vm569_vm9, 1, %v7727_v34  ;;  %vm617_vm14 = vcmp.ge.s32.totalorder %v5199_v9, 35  ;;  %vm1525_vm5 = vcmp.lt.s32.totalorder %v4092_v10, 7  ;;  %vm8005_vm0 = vmmov %vm8003_vm8 }
 0x171   :  { %v3391_v50 = vsel %vm2142_vm3, 1.0, %v7741_v54  ;;  %v553_v8 = vadd.s32 %v537_v23, %v505_v48  ;;  %vm665_vm10 = vcmp.ge.s32.totalorder %v5199_v9, 42  ;;  %vm8004_vm7 = vcmp.ge.s32.totalorder %v4137_v17, 0  ;;  %vm5254_vm1 = vmand %vm1509_vm6, %vm1525_vm5 }
 0x172   :  { %vm1878_vm13 = vmand %vm4877_vm4, %vm8004_vm7  ;;  %v5245_v39 = vadd.s32 4294967295, %v4225_v37  ;;  %2604 = vst.msk [vmem:[#allocation2 + $0xd0] sm:$0xff] %vm8005_vm0, %v2588_v62  ;;  %v2671_v16 = vpack.c.bf16 %v2635_v33, %v2632_v59  ;;  %v633_v30 = vsel %vm617_vm14, 1, %v7727_v34  ;;  %v2415_v51 = vmul.f32 %v3407_v7, %v5184_v45 }
 0x173   :  { %v1966_v36 = vmul.f32 %v3375_v19, %v5194_v21  ;;  %v601_v49 = vadd.s32 %v585_v46, %v553_v8  ;;  %v7527_v48 = vrot.slane %v4704_v31, 1  ;;  %v8006_v23 = vmov 0  ;;  %vm8009_vm3 = vmmov %vm8005_vm0 }
 0x174   :  { %v8007_v23 = vsel %vm5254_vm1, 4294967295, %v8006_v23  ;;  %3503 = vmatmul.msk.bf16.gmra.mxu0 %vm8009_vm3, %v2671_v16  ;;  %v2239_v1 = vmul.f32 %v3391_v50, %v2215_v20  ;;  %v681_v59 = vsel %vm665_vm10, 1, %v7727_v34  ;;  %vm8010_vm8 = vcmp.lt.s32.totalorder %v4137_v17, 7  ;;  %2458 = vrot.lane.b32.xlu2 %v2415_v51, %s3605_s26 }
 0x175   :  { %8008 = vst [vmem:[#allocation69_spill] sm:$0xff] %v8007_v23  ;;  %vm1894_vm9 = vmand %vm1878_vm13, %vm8010_vm8  ;;  %v785_v7 = vadd.s32 4294967295, %v4092_v10  ;;  %2009 = vrot.lane.b32.xlu1 %v1966_v36, %s3607_s28  ;;  %v649_v19 = vadd.s32 %v633_v30, %v601_v49  ;;  %vm7526_vm6 = vcmp.ge.s32.totalorder %v5245_v39, 0  ;;  %v8011_v10 = vrot.slane %v4577_v32, 1 }
 0x176   :  { %2282 = vrot.lane.b32.xlu0 %v2239_v1, %s3606_s27  ;;  %vm1557_vm14 = vmand %vm5254_vm1, %vm7526_vm6  ;;  %vm8012_vm5 = vcmp.lt.s32.totalorder %v3830_v22, 7  ;;  %v3367_v62 = vsel %vm1894_vm9, 1.0, %v7741_v54  ;;  %v298_v46 = vadd.s32 104, %v3830_v22  ;;  %v5286_v1 = vld [vmem:[%s7351_s4] ss:$0 sm:$0xff]  ;;  %vm8013_vm10 = vcmp.ge.s32.totalorder %v4100_v27, 0 }
 0x177   :  { %v5271_v20 = vadd.s32 %v681_v59, %v649_v19  ;;  %v5279_v17 = vsel %vm8012_vm5, %v8011_v10, %v7527_v48  ;;  %v261_v33 = vadd.f32 %v5286_v1, %v4718_v58  ;;  %vm8014_vm7 = vnez %v7743_v13 }
 0x178   :  { %vm5294_vm13 = vmand %vm8014_vm7, %vm8013_vm10  ;;  %vm7525_vm0 = vcmp.lt.s32.totalorder %v5245_v39, 7  ;;  %vm801_vm3 = vcmp.ge.s32.totalorder %v785_v7, 0  ;;  %vm817_vm8 = vcmp.lt.s32.totalorder %v785_v7, 7  ;;  %v3277_v51 = vadd.s32 4294967247, %v298_v46 }
 0x179   :  { %v713_v8 = vmul.u32 7, %v5271_v20  ;;  %v793_v16 = vadd.s32 4294967295, %v5271_v20  ;;  %v2063_v30 = vadd.s32 1, %v5271_v20  ;;  %vm5304_vm9 = vmand %vm1557_vm14, %vm7525_vm0  ;;  %v7532_v36 = vrot.slane %v5064_v3, 2 }
 0x17a   :  { %v1958_v49 = vmul.f32 %v3367_v62, %v5279_v17  ;;  %v7533_v59 = vrot.slane %v4704_v31, 7  ;;  %vm8019_vm10 = vcmp.ge.s32.totalorder %v4291_v61, 0  ;;  %vm5325_vm6 = vmand %vm801_vm3, %vm817_vm8  ;;  %v8022_v62 = vmov 0 }
 0x17b   :  { %vm5316_vm15 = vmand %vm8014_vm7, %vm8019_vm10  ;;  %v5321_v10 = vsub.s32 %v5199_v9, %v713_v8  ;;  %vm809_vm14 = vcmp.ge.s32.totalorder %v793_v16, 0  ;;  %vm825_vm11 = vcmp.lt.s32.totalorder %v793_v16, 7  ;;  %vm2079_vm0 = vcmp.ge.s32.totalorder %v2063_v30, 0  ;;  %v2638_v16 = vld [vmem:[#allocation2 + $0xd0] sm:$0xff] }
 0x17c   :  { %v8023_v62 = vsel %vm5325_vm6, 4294967295, %v8022_v62  ;;  %v5329_v46 = vmax.f32 %v261_v33, 0.0  ;;  %vm5331_vm5 = vmand %vm809_vm14, %vm825_vm11  ;;  %v8025_v13 = vmov 0  ;;  %vm2095_vm7 = vcmp.lt.s32.totalorder %v2063_v30, 7 }
 0x17d   :  { %8024 = vst [vmem:[#allocation70_spill] sm:$0xff] %v8023_v62  ;;  %v8026_v13 = vsel %vm5331_vm5, 4294967295, %v8025_v13  ;;  %v3280_v48 = vadd.s32 4294967247, %v3277_v51  ;;  %v5336_v9 = vadd.s32 1, %v5321_v10  ;;  %vm5338_vm10 = vmand %vm2079_vm0, %vm2095_vm7  ;;  %v8028_v8 = vmov 0  ;;  %1993 = vrot.lane.b32.xlu1 %v1958_v49, %s3607_s28 }
 0x17e   :  { %8027 = vst [vmem:[#allocation71_spill] sm:$0xff] %v8026_v13  ;;  %v8029_v8 = vsel %vm5338_vm10, 4294967295, %v8028_v8  ;;  %vm7530_vm3 = vcmp.ge.s32.totalorder %v5321_v10, 0  ;;  %vm7546_vm8 = vcmp.lt.s32.totalorder %v5321_v10, 7  ;;  %vm8030_vm11 = vcmp.lt.s32.totalorder %v4291_v61, 7 }
 0x17f   :  { %vm5349_vm14 = vmand %vm5316_vm15, %vm8030_vm11  ;;  %vm8033_vm0 = vcmp.lt.s32.totalorder %v5139_v14, 98  ;;  %v8034_v30 = vrot.slane %v4577_v32, 7  ;;  %vm8035_vm15 = vcmp.lt.s32.totalorder %v3830_v22, 1  ;;  %v3336_v14 = vsel %vm5304_vm9, 1.0, %v7741_v54 }
 0x180   :  { %v5357_v33 = vsel %vm8033_vm0, 1.0, %v7741_v54  ;;  %vm1033_vm7 = vmand %vm5331_vm5, %vm7530_vm3  ;;  %vm442_vm11 = vcmp.ge.s32.totalorder %v3280_v48, 7  ;;  %v8036_v49 = vrot.slane %v4596_v63, 2  ;;  %vm8037_vm3 = vcmp.lt.s32.totalorder %v3830_v22, 6 }
 0x181   :  { %v5369_v51 = vsel %vm8035_vm15, %v8034_v30, %v7533_v59  ;;  %vm1065_vm15 = vmand %vm1033_vm7, %vm7546_vm8  ;;  %vm8038_vm4 = vcmp.lt.s32.totalorder %v4100_v27, 7  ;;  %vm8041_vm2 = vcmp.ge.s32.totalorder %v4254_v42, 0  ;;  %v7557_v35 = vrot.slane %v4704_v31, 6 }
 0x182   :  { %v1395_v19 = vsel %vm8037_vm3, %v8036_v49, %v7532_v36  ;;  %vm5388_vm9 = vmand %vm5294_vm13, %vm8038_vm4  ;;  %v5401_v49 = vsel %vm442_vm11, 1, %v7727_v34  ;;  %vm8044_vm3 = vcmp.ge.s32.totalorder %v5336_v9, 0  ;;  %v3312_v50 = vsel %vm1065_vm15, 1.0, %v7741_v54  ;;  %v2641_v36 = vld [vmem:[#allocation2 + $0xe8] sm:$0xff] }
 0x183   :  { %vm5396_vm0 = vmand %vm5325_vm6, %vm8041_vm2  ;;  %v714_v59 = vmul.u32 7, %v5401_v49  ;;  %v794_v60 = vadd.s32 4294967295, %v5401_v49  ;;  %v2064_v27 = vadd.s32 1, %v5401_v49  ;;  %vm8045_vm4 = vcmp.ge.s32.totalorder %v4225_v37, 0 }
 0x184   :  { %vm1291_vm7 = vmand %vm5331_vm5, %vm8044_vm3  ;;  %vm8048_vm13 = vcmp.lt.s32.totalorder %v5336_v9, 7  ;;  %v1113_v13 = vmul.f32 %v3312_v50, %v5357_v33  ;;  %v2674_v43 = vpack.c.bf16 %v2641_v36, %v2638_v16  ;;  %v1670_v63 = vmul.f32 %v3336_v14, %v5369_v51 }
 0x185   :  { %vm5415_vm2 = vmand %vm5325_vm6, %vm8045_vm4  ;;  %v5429_v62 = vsub.s32 %v3280_v48, %v714_v59  ;;  %vm810_vm4 = vcmp.ge.s32.totalorder %v794_v60, 0  ;;  %vm826_vm8 = vcmp.lt.s32.totalorder %v794_v60, 7  ;;  %v7556_v16 = vrot.slane %v5329_v46, 1 }
 0x186   :  { %vm1323_vm11 = vmand %vm1291_vm7, %vm8048_vm13  ;;  %v1162_v36 = vmul.f32 %v5194_v21, %v1113_v13  ;;  %vm2080_vm6 = vcmp.ge.s32.totalorder %v2064_v27, 0  ;;  %vm2096_vm12 = vcmp.lt.s32.totalorder %v2064_v27, 7  ;;  %v264_v60 = vadd.f32 %v5286_v1, %v4832_v40  ;;  %1706 = vrot.lane.b32.xlu1 %v1670_v63, %s3605_s26  ;;  %v3551_v13 = vld [vmem:[%s7352_s5 + $0x78] sm:$0xff] }
 0x187   :  { %v3328_v2 = vsel %vm1323_vm11, 1.0, %v7741_v54  ;;  %vm8049_vm15 = vmmov %vm8044_vm3  ;;  %vm8051_vm11 = vcmask 261120   ;;  %v786_v40 = vadd.s32 4294967295, %v4365_v29  ;;  %v8054_v63 = vrot.slane %v4577_v32, 6  ;;  %2905 = vmatpush.bf16.msrb.mxu3 %v3551_v13 }
 0x188   :  { %vm2512_vm3 = vmand %vm5338_vm10, %vm8049_vm15  ;;  %v1371_v12 = vmul.f32 %v3328_v2, %v5357_v33  ;;  %3504 = vmatmul.msk.bf16.gmra.mxu0 %vm8051_vm11, %v2674_v43  ;;  %vm7553_vm15 = vcmp.ge.s32.totalorder %v5429_v62, 0  ;;  %v5444_v2 = vadd.s32 1, %v5429_v62  ;;  %1206 = vrot.lane.b32.xlu0 %v1162_v36, %s3607_s28  ;;  %vm8055_vm11 = vcmp.lt.s32.totalorder %v3830_v22, 2 }
 0x189   :  { %vm8050_vm7 = vmmov %vm8048_vm13  ;;  %v2223_v43 = vsel %vm8055_vm11, %v8054_v63, %v7557_v35  ;;  %v8056_v59 = vmov 0  ;;  %vm8061_vm11 = vcmask 261120   ;;  %v3399_v7 = vsel %vm5388_vm9, 1.0, %v7741_v54 }
 0x18a   :  { %vm2528_vm13 = vmand %vm2512_vm3, %vm8050_vm7  ;;  %v1420_v21 = vmul.f32 %v1395_v19, %v1371_v12  ;;  %vm7552_vm3 = vcmp.lt.s32.totalorder %v5429_v62, 7  ;;  %vm7554_vm7 = vcmp.ge.s32.totalorder %v5444_v2, 0  ;;  %v3383_v19 = vsel %vm5349_vm14, 1.0, %v7741_v54 }
 0x18b   :  { %v3424_v14 = vsel %vm2528_vm13, 1.0, %v7741_v54  ;;  %vm5438_vm5 = vmand %vm810_vm4, %vm826_vm8  ;;  %vm7555_vm13 = vcmp.lt.s32.totalorder %v5444_v2, 7  ;;  %v5524_v30 = vadd.s32 4294967295, %v4495_v5  ;;  %v8070_v34 = vmov 0 }
 0x18c   :  { %v2576_v48 = vmul.f32 %v3424_v14, %v5357_v33  ;;  %vm1034_vm8 = vmand %vm5438_vm5, %vm7553_vm15  ;;  %1464 = vrot.lane.b32.xlu2 %v1420_v21, %s3606_s27  ;;  %v8059_v14 = vrot.slane %v5064_v3, 1  ;;  %v5495_v21 = vmax.f32 %v264_v60, 0.0  ;;  %vm1526_vm15 = vcmp.lt.s32.totalorder %v4365_v29, 7 }
 0x18d   :  { %vm1066_vm4 = vmand %vm1034_vm8, %vm7552_vm3  ;;  %vm1510_vm3 = vcmp.ge.s32.totalorder %v4365_v29, 0  ;;  %v8131_v35 = vrot.slane %v4704_v31, 6 }
 0x18e   :  { %v2592_v12 = vmul.f32 %v2576_v48, %v5329_v46  ;;  %v3313_v1 = vsel %vm1066_vm4, 1.0, %v7741_v54  ;;  %vm5472_vm8 = vmand %vm2080_vm6, %vm2096_vm12  ;;  %vm8060_vm4 = vcmp.lt.s32.totalorder %v3830_v22, 7  ;;  %vm7564_vm6 = vcmp.lt.s32.totalorder %v4225_v37, 7 }
 0x18f   :  { %v8057_v59 = vsel %vm5472_vm8, 4294967295, %v8056_v59  ;;  %v1114_v36 = vmul.f32 0.0, %v3313_v1  ;;  %v5488_v27 = vsel %vm8060_vm4, %v8059_v14, %v7556_v16  ;;  %vm2513_vm12 = vmand %vm5472_vm8, %vm7554_vm7  ;;  %vm8062_vm4 = vcmp.lt.s32.totalorder %v4254_v42, 7  ;;  %v3550_v14 = vld [vmem:[%s7352_s5 + $0x70] sm:$0xff] }
 0x190   :  { %8058 = vst [vmem:[#allocation72_spill] sm:$0xff] %v8057_v59  ;;  %vm2529_vm14 = vmand %vm2513_vm12, %vm7555_vm13  ;;  %vm802_vm12 = vcmp.ge.s32.totalorder %v786_v40, 0  ;;  %v8067_v1 = vmov 0  ;;  %2906 = vmatpush.bf16.msrb.mxu3 %v3550_v14  ;;  %v3549_v14 = vld [vmem:[%s7352_s5 + $0x68] sm:$0xff]  ;;  %vm7570_vm8 = vcmp.lt.s32.totalorder %v5524_v30, 7 }
 0x191   :  { %2608 = vst.msk [vmem:[#allocation2 + $0x130] sm:$0xff] %vm8061_vm11, %v2592_v12  ;;  %vm5509_vm7 = vmand %vm5396_vm0, %vm8062_vm4  ;;  %v3425_v48 = vsel %vm2529_vm14, 1.0, %v7741_v54  ;;  %vm818_vm11 = vcmp.lt.s32.totalorder %v786_v40, 7  ;;  %v2231_v12 = vmul.f32 %v3383_v19, %v2223_v43  ;;  %v1163_v29 = vmul.f32 %v5488_v27, %v1114_v36  ;;  %v2647_v36 = vld [vmem:[#allocation2 + $0x118] sm:$0xff] }
 0x192   :  { %v2577_v63 = vmul.f32 0.0, %v3425_v48  ;;  %vm5519_vm9 = vmand %vm5415_vm2, %vm7564_vm6  ;;  %v7558_v40 = vrot.slane %v4818_v44, 1  ;;  %v2407_v43 = vmul.f32 %v3399_v7, %v5369_v51  ;;  %vm7563_vm14 = vcmp.ge.s32.totalorder %v4495_v5, 0  ;;  %v5548_v51 = vpop.permute.xlu2 %1700 }
 0x193   :  { %vm5526_vm0 = vmand %vm1510_vm3, %vm1526_vm15  ;;  %2266 = vrot.lane.b32.xlu0 %v2231_v12, %s3606_s27  ;;  %1208 = vrot.lane.b32.xlu1 %v1163_v29, %s3607_s28  ;;  %v1379_v19 = vrot.slane %v4704_v31, 2  ;;  %vm7559_vm3 = vcmp.lt.s32.totalorder %v4495_v5, 7  ;;  %vm8073_vm4 = vcmask 261120   ;;  %v3304_v7 = vsel %vm5519_vm9, 1.0, %v7741_v54 }
 0x194   :  { %v8068_v1 = vsel %vm5526_vm0, 4294967295, %v8067_v1  ;;  %v2593_v13 = vmul.f32 %v2577_v63, %v5495_v21  ;;  %vm5535_vm2 = vmand %vm802_vm12, %vm818_vm11  ;;  %2442 = vrot.lane.b32.xlu2 %v2407_v43, %s3605_s26  ;;  %vm7560_vm11 = vcmp.ge.s32.totalorder %v5524_v30, 0  ;;  %v8074_v12 = vrot.slane %v4704_v31, 1  ;;  %v2644_v63 = vld [vmem:[#allocation2 + $0x100] sm:$0xff]  ;;  %2907 = vmatpush.bf16.msrb.mxu3 %v3549_v14 }
 0x195   :  { %8069 = vst [vmem:[#allocation73_spill] sm:$0xff] %v8068_v1  ;;  %v8071_v34 = vsel %vm5535_vm2, 4294967295, %v8070_v34  ;;  %vm1026_vm15 = vmand %vm5535_vm2, %vm7563_vm14  ;;  %v3320_v43 = vsel %vm5509_vm7, 1.0, %v7741_v54  ;;  %v2677_v16 = vpack.c.bf16 %v2647_v36, %v2644_v63  ;;  %vm8084_vm7 = vcmp.ge.s32.totalorder %v5245_v39, 0  ;;  %v8088_v63 = vld [vmem:[#allocation28_spill] sm:$0xff]  ;;  %v8127_v1 = vld [vmem:[#allocation42_spill] sm:$0xff] }
 0x196   :  { %8072 = vst [vmem:[#allocation74_spill] sm:$0xff] %v8071_v34  ;;  %vm1058_vm12 = vmand %vm1026_vm15, %vm7559_vm3  ;;  %vm8076_vm15 = vcmp.ge.s32.totalorder %v4565_v55, 0  ;;  %vm8085_vm3 = vnez %v7789_v52  ;;  %vm8094_vm14 = vcmask 261120   ;;  %vm8095_vm6 = vcmp.ge.s32.totalorder %v4225_v37, 0  ;;  %v3547_v36 = vld [vmem:[%s7352_s5 + $0x58] sm:$0xff] }
 0x197   :  { %2609 = vst.msk [vmem:[#allocation2 + $0x148] sm:$0xff] %vm8073_vm4, %v2593_v13  ;;  %v3305_v48 = vsel %vm1058_vm12, 1.0, %v7741_v54  ;;  %vm8075_vm4 = vcmp.lt.s32.totalorder %v3830_v22, 7  ;;  %vm1284_vm13 = vmand %vm5535_vm2, %vm8076_vm15  ;;  %v8079_v13 = vrot.slane %v4577_v32, 2  ;;  %vm8080_vm12 = vcmp.lt.s32.totalorder %v3830_v22, 6 }
 0x198   :  { %v5566_v29 = vsel %vm8075_vm4, %v8074_v12, %v7558_v40  ;;  %vm5576_vm9 = vmand %vm5526_vm0, %vm7560_vm11  ;;  %vm8081_vm4 = vcmp.lt.s32.totalorder %v4565_v55, 7  ;;  %v1154_v40 = vmul.f32 %v3304_v7, %v5279_v17  ;;  %3505 = vmatmul.msk.bf16.gmra.mxu0 %vm8094_vm14, %v2677_v16  ;;  %v7569_v17 = vrot.slane %v4818_v44, 7  ;;  %v3548_v16 = vld [vmem:[%s7352_s5 + $0x60] sm:$0xff] }
 0x199   :  { %v1403_v12 = vsel %vm8080_vm12, %v8079_v13, %v1379_v19  ;;  %vm5589_vm15 = vmand %vm1284_vm13, %vm8081_vm4  ;;  %v1155_v60 = vmul.f32 %v3305_v48, %v5566_v29  ;;  %vm8089_vm13 = vcmp.ge.s32.totalorder %v8088_v63, 0  ;;  %v8090_v13 = vld [vmem:[#allocation30_spill] sm:$0xff]  ;;  %v7568_v7 = vrot.slane %v4818_v44, 2  ;;  %2908 = vmatpush.bf16.msrb.mxu3 %v3548_v16 }
 0x19a   :  { %vm5602_vm12 = vmand %vm8085_vm3, %vm8084_vm7  ;;  %vm8091_vm4 = vnez %v8090_v13  ;;  %v1412_v48 = vmul.f32 %v3320_v43, %v1403_v12  ;;  %vm8097_vm14 = vcmp.ge.s32.totalorder %v4254_v42, 0  ;;  %v5635_v52 = vpop.permute.xlu2 %2260  ;;  %v3321_v12 = vsel %vm5589_vm15, 1.0, %v7741_v54 }
 0x19b   :  { %vm5610_vm11 = vmand %vm8091_vm4, %vm8089_vm13  ;;  %1190 = vrot.lane.b32.xlu0 %v1154_v40, %s3607_s28  ;;  %1192 = vrot.lane.b32.xlu1 %v1155_v60, %s3607_s28  ;;  %vm8096_vm13 = vcmp.lt.s32.totalorder %v4225_v37, 7  ;;  %v8098_v40 = vrot.slane %v4704_v31, 7  ;;  %v787_v13 = vadd.s32 4294967295, %v4834_v25  ;;  %vm8107_vm15 = vcmp.ge.s32.totalorder %v4565_v55, 0 }
 0x19c   :  { %vm2328_vm7 = vmand %vm8085_vm3, %vm8095_vm6  ;;  %1448 = vrot.lane.b32.xlu2 %v1412_v48, %s3606_s27  ;;  %vm8099_vm3 = vcmp.lt.s32.totalorder %v3830_v22, 1  ;;  %v8125_v16 = vrot.slane %v4818_v44, 1  ;;  %v8128_v37 = vmov 0  ;;  %v7582_v14 = vrot.slane %v4919_v6, 7 }
 0x19d   :  { %vm2344_vm4 = vmand %vm2328_vm7, %vm8096_vm13  ;;  %v1660_v43 = vsel %vm8099_vm3, %v8098_v40, %v7569_v17  ;;  %vm8101_vm7 = vcmp.lt.s32.totalorder %v5245_v39, 7  ;;  %v8109_v40 = vld [vmem:[#allocation52_spill] sm:$0xff]  ;;  %v7576_v17 = vrot.slane %v4919_v6, 1  ;;  %2909 = vmatpush.bf16.msrb.mxu3 %v3547_v36 }
 0x19e   :  { %vm1879_vm2 = vmand %vm5254_vm1, %vm8097_vm14  ;;  %v3400_v60 = vsel %vm2344_vm4, 1.0, %v7741_v54  ;;  %vm8104_vm14 = vcmp.lt.s32.totalorder %v4254_v42, 7  ;;  %vm8110_vm4 = vnez %v8109_v40  ;;  %v2650_v40 = vld [vmem:[#allocation2 + $0x130] sm:$0xff] }
 0x19f   :  { %vm1574_vm6 = vmand %vm5576_vm9, %vm7570_vm8  ;;  %vm8100_vm9 = vcmp.lt.s32.totalorder %v3830_v22, 6  ;;  %v2408_v42 = vmul.f32 %v3400_v60, %v1660_v43  ;;  %vm819_vm8 = vcmp.lt.s32.totalorder %v787_v13, 7  ;;  %v3546_v36 = vld [vmem:[%s7352_s5 + $0x50] sm:$0xff] }
 0x1a0   :  { %v1402_v58 = vsel %vm8100_vm9, %v1379_v19, %v7568_v7  ;;  %vm5657_vm13 = vmand %vm5602_vm12, %vm8101_vm7  ;;  %v3337_v19 = vsel %vm1574_vm6, 1.0, %v7741_v54  ;;  %vm8113_vm6 = vcmp.ge.s32.totalorder %v5524_v30, 0 }
 0x1a1   :  { %vm5664_vm3 = vmand %vm1879_vm2, %vm8104_vm14  ;;  %v1413_v48 = vmul.f32 %v3321_v12, %v1402_v58  ;;  %vm8108_vm2 = vcmp.ge.s32.totalorder %v4495_v5, 0  ;;  %v1671_v12 = vmul.f32 %v3337_v19, %v1660_v43  ;;  %v2200_v58 = vrot.slane %v4818_v44, 6  ;;  %v8120_v19 = vld [vmem:[#allocation25_spill] sm:$0xff]  ;;  %2910 = vmatpush.bf16.msrb.mxu3 %v3546_v36 }
 0x1a2   :  { %vm1880_vm12 = vmand %vm5526_vm0, %vm8107_vm15  ;;  %vm8116_vm14 = vcmp.lt.s32.totalorder %v4565_v55, 7  ;;  %v5708_v43 = vadd.s32 4294967295, %v4883_v0  ;;  %v5714_v55 = vpop.permute.xlu2 %2438 }
 0x1a3   :  { %vm5681_vm9 = vmand %vm8110_vm4, %vm8108_vm2  ;;  %1450 = vrot.lane.b32.xlu0 %v1413_v48, %s3606_s27  ;;  %2444 = vrot.lane.b32.xlu1 %v2408_v42, %s3605_s26  ;;  %vm803_vm2 = vcmp.ge.s32.totalorder %v787_v13, 0  ;;  %v5711_v48 = vadd.s32 4294967295, %v8120_v19  ;;  %v2653_v42 = vld [vmem:[#allocation2 + $0x148] sm:$0xff]  ;;  %v3384_v13 = vsel %vm5657_vm13, 1.0, %v7741_v54 }
 0x1a4   :  { %vm5690_vm7 = vmand %vm8110_vm4, %vm8113_vm6  ;;  %vm8119_vm4 = vcmp.lt.s32.totalorder %v8088_v63, 7  ;;  %1708 = vrot.lane.b32.xlu2 %v1671_v12, %s3605_s26  ;;  %v3368_v12 = vsel %vm5664_vm3, 1.0, %v7741_v54  ;;  %vm8132_vm3 = vcmp.lt.s32.totalorder %v3830_v22, 2  ;;  %vm7578_vm13 = vcmp.lt.s32.totalorder %v5708_v43, 7 }
 0x1a5   :  { %vm5699_vm15 = vmand %vm1880_vm12, %vm8116_vm14  ;;  %8121 = vst [vmem:[#allocation28_spill] sm:$0xff] %v5711_v48  ;;  %vm8122_vm12 = vcmp.lt.s32.totalorder %v5524_v30, 7  ;;  %v2222_v34 = vsel %vm8132_vm3, %v8131_v35, %v2200_v58  ;;  %vm7579_vm3 = vcmp.ge.s32.totalorder %v4883_v0, 0  ;;  %v3545_v35 = vld [vmem:[%s7352_s5 + $0x48] sm:$0xff] }
 0x1a6   :  { %vm910_vm6 = vmand %vm5610_vm11, %vm8119_vm4  ;;  %vm1511_vm11 = vcmp.ge.s32.totalorder %v4834_v25, 0  ;;  %vm1527_vm4 = vcmp.lt.s32.totalorder %v4834_v25, 7  ;;  %v3369_v25 = vsel %vm5699_vm15, 1.0, %v7741_v54  ;;  %vm7577_vm15 = vcmp.ge.s32.totalorder %v5708_v43, 0  ;;  %2911 = vmatpush.bf16.msrb.mxu3 %v3545_v35  ;;  %v3544_v35 = vld [vmem:[%s7352_s5 + $0x40] sm:$0xff] }
 0x1a7   :  { %vm5720_vm14 = vmand %vm5690_vm7, %vm8122_vm12  ;;  %v3285_v59 = vsel %vm910_vm6, 1.0, %v7741_v54  ;;  %vm8126_vm7 = vcmp.lt.s32.totalorder %v3830_v22, 7  ;;  %vm8133_vm12 = vcmp.ge.s32.totalorder %v4902_v4, 0 }
 0x1a8   :  { %v5739_v19 = vsel %vm8126_vm7, %v8125_v16, %v7576_v17  ;;  %v974_v23 = vmul.f32 %v3285_v59, %v8127_v1  ;;  %vm5747_vm6 = vmand %vm803_vm2, %vm819_vm8  ;;  %v2680_v59 = vpack.c.bf16 %v2653_v42, %v2650_v40  ;;  %vm8136_vm8 = vcmask 261120  }
 0x1a9   :  { %v8129_v37 = vsel %vm5747_vm6, 4294967295, %v8128_v37  ;;  %vm5759_vm7 = vmand %vm5747_vm6, %vm8133_vm12  ;;  %v8137_v16 = vmov 0  ;;  %v1959_v17 = vmul.f32 %v3368_v12, %v5566_v29  ;;  %v1960_v40 = vmul.f32 %v3369_v25, %v5739_v19  ;;  %v8164_v29 = vld [vmem:[#allocation29_spill] sm:$0xff] }
 0x1aa   :  { %8130 = vst [vmem:[#allocation30_spill] sm:$0xff] %v8129_v37  ;;  %vm5768_vm2 = vmand %vm1511_vm11, %vm1527_vm4  ;;  %v2232_v42 = vmul.f32 %v3384_v13, %v2222_v34  ;;  %v5819_v25 = vpop.permute.xlu2 %1444  ;;  %v1443_v13 = vpop.permute.xlu1 %1442  ;;  %2912 = vmatpush.bf16.msrb.mxu3 %v3544_v35  ;;  %v7587_v37 = vrot.slane %v4976_v24, 2  ;;  %v5888_v35 = vadd.s32 4294967295, %v5321_v10 }
 0x1ab   :  { %990 = vst.msk [vmem:[#allocation2 + $0x18] sm:$0xff] %vm8136_vm8, %v974_v23  ;;  %v8138_v16 = vsel %vm5768_vm2, 4294967295, %v8137_v16  ;;  %vm1559_vm11 = vmand %vm5768_vm2, %vm7577_vm15  ;;  %v7583_v23 = vrot.slane %v4919_v6, 6  ;;  %1995 = vrot.lane.b32.xlu0 %v1959_v17, %s3607_s28  ;;  %1997 = vrot.lane.b32.xlu1 %v1960_v40, %s3607_s28  ;;  %v8147_v17 = vrot.slane %v4818_v44, 7  ;;  %v3385_v40 = vsel %vm5720_vm14, 1.0, %v7741_v54 }
 0x1ac   :  { %vm8139_vm12 = vmmov %vm8136_vm8  ;;  %2268 = vrot.lane.b32.xlu2 %v2232_v42, %s3606_s27  ;;  %v1185_v42 = vpop.permute.xlu0 %1184  ;;  %vm8159_vm14 = vcmask 523520  }
 0x1ad   :  { %3506 = vmatmul.msk.bf16.gmra.mxu0 %vm8139_vm12, %v2680_v59  ;;  %vm5789_vm8 = vmand %vm1559_vm11, %vm7578_vm13  ;;  %vm8144_vm11 = vcmp.lt.s32.totalorder %v4495_v5, 7  ;;  %v8152_v59 = vld [vmem:[#allocation33_spill] sm:$0xff]  ;;  %1232 = vst.msk [vmem:[#allocation2 + $0x18] sm:$0xff] %vm8159_vm14, %v1185_v42 }
 0x1ae   :  { %vm5799_vm15 = vmand %vm5747_vm6, %vm7579_vm3  ;;  %vm8148_vm3 = vcmp.lt.s32.totalorder %v3830_v22, 1  ;;  %vm8153_vm4 = vcmp.ge.s32.totalorder %v8152_v59, 0  ;;  %vm8154_vm6 = vcmp.ge.s32.totalorder %v5711_v48, 0 }
 0x1af   :  { %vm5808_vm13 = vmand %vm5681_vm9, %vm8144_vm11  ;;  %v1659_v12 = vsel %vm8148_vm3, %v8147_v17, %v7582_v14  ;;  %vm8149_vm9 = vcmp.lt.s32.totalorder %v4902_v4, 7  ;;  %vm7585_vm3 = vcmask 1048320   ;;  %v3338_v17 = vsel %vm5789_vm8, 1.0, %v7741_v54 }
 0x1b0   :  { %vm5825_vm11 = vmand %vm5759_vm7, %vm8149_vm9  ;;  %vm8155_vm7 = vcmp.lt.s32.totalorder %v3830_v22, 2  ;;  %vm8160_vm9 = vcmp.lt.s32.totalorder %v8152_v59, 7  ;;  %v3401_v63 = vsel %vm5808_vm13, 1.0, %v7741_v54  ;;  %vm8163_vm8 = vcmask 785920  }
 0x1b1   :  { %vm1279_vm0 = vmand %vm8154_vm6, %vm8153_vm4  ;;  %v2221_v60 = vsel %vm8155_vm7, %v2200_v58, %v7583_v23  ;;  %vm8156_vm6 = vcmp.lt.s32.totalorder %v4883_v0, 7  ;;  %1490 = vst.msk [vmem:[#allocation2 + $0x18] sm:$0xff] %vm8163_vm8, %v1443_v13  ;;  %vm8165_vm7 = vcmp.ge.s32.totalorder %v8164_v29, 0  ;;  %v5874_v59 = vadd.s32 4294967295, %v5429_v62  ;;  %v8169_v23 = vld [vmem:[#allocation26_spill] sm:$0xff]  ;;  %v8171_v13 = vld [vmem:[#allocation31_spill] sm:$0xff] }
 0x1b2   :  { %vm5850_vm4 = vmand %vm5799_vm15, %vm8156_vm6  ;;  %vm8166_vm15 = vcmp.ge.s32.totalorder %v5711_v48, 0  ;;  %v2233_v42 = vmul.f32 %v3385_v40, %v2221_v60  ;;  %1748 = vst.msk [vmem:[#allocation2 + $0x18] sm:$0xff] %vm7585_vm3, %v5548_v51  ;;  %v1672_v34 = vmul.f32 %v3338_v17, %v1659_v12  ;;  %vm8172_vm13 = vnez %v8171_v13  ;;  %v2437_v36 = vpop.permute.xlu1 %2436  ;;  %v2659_v58 = vld [vmem:[#allocation2 + $0x178] sm:$0xff] }
 0x1b3   :  { %vm5857_vm12 = vmand %vm1279_vm0, %vm8160_vm9  ;;  %vm8170_vm0 = vcmp.ge.s32.totalorder %v8169_v23, 0  ;;  %vm1518_vm9 = vcmp.ge.s32.totalorder %v5401_v49, 0  ;;  %vm1534_vm8 = vcmp.lt.s32.totalorder %v5401_v49, 7  ;;  %v2409_v40 = vmul.f32 %v3401_v63, %v1659_v12  ;;  %v8177_v12 = vld [vmem:[#allocation46_spill] sm:$0xff] }
 0x1b4   :  { %vm5869_vm6 = vmand %vm8166_vm15, %vm8165_vm7  ;;  %vm8173_vm7 = vcmp.lt.s32.totalorder %v8169_v23, 7  ;;  %2270 = vrot.lane.b32.xlu0 %v2233_v42, %s3606_s27  ;;  %1710 = vrot.lane.b32.xlu1 %v1672_v34, %s3605_s26  ;;  %vm8174_vm3 = vcmp.lt.s32.totalorder %v8164_v29, 7  ;;  %v8178_v63 = vmov 0  ;;  %v5913_v29 = vpop.permute.xlu2 %1720  ;;  %v2656_v42 = vld [vmem:[#allocation2 + $0x160] sm:$0xff]  ;;  %v3306_v49 = vsel %vm5850_vm4, 1.0, %v7741_v54  ;;  %v1988_v13 = vpop.permute.xlu0 %1987 }
 0x1b5   :  { %vm1764_vm14 = vmand %vm8172_vm13, %vm8170_vm0  ;;  %vm1517_vm13 = vcmp.ge.s32.totalorder %v5271_v20, 0  ;;  %2446 = vrot.lane.b32.xlu2 %v2409_v40, %s3605_s26  ;;  %v3316_v40 = vsel %vm5857_vm12, 1.0, %v7741_v54  ;;  %v8185_v14 = vmov 0  ;;  %vm8187_vm12 = vcmask 523520  }
 0x1b6   :  { %vm1780_vm15 = vmand %vm1764_vm14, %vm8173_vm7  ;;  %vm1533_vm14 = vcmp.lt.s32.totalorder %v5271_v20, 7  ;;  %vm7589_vm7 = vcmp.ge.s32.totalorder %v5874_v59, 0  ;;  %2035 = vst.msk [vmem:[#allocation2 + $0x8] sm:$0xff] %vm8187_vm12, %v1988_v13  ;;  %v8188_v20 = vrot.slane %v4919_v6, 2  ;;  %v2683_v13 = vpack.c.bf16 %v2659_v58, %v2656_v42 }
 0x1b7   :  { %vm5896_vm0 = vmand %vm5869_vm6, %vm8174_vm3  ;;  %v3349_v60 = vsel %vm1780_vm15, 1.0, %v7741_v54  ;;  %vm8183_vm6 = vcmp.lt.s32.totalorder %v3830_v22, 6  ;;  %vm7591_vm15 = vcmp.lt.s32.totalorder %v5888_v35, 7  ;;  %v1156_v48 = vmul.f32 %v3306_v49, %v5739_v19 }
 0x1b8   :  { %v1844_v17 = vmul.f32 %v3349_v60, %v8177_v12  ;;  %vm5908_vm1 = vmand %vm1518_vm9, %vm1534_vm8  ;;  %v8182_v60 = vrot.slane %v8127_v1, 2  ;;  %vm8184_vm9 = vcmask 261120   ;;  %vm7595_vm8 = vcmp.ge.s32.totalorder %v5888_v35, 0 }
 0x1b9   :  { %v8179_v63 = vsel %vm5908_vm1, 4294967295, %v8178_v63  ;;  %vm5919_vm3 = vmand %vm5908_vm1, %vm7589_vm7  ;;  %vm8192_vm7 = vcmask 1048320  }
 0x1ba   :  { %v1407_v23 = vsel %vm8183_vm6, %v7587_v37, %v8182_v60  ;;  %1860 = vst.msk [vmem:[#allocation2 + $0x20] sm:$0xff] %vm8184_vm9, %v1844_v17  ;;  %vm5941_vm4 = vmand %vm1517_vm13, %vm1533_vm14  ;;  %v3322_v17 = vsel %vm5825_vm11, 1.0, %v7741_v54  ;;  %v8189_v60 = vrot.slane %v4818_v44, 2  ;;  %vm8190_vm13 = vcmp.lt.s32.totalorder %v3830_v22, 6  ;;  %v1990_v34 = vpop.permute.xlu1 %1989 }
 0x1bb   :  { %v8186_v14 = vsel %vm5941_vm4, 4294967295, %v8185_v14  ;;  %vm1565_vm6 = vmand %vm5941_vm4, %vm7595_vm8  ;;  %vm8191_vm14 = vcmask 785920   ;;  %vm7590_vm9 = vcmp.lt.s32.totalorder %v5874_v59, 7  ;;  %v1408_v7 = vmul.f32 %v3316_v40, %v1407_v23 }
 0x1bc   :  { %v1401_v37 = vsel %vm8190_vm13, %v8189_v60, %v8188_v20  ;;  %2308 = vst.msk [vmem:[#allocation2 + $0x8] sm:$0xff] %vm8191_vm14, %v5635_v52  ;;  %vm1581_vm12 = vmand %vm1565_vm6, %vm7591_vm15  ;;  %vm8195_vm13 = vcmask 261120   ;;  %v7594_v52 = vrot.slane %v4976_v24, 1  ;;  %vm8196_vm6 = vcmp.ge.s32.totalorder %v5444_v2, 0  ;;  %1194 = vrot.lane.b32.xlu0 %v1156_v48, %s3607_s28 }
 0x1bd   :  { %2484 = vst.msk [vmem:[#allocation2 + $0x8] sm:$0xff] %vm8192_vm7, %v2437_v36  ;;  %vm5971_vm11 = vmand %vm5919_vm3, %vm7590_vm9  ;;  %3507 = vmatmul.msk.bf16.gmra.mxu0 %vm8195_vm13, %v2683_v13  ;;  %v3344_v42 = vsel %vm1581_vm12, 1.0, %v7741_v54  ;;  %v1414_v19 = vmul.f32 %v3322_v17, %v1401_v37  ;;  %v7592_v23 = vrot.slane %v4976_v24, 7  ;;  %1440 = vrot.lane.b32.xlu1 %v1408_v7, %s3606_s27  ;;  %vm8197_vm3 = vcmp.ge.s32.totalorder %v4111_v15, 0  ;;  %v8198_v36 = vld [vmem:[#allocation39_spill] sm:$0xff]  ;;  %v2263_v17 = vpop.permute.xlu0 %2262 }
 0x1be   :  { %vm1292_vm7 = vmand %vm5438_vm5, %vm8196_vm6  ;;  %vm8199_vm14 = vnez %v8198_v36  ;;  %vm8200_vm9 = vcmp.lt.s32.totalorder %v4111_v15, 7  ;;  %v1629_v49 = vmul.f32 %v3344_v42, %v5357_v33  ;;  %vm8201_vm6 = vcmp.lt.s32.totalorder %v5444_v2, 7  ;;  %v6029_v42 = vpop.permute.xlu2 %2280 }
 0x1bf   :  { %vm879_vm13 = vmand %vm8199_vm14, %vm8197_vm3  ;;  %1452 = vrot.lane.b32.xlu2 %v1414_v19, %s3606_s27  ;;  %v3300_v40 = vsel %vm5896_vm0, 1.0, %v7741_v54  ;;  %v8204_v15 = vrot.slane %v8127_v1, 1  ;;  %vm8206_vm3 = vcmask 523520   ;;  %v8209_v13 = vrot.slane %v8127_v1, 7 }
 0x1c0   :  { %vm911_vm12 = vmand %vm879_vm13, %vm8200_vm9  ;;  %vm8205_vm9 = vcmp.lt.s32.totalorder %v3830_v22, 7  ;;  %2036 = vst.msk [vmem:[#allocation2 + $0x20] sm:$0xff] %vm8206_vm3, %v1990_v34  ;;  %vm8210_vm0 = vcmp.lt.s32.totalorder %v3830_v22, 1  ;;  %vm8211_vm14 = vcmask 785920   ;;  %vm8212_vm13 = vcmp.ge.s32.totalorder %v5444_v2, 0 }
 0x1c1   :  { %vm5995_vm15 = vmand %vm1292_vm7, %vm8201_vm6  ;;  %v3286_v48 = vsel %vm911_vm12, 1.0, %v7741_v54  ;;  %v6009_v58 = vsel %vm8205_vm9, %v7594_v52, %v8204_v15  ;;  %v6027_v7 = vsel %vm8210_vm0, %v7592_v23, %v8209_v13  ;;  %2309 = vst.msk [vmem:[#allocation2 + $0x20] sm:$0xff] %vm8211_vm14, %v2263_v17  ;;  %vm8213_vm6 = vcmask 1048320   ;;  %v8220_v15 = vld [vmem:[#allocation50_spill] sm:$0xff] }
 0x1c2   :  { %v975_v60 = vmul.f32 %v3286_v48, %v8177_v12  ;;  %vm6017_vm7 = vmand %vm5338_vm10, %vm7595_vm8  ;;  %2485 = vst.msk [vmem:[#allocation2 + $0x20] sm:$0xff] %vm8213_vm6, %v5714_v55  ;;  %vm8214_vm9 = vcmp.lt.s32.totalorder %v5444_v2, 7  ;;  %v1150_v12 = vmul.f32 %v3300_v40, %v6009_v58  ;;  %v1678_v19 = vmul.f32 %v5184_v45, %v1629_v49  ;;  %v8217_v2 = vld [vmem:[#allocation44_spill] sm:$0xff] }
 0x1c3   :  { %vm1888_vm12 = vmand %vm5908_vm1, %vm8212_vm13  ;;  %v3329_v36 = vsel %vm5995_vm15, 1.0, %v7741_v54  ;;  %vm8215_vm0 = vcmask 261120   ;;  %vm8216_vm14 = vcmp.ge.s32.totalorder %v5336_v9, 0  ;;  %v788_v55 = vadd.s32 4294967295, %v4896_v53 }
 0x1c4   :  { %vm1904_vm3 = vmand %vm1888_vm12, %vm8214_vm9  ;;  %991 = vst.msk [vmem:[#allocation2 + $0x30] sm:$0xff] %vm8215_vm0, %v975_v60  ;;  %v1666_v34 = vmul.f32 %v8217_v2, %v6027_v7  ;;  %v7593_v48 = vrot.slane %v5329_v46, 2  ;;  %v7603_v45 = vrot.slane %v5495_v21, 1  ;;  %vm8218_vm15 = vcmp.lt.s32.totalorder %v5336_v9, 7  ;;  %1182 = vrot.lane.b32.xlu0 %v1150_v12, %s3607_s28  ;;  %v1703_v12 = vpop.permute.xlu1 %1702  ;;  %v2613_v51 = vld [vmem:[#allocation2 + $0x8] sm:$0xff] }
 0x1c5   :  { %vm1887_vm13 = vmand %vm5941_vm4, %vm8216_vm14  ;;  %v3377_v49 = vsel %vm1904_vm3, 1.0, %v7741_v54  ;;  %v7604_v37 = vrot.slane %v5329_v46, 7  ;;  %1722 = vrot.lane.b32.xlu1 %v1678_v19, %s3605_s26  ;;  %vm8219_vm6 = vcmp.ge.s32.totalorder %v4266_v41, 0  ;;  %vm8221_vm9 = vnez %v8220_v15 }
 0x1c6   :  { %vm1903_vm12 = vmand %vm1887_vm13, %vm8218_vm15  ;;  %v6067_v17 = vadd.s32 4294967295, %v4948_v57  ;;  %vm1512_vm3 = vcmp.ge.s32.totalorder %v4896_v53, 0  ;;  %v3345_v9 = vsel %vm5971_vm11, 1.0, %v7741_v54  ;;  %v1372_v60 = vmul.f32 0.0, %v3329_v36 }
 0x1c7   :  { %v3376_v40 = vsel %vm1903_vm12, 1.0, %v7741_v54  ;;  %vm888_vm0 = vmand %vm8221_vm9, %vm8219_vm6  ;;  %vm8222_vm14 = vcmp.lt.s32.totalorder %v4266_v41, 7  ;;  %vm1528_vm15 = vcmp.lt.s32.totalorder %v4896_v53, 7  ;;  %1698 = vrot.lane.b32.xlu2 %v1666_v34, %s3605_s26  ;;  %v1952_v19 = vmul.f32 0.0, %v3377_v49 }
 0x1c8   :  { %v1951_v13 = vmul.f32 %v3376_v40, %v5357_v33  ;;  %vm920_vm13 = vmand %vm888_vm0, %vm8222_vm14  ;;  %vm804_vm12 = vcmp.ge.s32.totalorder %v788_v55, 0  ;;  %vm820_vm6 = vcmp.lt.s32.totalorder %v788_v55, 7  ;;  %v8223_v20 = vrot.slane %v5064_v3, 2  ;;  %v1187_v40 = vpop.permute.xlu0 %1186 }
 0x1c9   :  { %v3295_v2 = vsel %vm920_vm13, 1.0, %v7741_v54  ;;  %vm8224_vm11 = vcmp.lt.s32.totalorder %v3830_v22, 6  ;;  %vm8225_vm9 = vcmp.lt.s32.totalorder %v5888_v35, 7  ;;  %v8228_v34 = vrot.slane %v5329_v46, 1 }
 0x1ca   :  { %v1394_v36 = vsel %vm8224_vm11, %v8223_v20, %v7593_v48  ;;  %vm6089_vm0 = vmand %vm6017_vm7, %vm8225_vm9  ;;  %vm8229_vm14 = vcmp.lt.s32.totalorder %v3830_v22, 7  ;;  %v1967_v15 = vmul.f32 %v1951_v13, %v5488_v27  ;;  %v984_v20 = vmul.f32 %v3295_v2, %v4368_v38  ;;  %v2616_v48 = vld [vmem:[#allocation2 + $0x20] sm:$0xff]  ;;  %v6129_v2 = vpop.permute.xlu2 %1704 }
 0x1cb   :  { %v6099_v49 = vsel %vm8229_vm14, %v8228_v34, %v7603_v45  ;;  %v1630_v23 = vmul.f32 0.0, %v3345_v9  ;;  %vm8230_vm13 = vcmask 523520   ;;  %vm6108_vm7 = vmand %vm1512_vm3, %vm1528_vm15  ;;  %v8231_v52 = vmov 0 }
 0x1cc   :  { %1233 = vst.msk [vmem:[#allocation2 + $0x30] sm:$0xff] %vm8230_vm13, %v1187_v40  ;;  %v8232_v52 = vsel %vm6108_vm7, 4294967295, %v8231_v52  ;;  %v8234_v34 = vrot.slane %v5064_v3, 7  ;;  %vm8235_vm11 = vcmp.lt.s32.totalorder %v3830_v22, 1  ;;  %vm8236_vm9 = vcmask 785920   ;;  %vm6124_vm14 = vmand %vm804_vm12, %vm820_vm6 }
 0x1cd   :  { %8233 = vst [vmem:[#allocation52_spill] sm:$0xff] %v8232_v52  ;;  %v2661_v9 = vpack.c.bf16 %v2616_v48, %v2613_v51  ;;  %v8237_v53 = vmov 0  ;;  %vm7598_vm3 = vcmp.ge.s32.totalorder %v4948_v57, 0  ;;  %v1421_v13 = vmul.f32 %v1394_v36, %v1372_v60  ;;  %v8247_v36 = vld [vmem:[#allocation56_spill] sm:$0xff] }
 0x1ce   :  { %v6118_v27 = vsel %vm8235_vm11, %v8234_v34, %v7604_v37  ;;  %1491 = vst.msk [vmem:[#allocation2 + $0x30] sm:$0xff] %vm8236_vm9, %v5819_v25  ;;  %v8238_v53 = vsel %vm6124_vm14, 4294967295, %v8237_v53  ;;  %vm8239_vm15 = vcmask 1048320   ;;  %v1968_v40 = vmul.f32 %v1952_v19, %v6099_v49  ;;  %vm1028_vm11 = vmand %vm6124_vm14, %vm7598_vm3 }
 0x1cf   :  { %1749 = vst.msk [vmem:[#allocation2 + $0x30] sm:$0xff] %vm8239_vm15, %v1703_v12  ;;  %vm7596_vm13 = vcmp.ge.s32.totalorder %v6067_v17, 0  ;;  %2913 = vmatmul.bf16.vlgmr.msrb.gmra.mxu3 %v2661_v9  ;;  %vm8240_vm12 = vcmask 261120   ;;  %vm7597_vm9 = vcmp.lt.s32.totalorder %v4948_v57, 7  ;;  %v1124_v55 = vrot.slane %v5025_v26, 1  ;;  %1466 = vrot.lane.b32.xlu0 %v1421_v13, %s3606_s27 }
 0x1d0   :  { %1000 = vst.msk [vmem:[#allocation2 + $0x108] sm:$0xff] %vm8240_vm12, %v984_v20  ;;  %vm6143_vm6 = vmand %vm6108_vm7, %vm7596_vm13  ;;  %v1679_v48 = vmul.f32 %v6118_v27, %v1630_v23  ;;  %2013 = vrot.lane.b32.xlu1 %v1968_v40, %s3607_s28  ;;  %v3392_v60 = vsel %vm6089_vm0, 1.0, %v7741_v54  ;;  %v7605_v12 = vrot.slane %v5329_v46, 6  ;;  %vm8243_vm12 = vcmp.ge.s32.totalorder %v4979_v56, 0  ;;  %v1205_v23 = vpop.permute.xlu1 %1204  ;;  %v1463_v41 = vpop.permute.xlu0 %1462 }
 0x1d1   :  { %vm1060_vm15 = vmand %vm1028_vm11, %vm7597_vm9  ;;  %vm8246_vm13 = vcmp.ge.s32.totalorder %v4311_v11, 0  ;;  %vm8248_vm11 = vnez %v8247_v36  ;;  %vm8249_vm3 = vcmask 523520   ;;  %vm7601_vm0 = vcmp.lt.s32.totalorder %v6067_v17, 7 }
 0x1d2   :  { %vm6162_vm8 = vmand %vm6124_vm14, %vm8243_vm12  ;;  %1724 = vrot.lane.b32.xlu2 %v1679_v48, %s3605_s26  ;;  %1242 = vst.msk [vmem:[#allocation2 + $0x108] sm:$0xff] %vm8249_vm3, %v1205_v23  ;;  %v3307_v20 = vsel %vm1060_vm15, 1.0, %v7741_v54  ;;  %v8250_v51 = vrot.slane %v4919_v6, 1  ;;  %vm8251_vm12 = vcmp.lt.s32.totalorder %v3830_v22, 7  ;;  %vm8252_vm14 = vcmp.lt.s32.totalorder %v4311_v11, 7 }
 0x1d3   :  { %vm1773_vm9 = vmand %vm8248_vm11, %vm8246_vm13  ;;  %v2191_v9 = vmul.f32 %v3392_v60, %v5357_v33  ;;  %vm8253_vm13 = vcmask 785920   ;;  %v8256_v48 = vrot.slane %v5064_v3, 6  ;;  %vm8259_vm15 = vcmp.lt.s32.totalorder %v4979_v56, 7 }
 0x1d4   :  { %v6180_v34 = vsel %vm8251_vm12, %v8250_v51, %v1124_v55  ;;  %vm1789_vm4 = vmand %vm1773_vm9, %vm8252_vm14  ;;  %1500 = vst.msk [vmem:[#allocation2 + $0x108] sm:$0xff] %vm8253_vm13, %v1463_v41  ;;  %vm8257_vm14 = vcmp.lt.s32.totalorder %v3830_v22, 2  ;;  %vm8258_vm9 = vcmask 1048320   ;;  %v8263_v51 = vld [vmem:[#allocation60_spill] sm:$0xff]  ;;  %v8361_v52 = vrot.slane %v5025_v26, 2 }
 0x1d5   :  { %vm6190_vm3 = vmand %vm6143_vm6, %vm7601_vm0  ;;  %v3358_v40 = vsel %vm1789_vm4, 1.0, %v7741_v54  ;;  %v2214_v23 = vsel %vm8257_vm14, %v8256_v48, %v7605_v12  ;;  %1758 = vst.msk [vmem:[#allocation2 + $0x108] sm:$0xff] %vm8258_vm9, %v5913_v29  ;;  %v1157_v41 = vmul.f32 %v3307_v20, %v6180_v34  ;;  %vm8262_vm4 = vcmp.ge.s32.totalorder %v4883_v0, 0 }
 0x1d6   :  { %vm6207_vm6 = vmand %vm6162_vm8, %vm8259_vm15  ;;  %v1853_v60 = vmul.f32 %v3358_v40, %v4368_v38  ;;  %vm8264_vm12 = vnez %v8263_v51  ;;  %v1640_v48 = vrot.slane %v5025_v26, 7  ;;  %v7608_v29 = vrot.slane %v5025_v26, 2  ;;  %v6229_v40 = vpop.permute.xlu2 %2264 }
 0x1d7   :  { %vm2330_vm13 = vmand %vm8264_vm12, %vm8262_vm4  ;;  %vm8265_vm14 = vcmask 261120   ;;  %vm8266_vm8 = vcmp.ge.s32.totalorder %v5708_v43, 0  ;;  %v2240_v20 = vmul.f32 %v2214_v23, %v2191_v9  ;;  %2011 = vrot.lane.b32.xlu0 %v1967_v15, %s3607_s28  ;;  %vm8269_vm15 = vcmp.lt.s32.totalorder %v4883_v0, 7  ;;  %v8274_v15 = vld [vmem:[#allocation62_spill] sm:$0xff] }
 0x1d8   :  { %1869 = vst.msk [vmem:[#allocation2 + $0xf8] sm:$0xff] %vm8265_vm14, %v1853_v60  ;;  %vm6224_vm9 = vmand %vm8264_vm12, %vm8266_vm8  ;;  %1196 = vrot.lane.b32.xlu1 %v1157_v41, %s3607_s28  ;;  %vm8270_vm14 = vcmp.ge.s32.totalorder %v4902_v4, 0  ;;  %v2457_v9 = vpop.permute.xlu1 %2456  ;;  %vm8273_vm12 = vcmp.ge.s32.totalorder %v4291_v61, 0  ;;  %vm8275_vm8 = vnez %v8274_v15  ;;  %v8276_v23 = vrot.slane %v4919_v6, 7  ;;  %v2008_v15 = vpop.permute.xlu0 %2007 }
 0x1d9   :  { %vm2346_vm4 = vmand %vm2330_vm13, %vm8269_vm15  ;;  %vm8277_vm13 = vcmp.lt.s32.totalorder %v3830_v22, 1  ;;  %v3323_v51 = vsel %vm6207_vm6, 1.0, %v7741_v54  ;;  %vm8279_vm15 = vcmp.lt.s32.totalorder %v3830_v22, 6  ;;  %v7609_v60 = vrot.slane %v5141_v28, 1 }
 0x1da   :  { %vm6238_vm0 = vmand %vm5768_vm2, %vm8270_vm14  ;;  %2284 = vrot.lane.b32.xlu2 %v2240_v20, %s3606_s27  ;;  %v1658_v41 = vsel %vm8277_vm13, %v8276_v23, %v1640_v48  ;;  %v8278_v20 = vrot.slane %v4919_v6, 2  ;;  %v3402_v37 = vsel %vm2346_vm4, 1.0, %v7741_v54  ;;  %vm8280_vm14 = vcmp.lt.s32.totalorder %v4291_v61, 7 }
 0x1db   :  { %vm880_vm1 = vmand %vm8275_vm8, %vm8273_vm12  ;;  %vm8281_vm8 = vcmask 523520   ;;  %vm8282_vm13 = vcmp.lt.s32.totalorder %v5708_v43, 7  ;;  %vm8285_vm4 = vcmask 785920   ;;  %v2410_v12 = vmul.f32 %v3402_v37, %v1658_v41 }
 0x1dc   :  { %v1400_v45 = vsel %vm8279_vm15, %v8278_v20, %v7608_v29  ;;  %vm912_vm12 = vmand %vm880_vm1, %vm8280_vm14  ;;  %2045 = vst.msk [vmem:[#allocation2 + $0xf8] sm:$0xff] %vm8281_vm8, %v2008_v15  ;;  %v3339_v20 = vsel %vm6190_vm3, 1.0, %v7741_v54  ;;  %vm8286_vm1 = vcmp.lt.s32.totalorder %v4902_v4, 7  ;;  %vm8290_vm14 = vcmp.ge.s32.totalorder %v4979_v56, 0  ;;  %v8294_v4 = vld [vmem:[#allocation64_spill] sm:$0xff] }
 0x1dd   :  { %vm6270_vm6 = vmand %vm6224_vm9, %vm8282_vm13  ;;  %v3287_v23 = vsel %vm912_vm12, 1.0, %v7741_v54  ;;  %2318 = vst.msk [vmem:[#allocation2 + $0xf8] sm:$0xff] %vm8285_vm4, %v6029_v42  ;;  %v1415_v15 = vmul.f32 %v3323_v51, %v1400_v45  ;;  %vm8289_vm9 = vcmask 1048320   ;;  %v8291_v42 = vld [vmem:[#allocation65_spill] sm:$0xff]  ;;  %vm8292_vm12 = vcmask 261120  }
 0x1de   :  { %vm6284_vm15 = vmand %vm6238_vm0, %vm8286_vm1  ;;  %v976_v19 = vmul.f32 %v3287_v23, %v4436_v47  ;;  %2494 = vst.msk [vmem:[#allocation2 + $0xf8] sm:$0xff] %vm8289_vm9, %v2457_v9  ;;  %v789_v13 = vadd.s32 4294967295, %v8291_v42  ;;  %vm8293_vm0 = vcmp.ge.s32.totalorder %v4948_v57, 0  ;;  %vm8295_vm8 = vnez %v8294_v4  ;;  %v8305_v23 = vld [vmem:[#allocation47_spill] sm:$0xff] }
 0x1df   :  { %vm1882_vm3 = vmand %vm6108_vm7, %vm8290_vm14  ;;  %v1673_v45 = vmul.f32 %v3339_v20, %v1658_v41  ;;  %1454 = vrot.lane.b32.xlu0 %v1415_v15, %s3606_s27  ;;  %vm8296_vm4 = vcmp.lt.s32.totalorder %v4979_v56, 7  ;;  %v2202_v37 = vrot.slane %v5025_v26, 6  ;;  %vm8297_vm9 = vcmp.ge.s32.totalorder %v6067_v17, 0  ;;  %v6315_v41 = vpop.permute.xlu2 %2458  ;;  %v8345_v56 = vld [vmem:[#allocation53_spill] sm:$0xff] }
 0x1e0   :  { %992 = vst.msk [vmem:[#allocation2 + $0x48] sm:$0xff] %vm8292_vm12, %v976_v19  ;;  %vm2331_vm13 = vmand %vm8295_vm8, %vm8293_vm0  ;;  %2448 = vrot.lane.b32.xlu1 %v2410_v12, %s3605_s26  ;;  %v1189_v51 = vpop.permute.xlu1 %1188  ;;  %vm8300_vm12 = vcmp.lt.s32.totalorder %v4948_v57, 7  ;;  %v8303_v12 = vld [vmem:[#allocation38_spill] sm:$0xff]  ;;  %v3370_v20 = vsel %vm6284_vm15, 1.0, %v7741_v54  ;;  %vm8307_vm2 = vcmask 523520   ;;  %v1447_v19 = vpop.permute.xlu0 %1446  ;;  %vm8310_vm15 = vcmask 785920  }
 0x1e1   :  { %vm1898_vm1 = vmand %vm1882_vm3, %vm8296_vm4  ;;  %vm8304_vm3 = vcmp.ge.s32.totalorder %v8303_v12, 0  ;;  %vm8306_vm4 = vnez %v8305_v23  ;;  %1234 = vst.msk [vmem:[#allocation2 + $0x48] sm:$0xff] %vm8307_vm2, %v1189_v51  ;;  %vm8311_vm2 = vcmp.lt.s32.totalorder %v6067_v17, 7  ;;  %v3386_v51 = vsel %vm6270_vm6, 1.0, %v7741_v54 }
 0x1e2   :  { %vm6310_vm14 = vmand %vm8295_vm8, %vm8297_vm9  ;;  %1712 = vrot.lane.b32.xlu2 %v1673_v45, %s3605_s26  ;;  %vm805_vm8 = vcmp.ge.s32.totalorder %v789_v13, 0  ;;  %vm821_vm9 = vcmp.lt.s32.totalorder %v789_v13, 7  ;;  %v3371_v4 = vsel %vm1898_vm1, 1.0, %v7741_v54  ;;  %v6343_v45 = vadd.s32 4294967295, %v5099_v18  ;;  %1492 = vst.msk [vmem:[#allocation2 + $0x48] sm:$0xff] %vm8310_vm15, %v1447_v19 }
 0x1e3   :  { %vm6319_vm0 = vmand %vm2331_vm13, %vm8300_vm12  ;;  %vm8308_vm13 = vcmp.lt.s32.totalorder %v3830_v22, 7  ;;  %vm8309_vm12 = vcmp.lt.s32.totalorder %v8303_v12, 7  ;;  %vm1513_vm1 = vcmp.ge.s32.totalorder %v8291_v42, 0  ;;  %v8314_v12 = vrot.slane %v4919_v6, 6  ;;  %v8369_v6 = vld [vmem:[#allocation59_spill] sm:$0xff] }
 0x1e4   :  { %vm1765_vm7 = vmand %vm8306_vm4, %vm8304_vm3  ;;  %v6337_v15 = vsel %vm8308_vm13, %v1124_v55, %v7609_v60  ;;  %vm1529_vm13 = vcmp.lt.s32.totalorder %v8291_v42, 7  ;;  %v8317_v19 = vmov 0  ;;  %v1961_v42 = vmul.f32 %v3370_v20, %v6180_v34  ;;  %v8320_v60 = vld [vmem:[#allocation67_spill] sm:$0xff] }
 0x1e5   :  { %vm1781_vm3 = vmand %vm1765_vm7, %vm8309_vm12  ;;  %vm8315_vm7 = vcmp.lt.s32.totalorder %v3830_v22, 2  ;;  %v1962_v25 = vmul.f32 %v3371_v4, %v6337_v15  ;;  %v7612_v29 = vrot.slane %v5141_v28, 6  ;;  %vm8321_vm6 = vcmp.ge.s32.totalorder %v8320_v60, 0 }
 0x1e6   :  { %vm6350_vm4 = vmand %vm6310_vm14, %vm8311_vm2  ;;  %v3350_v55 = vsel %vm1781_vm3, 1.0, %v7741_v54  ;;  %v2220_v23 = vsel %vm8315_vm7, %v8314_v12, %v2202_v37  ;;  %vm8316_vm14 = vcmask 1048320   ;;  %v8325_v34 = vmov 0  ;;  %v8331_v12 = vld [vmem:[#allocation32_spill] sm:$0xff] }
 0x1e7   :  { %1750 = vst.msk [vmem:[#allocation2 + $0x48] sm:$0xff] %vm8316_vm14, %v6129_v2  ;;  %v1845_v9 = vmul.f32 %v3350_v55, %v4436_v47  ;;  %vm6369_vm12 = vmand %vm805_vm8, %vm821_vm9  ;;  %v7613_v47 = vrot.slane %v5141_v28, 7  ;;  %vm8324_vm8 = vcmask 261120   ;;  %vm7611_vm9 = vcmp.ge.s32.totalorder %v6343_v45, 0  ;;  %1999 = vrot.lane.b32.xlu0 %v1961_v42, %s3607_s28  ;;  %v8333_v42 = vld [vmem:[#allocation34_spill] sm:$0xff]  ;;  %v6433_v2 = vpop.permute.xlu2 %1464 }
 0x1e8   :  { %v8318_v19 = vsel %vm6369_vm12, 4294967295, %v8317_v19  ;;  %vm6380_vm3 = vmand %vm6369_vm12, %vm8321_vm6  ;;  %v2234_v13 = vmul.f32 %v3386_v51, %v2220_v23  ;;  %2001 = vrot.lane.b32.xlu1 %v1962_v25, %s3607_s28  ;;  %vm7610_vm2 = vcmp.lt.s32.totalorder %v6343_v45, 7  ;;  %vm7614_vm14 = vcmp.ge.s32.totalorder %v5099_v18, 0  ;;  %v2441_v55 = vpop.permute.xlu1 %2440  ;;  %v8367_v51 = vld [vmem:[#allocation40_spill] sm:$0xff] }
 0x1e9   :  { %8319 = vst [vmem:[#allocation25_spill] sm:$0xff] %v8318_v19  ;;  %vm6387_vm15 = vmand %vm1513_vm1, %vm1529_vm13  ;;  %v3387_v20 = vsel %vm6350_vm4, 1.0, %v7741_v54  ;;  %vm8327_vm13 = vcmp.lt.s32.totalorder %v3830_v22, 2  ;;  %vm8328_vm6 = vcmp.lt.s32.totalorder %v8320_v60, 7  ;;  %v790_v23 = vadd.s32 4294967295, %v8331_v12 }
 0x1ea   :  { %1861 = vst.msk [vmem:[#allocation2 + $0x38] sm:$0xff] %vm8324_vm8, %v1845_v9  ;;  %v8326_v34 = vsel %vm6387_vm15, 4294967295, %v8325_v34  ;;  %vm1561_vm7 = vmand %vm6387_vm15, %vm7611_vm9  ;;  %2272 = vrot.lane.b32.xlu2 %v2234_v13, %s3606_s27  ;;  %v2219_v4 = vsel %vm8327_vm13, %v2202_v37, %v7612_v29  ;;  %vm8332_vm4 = vcmp.lt.s32.totalorder %v3830_v22, 1  ;;  %v1992_v9 = vpop.permute.xlu0 %1991  ;;  %v6431_v25 = vadd.s32 4294967295, %v8333_v42  ;;  %v8335_v13 = vld [vmem:[#allocation43_spill] sm:$0xff] }
 0x1eb   :  { %vm1577_vm1 = vmand %vm1561_vm7, %vm7610_vm2  ;;  %v1657_v61 = vsel %vm8332_vm4, %v1640_v48, %v7613_v47  ;;  %vm8334_vm13 = vcmask 523520   ;;  %v8337_v48 = vld [vmem:[#allocation49_spill] sm:$0xff]  ;;  %vm1530_vm9 = vcmp.lt.s32.totalorder %v8331_v12, 7  ;;  %v3403_v29 = vsel %vm6319_vm0, 1.0, %v7741_v54 }
 0x1ec   :  { %vm6413_vm8 = vmand %vm6380_vm3, %vm8328_vm6  ;;  %v3340_v37 = vsel %vm1577_vm1, 1.0, %v7741_v54  ;;  %2037 = vst.msk [vmem:[#allocation2 + $0x38] sm:$0xff] %vm8334_vm13, %v1992_v9  ;;  %vm8336_vm6 = vcmp.ge.s32.totalorder %v8335_v13, 0  ;;  %vm8338_vm4 = vnez %v8337_v48  ;;  %vm1514_vm1 = vcmp.ge.s32.totalorder %v8331_v12, 0  ;;  %v8359_v48 = vld [vmem:[#allocation36_spill] sm:$0xff] }
 0x1ed   :  { %vm1029_vm3 = vmand %vm6369_vm12, %vm7614_vm14  ;;  %v2235_v47 = vmul.f32 %v3387_v20, %v2219_v4  ;;  %vm8339_vm14 = vcmask 785920   ;;  %vm8340_vm7 = vcmp.lt.s32.totalorder %v8335_v13, 7  ;;  %vm8341_vm12 = vcmask 1048320  }
 0x1ee   :  { %vm1774_vm2 = vmand %vm8338_vm4, %vm8336_vm6  ;;  %2310 = vst.msk [vmem:[#allocation2 + $0x38] sm:$0xff] %vm8339_vm14, %v6229_v40  ;;  %v1674_v9 = vmul.f32 %v3340_v37, %v1657_v61  ;;  %vm8342_vm6 = vcmp.lt.s32.totalorder %v5099_v18, 7  ;;  %vm806_vm10 = vcmp.ge.s32.totalorder %v790_v23, 0  ;;  %vm822_vm0 = vcmp.lt.s32.totalorder %v790_v23, 7 }
 0x1ef   :  { %vm1790_vm13 = vmand %vm1774_vm2, %vm8340_vm7  ;;  %2486 = vst.msk [vmem:[#allocation2 + $0x38] sm:$0xff] %vm8341_vm12, %v2441_v55  ;;  %vm7624_vm14 = vcmp.ge.s32.totalorder %v6431_v25, 0  ;;  %v8346_v40 = vmov 0  ;;  %v2411_v4 = vmul.f32 %v3403_v29, %v1657_v61  ;;  %2274 = vrot.lane.b32.xlu0 %v2235_v47, %s3606_s27  ;;  %v1383_v23 = vrot.slane %v5141_v28, 2  ;;  %v8354_v29 = vld [vmem:[#allocation68_spill] sm:$0xff]  ;;  %v8379_v55 = vld [vmem:[#allocation66_spill] sm:$0xff] }
 0x1f0   :  { %vm6452_vm4 = vmand %vm1029_vm3, %vm8342_vm6  ;;  %v3359_v12 = vsel %vm1790_vm13, 1.0, %v7741_v54  ;;  %1714 = vrot.lane.b32.xlu1 %v1674_v9, %s3605_s26  ;;  %vm8350_vm2 = vcmask 261120   ;;  %v8351_v37 = vmov 0  ;;  %vm7626_vm3 = vcmp.ge.s32.totalorder %v8333_v42, 0  ;;  %v2010_v61 = vpop.permute.xlu1 %2009 }
 0x1f1   :  { %v1854_v20 = vmul.f32 %v3359_v12, %v8345_v56  ;;  %vm6459_vm11 = vmand %vm1514_vm1, %vm1530_vm9  ;;  %v1126_v47 = vrot.slane %v8354_v29, 1  ;;  %vm7625_vm1 = vcmp.lt.s32.totalorder %v8333_v42, 7  ;;  %v3308_v13 = vsel %vm6452_vm4, 1.0, %v7741_v54 }
 0x1f2   :  { %v8347_v40 = vsel %vm6459_vm11, 4294967295, %v8346_v40  ;;  %vm6469_vm12 = vmand %vm6459_vm11, %vm7624_vm14  ;;  %2450 = vrot.lane.b32.xlu2 %v2411_v4, %s3605_s26  ;;  %v2283_v9 = vpop.permute.xlu0 %2282  ;;  %v8356_v12 = vrot.slane %v5141_v28, 1  ;;  %vm8357_vm6 = vcmp.lt.s32.totalorder %v3830_v22, 7  ;;  %v6499_v4 = vpop.permute.xlu2 %2442  ;;  %vm8360_vm4 = vcmp.ge.s32.totalorder %v8359_v48, 0 }
 0x1f3   :  { %1870 = vst.msk [vmem:[#allocation2 + $0x110] sm:$0xff] %vm8350_vm2, %v1854_v20  ;;  %vm6475_vm9 = vmand %vm806_vm10, %vm822_vm0  ;;  %vm8355_vm10 = vcmask 523520   ;;  %vm8358_vm0 = vcmask 785920  }
 0x1f4   :  { %v8352_v37 = vsel %vm6475_vm9, 4294967295, %v8351_v37  ;;  %vm1030_vm7 = vmand %vm6475_vm9, %vm7626_vm3  ;;  %2046 = vst.msk [vmem:[#allocation2 + $0x110] sm:$0xff] %vm8355_vm10, %v2010_v61  ;;  %v6497_v20 = vsel %vm8357_vm6, %v8356_v12, %v1126_v47  ;;  %v3324_v61 = vsel %vm6413_vm8, 1.0, %v7741_v54  ;;  %vm8363_vm10 = vcmask 1048320  }
 0x1f5   :  { %8353 = vst [vmem:[#allocation42_spill] sm:$0xff] %v8352_v37  ;;  %vm1062_vm13 = vmand %vm1030_vm7, %vm7625_vm1  ;;  %vm8362_vm7 = vcmp.lt.s32.totalorder %v3830_v22, 6  ;;  %vm8364_vm6 = vcmp.lt.s32.totalorder %v8359_v48, 7  ;;  %v1158_v37 = vmul.f32 %v3308_v13, %v6337_v15  ;;  %vm8368_vm8 = vcmp.ge.s32.totalorder %v8367_v51, 0  ;;  %v8373_v15 = vld [vmem:[#allocation71_spill] sm:$0xff] }
 0x1f6   :  { %2319 = vst.msk [vmem:[#allocation2 + $0x110] sm:$0xff] %vm8358_vm0, %v2283_v9  ;;  %v3309_v19 = vsel %vm1062_vm13, 1.0, %v7741_v54  ;;  %vm1288_vm2 = vmand %vm6475_vm9, %vm8360_vm4  ;;  %v1399_v12 = vsel %vm8362_vm7, %v8361_v52, %v1383_v23  ;;  %vm8370_vm0 = vnez %v8369_v6  ;;  %vm8371_vm7 = vcmp.lt.s32.totalorder %v8367_v51, 7 }
 0x1f7   :  { %2495 = vst.msk [vmem:[#allocation2 + $0x110] sm:$0xff] %vm8363_vm10, %v6315_v41  ;;  %vm6518_vm13 = vmand %vm1288_vm2, %vm8364_vm6  ;;  %v1159_v57 = vmul.f32 %v3309_v19, %v6497_v20  ;;  %v1416_v52 = vmul.f32 %v3324_v61, %v1399_v12  ;;  %1198 = vrot.lane.b32.xlu0 %v1158_v37, %s3607_s28  ;;  %vm8372_vm2 = vcmp.ge.s32.totalorder %v5888_v35, 0  ;;  %vm8374_vm10 = vnez %v8373_v15 }
 0x1f8   :  { %vm1766_vm4 = vmand %vm8370_vm0, %vm8368_vm8  ;;  %vm7627_vm1 = vcmp.lt.s32.totalorder %v6431_v25, 7  ;;  %v1384_v6 = vrot.slane %v8354_v29, 2  ;;  %vm8375_vm8 = vcmp.lt.s32.totalorder %v5888_v35, 7  ;;  %v1642_v13 = vrot.slane %v8354_v29, 7 }
 0x1f9   :  { %vm1782_vm14 = vmand %vm1766_vm4, %vm8371_vm7  ;;  %1200 = vrot.lane.b32.xlu1 %v1159_v57, %s3607_s28  ;;  %v1994_v57 = vpop.permute.xlu1 %1993  ;;  %v3325_v61 = vsel %vm6518_vm13, 1.0, %v7741_v54  ;;  %vm8376_vm4 = vcmp.lt.s32.totalorder %v3830_v22, 6  ;;  %vm8377_vm7 = vcmask 261120   ;;  %vm8383_vm13 = vcmask 523520  }
 0x1fa   :  { %v3351_v41 = vsel %vm1782_vm14, 1.0, %v7741_v54  ;;  %vm889_vm6 = vmand %vm8374_vm10, %vm8372_vm2  ;;  %1456 = vrot.lane.b32.xlu2 %v1416_v52, %s3606_s27  ;;  %v1398_v35 = vsel %vm8376_vm4, %v1383_v23, %v1384_v6  ;;  %vm8380_vm2 = vnez %v8379_v55  ;;  %v6566_v52 = vpop.permute.xlu2 %1448  ;;  %v8384_v9 = vrot.slane %v4368_v38, 1 }
 0x1fb   :  { %v1846_v19 = vmul.f32 %v3351_v41, %v4577_v32  ;;  %vm921_vm0 = vmand %vm889_vm6, %vm8375_vm8  ;;  %vm8385_vm6 = vcmp.lt.s32.totalorder %v3830_v22, 7  ;;  %vm8386_vm8 = vcmp.ge.s32.totalorder %v8359_v48, 0  ;;  %v8387_v15 = vrot.slane %v5141_v28, 7 }
 0x1fc   :  { %vm1578_vm14 = vmand %vm6469_vm12, %vm7627_vm1  ;;  %v3296_v37 = vsel %vm921_vm0, 1.0, %v7741_v54  ;;  %vm8378_vm12 = vcmp.ge.s32.totalorder %v6343_v45, 0  ;;  %v6573_v23 = vsel %vm8385_vm6, %v1126_v47, %v8384_v9  ;;  %vm8388_vm4 = vcmp.lt.s32.totalorder %v3830_v22, 1 }
 0x1fd   :  { %1862 = vst.msk [vmem:[#allocation2 + $0x50] sm:$0xff] %vm8377_vm7, %v1846_v19  ;;  %v969_v12 = vmul.f32 %v3296_v37, %v5357_v33  ;;  %vm6562_vm10 = vmand %vm8380_vm2, %vm8378_vm12  ;;  %v3341_v41 = vsel %vm1578_vm14, 1.0, %v7741_v54  ;;  %v1656_v19 = vsel %vm8388_vm4, %v8387_v15, %v1642_v13  ;;  %vm8389_vm7 = vcmp.lt.s32.totalorder %v8359_v48, 7 }
 0x1fe   :  { %2038 = vst.msk [vmem:[#allocation2 + $0x50] sm:$0xff] %vm8383_vm13, %v1994_v57  ;;  %vm1884_vm0 = vmand %vm6459_vm11, %vm8386_vm8  ;;  %v1417_v47 = vmul.f32 %v3325_v61, %v1398_v35  ;;  %vm8390_vm13 = vcmp.ge.s32.totalorder %v8320_v60, 0  ;;  %vm8391_vm6 = vcmask 261120   ;;  %vm8392_vm8 = vcmp.lt.s32.totalorder %v8320_v60, 7  ;;  %v1207_v60 = vpop.permute.xlu0 %1206 }
 0x1ff   :  { %v985_v57 = vmul.f32 %v969_v12, %v8345_v56  ;;  %vm1900_vm12 = vmand %vm1884_vm0, %vm8389_vm7  ;;  %v1675_v15 = vmul.f32 %v3341_v41, %v1656_v19  ;;  %v8393_v56 = vld [vmem:[#allocation37_spill] sm:$0xff]  ;;  %v2204_v12 = vrot.slane %v8354_v29, 6  ;;  %vm8530_vm11 = vcmask 523520  }
 0x200   :  { %v3373_v37 = vsel %vm1900_vm12, 1.0, %v7741_v54  ;;  %vm1883_vm14 = vmand %vm6387_vm15, %vm8390_vm13  ;;  %1458 = vrot.lane.b32.xlu0 %v1417_v47, %s3606_s27  ;;  %vm8394_vm0 = vnez %v8393_v56  ;;  %vm8395_vm12 = vcmp.lt.s32.totalorder %v6343_v45, 7  ;;  %v8404_v41 = vld [vmem:[#allocation41_spill] sm:$0xff] }
 0x201   :  { %1001 = vst.msk [vmem:[#allocation2 + $0x120] sm:$0xff] %vm8391_vm6, %v985_v57  ;;  %v1964_v9 = vmul.f32 %v3373_v37, %v6573_v23  ;;  %vm1899_vm4 = vmand %vm1883_vm14, %vm8392_vm8  ;;  %v6613_v61 = vpop.permute.xlu1 %1706  ;;  %vm8398_vm14 = vcmp.lt.s32.totalorder %v8333_v42, 7  ;;  %vm8401_vm8 = vcmp.ge.s32.totalorder %v5099_v18, 0  ;;  %v791_v57 = vadd.s32 4294967295, %v8404_v41  ;;  %v3543_v56 = vld [vmem:[%s7352_s5 + $0x38] sm:$0xff] }
 0x202   :  { %vm2333_vm7 = vmand %vm8394_vm0, %vm7626_vm3  ;;  %1716 = vrot.lane.b32.xlu2 %v1675_v15, %s3605_s26  ;;  %v3372_v51 = vsel %vm1899_vm4, 1.0, %v7741_v54  ;;  %vm8403_vm3 = vcmp.lt.s32.totalorder %v5099_v18, 7  ;;  %v6631_v47 = vpop.permute.xlu2 %1708  ;;  %vm8409_vm4 = vcmp.lt.s32.totalorder %v6431_v25, 7  ;;  %2856 = vmatpush.bf16.msrb.mxu2 %v3543_v56 }
 0x203   :  { %vm6607_vm13 = vmand %vm6562_vm10, %vm8395_vm12  ;;  %2005 = vrot.lane.b32.xlu1 %v1964_v9, %s3607_s28  ;;  %vm8402_vm12 = vcmask 523520   ;;  %v8407_v9 = vrot.slane %v5141_v28, 6 }
 0x204   :  { %vm6617_vm6 = vmand %vm2333_vm7, %vm8398_vm14  ;;  %1243 = vst.msk [vmem:[#allocation2 + $0x120] sm:$0xff] %vm8402_vm12, %v1207_v60  ;;  %vm8405_vm7 = vcmask 785920   ;;  %v3388_v55 = vsel %vm6607_vm13, 1.0, %v7741_v54  ;;  %v1963_v60 = vmul.f32 %v3372_v51, %v6497_v20  ;;  %vm8413_vm13 = vcmp.lt.s32.totalorder %v5874_v59, 7  ;;  %v8415_v20 = vld [vmem:[#allocation70_spill] sm:$0xff] }
 0x205   :  { %vm2332_vm10 = vmand %vm8380_vm2, %vm8401_vm8  ;;  %1501 = vst.msk [vmem:[#allocation2 + $0x120] sm:$0xff] %vm8405_vm7, %v6433_v2  ;;  %vm8406_vm2 = vcmp.ge.s32.totalorder %v6431_v25, 0  ;;  %vm807_vm12 = vcmp.ge.s32.totalorder %v791_v57, 0  ;;  %vm823_vm7 = vcmp.lt.s32.totalorder %v791_v57, 7 }
 0x206   :  { %vm2348_vm1 = vmand %vm2332_vm10, %vm8403_vm3  ;;  %vm8408_vm3 = vcmp.lt.s32.totalorder %v3830_v22, 2 }
 0x207   :  { %v3404_v37 = vsel %vm2348_vm1, 1.0, %v7741_v54  ;;  %vm2124_vm14 = vmand %vm8394_vm0, %vm8406_vm2  ;;  %v2218_v15 = vsel %vm8408_vm3, %v8407_v9, %v2204_v12  ;;  %vm8412_vm1 = vcmp.ge.s32.totalorder %v5874_v59, 0  ;;  %vm8414_vm2 = vcmp.ge.s32.totalorder %v5245_v39, 0 }
 0x208   :  { %vm6649_vm8 = vmand %vm2124_vm14, %vm8409_vm4  ;;  %v2412_v48 = vmul.f32 %v3404_v37, %v1656_v19  ;;  %v2236_v41 = vmul.f32 %v3388_v55, %v2218_v15  ;;  %2003 = vrot.lane.b32.xlu0 %v1963_v60, %s3607_s28  ;;  %vm8416_vm14 = vnez %v8415_v20  ;;  %v2267_v19 = vpop.permute.xlu0 %2266  ;;  %v8418_v37 = vmov 0  ;;  %v8432_v20 = vld [vmem:[#allocation48_spill] sm:$0xff] }
 0x209   :  { %vm890_vm0 = vmand %vm5438_vm5, %vm8412_vm1  ;;  %vm8417_vm5 = vcmp.lt.s32.totalorder %v5245_v39, 7  ;;  %v1209_v51 = vpop.permute.xlu1 %1208  ;;  %v3389_v55 = vsel %vm6649_vm8, 1.0, %v7741_v54  ;;  %v8421_v15 = vrot.slane %v4368_v38, 6 }
 0x20a   :  { %vm922_vm10 = vmand %vm890_vm0, %vm8413_vm13  ;;  %2276 = vrot.lane.b32.xlu2 %v2236_v41, %s3606_s27  ;;  %vm8420_vm0 = vcmask 785920   ;;  %vm8422_vm13 = vcmp.lt.s32.totalorder %v3830_v22, 2  ;;  %v6692_v41 = vpop.permute.xlu2 %2268 }
 0x20b   :  { %v3297_v9 = vsel %vm922_vm10, 1.0, %v7741_v54  ;;  %vm881_vm3 = vmand %vm8416_vm14, %vm8414_vm2  ;;  %2452 = vrot.lane.b32.xlu1 %v2412_v48, %s3605_s26  ;;  %2311 = vst.msk [vmem:[#allocation2 + $0x50] sm:$0xff] %vm8420_vm0, %v2267_v19  ;;  %v2217_v39 = vsel %vm8422_vm13, %v2204_v12, %v8421_v15  ;;  %v8423_v48 = vld [vmem:[#allocation51_spill] sm:$0xff]  ;;  %v8429_v12 = vrot.slane %v4368_v38, 7  ;;  %vm8430_vm14 = vcmp.lt.s32.totalorder %v3830_v22, 1  ;;  %v2619_v15 = vld [vmem:[#allocation2 + $0x38] sm:$0xff] }
 0x20c   :  { %v970_v50 = vmul.f32 0.0, %v3297_v9  ;;  %vm913_vm4 = vmand %vm881_vm3, %vm8417_vm5  ;;  %vm8424_vm10 = vcmp.ge.s32.totalorder %v8423_v48, 0  ;;  %vm8426_vm8 = vcmp.lt.s32.totalorder %v8423_v48, 7  ;;  %vm8431_vm3 = vcmask 261120  }
 0x20d   :  { %v3288_v57 = vsel %vm913_vm4, 1.0, %v7741_v54  ;;  %vm6674_vm1 = vmand %vm807_vm12, %vm823_vm7  ;;  %vm8425_vm7 = vcmask 1048320   ;;  %v1655_v9 = vsel %vm8430_vm14, %v1642_v13, %v8429_v12  ;;  %vm8433_vm5 = vcmp.ge.s32.totalorder %v8432_v20, 0 }
 0x20e   :  { %v8419_v37 = vsel %vm6674_vm1, 4294967295, %v8418_v37  ;;  %v986_v56 = vmul.f32 %v970_v50, %v5064_v3  ;;  %v977_v60 = vmul.f32 %v3288_v57, %v4577_v32  ;;  %vm1289_vm12 = vmand %vm6674_vm1, %vm8424_vm10  ;;  %2487 = vst.msk [vmem:[#allocation2 + $0x50] sm:$0xff] %vm8425_vm7, %v6499_v4  ;;  %v3542_v32 = vld [vmem:[%s7352_s5 + $0x30] sm:$0xff]  ;;  %v3405_v4 = vsel %vm6617_vm6, 1.0, %v7741_v54 }
 0x20f   :  { %vm6698_vm2 = vmand %vm1289_vm12, %vm8426_vm8  ;;  %vm8434_vm4 = vnez %v8247_v36  ;;  %v2237_v50 = vmul.f32 %v3389_v55, %v2217_v39  ;;  %vm8435_vm13 = vcmask 523520   ;;  %vm8436_vm10 = vcmp.lt.s32.totalorder %v8432_v20, 7  ;;  %2857 = vmatpush.bf16.msrb.mxu2 %v3542_v32  ;;  %v3541_v36 = vld [vmem:[%s7352_s5 + $0x28] sm:$0xff] }
 0x210   :  { %1002 = vst.msk [vmem:[#allocation2 + $0x138] sm:$0xff] %vm8431_vm3, %v986_v56  ;;  %vm1563_vm0 = vmand %vm8434_vm4, %vm8433_vm5  ;;  %vm8438_vm6 = vcmp.ge.s32.totalorder %v4311_v11, 0  ;;  %v2413_v35 = vmul.f32 %v3405_v4, %v1655_v9  ;;  %vm8439_vm14 = vcmp.lt.s32.totalorder %v4311_v11, 7  ;;  %vm8440_vm5 = vcmp.ge.s32.totalorder %v5524_v30, 0  ;;  %v1191_v57 = vpop.permute.xlu0 %1190 }
 0x211   :  { %1244 = vst.msk [vmem:[#allocation2 + $0x138] sm:$0xff] %vm8435_vm13, %v1209_v51  ;;  %vm1579_vm12 = vmand %vm1563_vm0, %vm8436_vm10  ;;  %2278 = vrot.lane.b32.xlu0 %v2237_v50, %s3606_s27  ;;  %v8441_v51 = vld [vmem:[#allocation74_spill] sm:$0xff]  ;;  %vm8443_vm13 = vcmp.lt.s32.totalorder %v5524_v30, 7  ;;  %v1193_v55 = vpop.permute.xlu1 %1192  ;;  %v3326_v50 = vsel %vm6698_vm2, 1.0, %v7741_v54  ;;  %vm8458_vm2 = vcmask 261120  }
 0x212   :  { %vm8437_vm7 = vmmov %vm8431_vm3  ;;  %v3342_v13 = vsel %vm1579_vm12, 1.0, %v7741_v54  ;;  %vm8442_vm4 = vnez %v8441_v51  ;;  %2454 = vrot.lane.b32.xlu2 %v2413_v35, %s3605_s26  ;;  %vm8444_vm12 = vcmask 523520   ;;  %v6749_v48 = vpop.permute.xlu2 %2446  ;;  %v1647_v51 = vrot.slane %v5495_v21, 7 }
 0x213   :  { %993 = vst.msk [vmem:[#allocation2 + $0x60] sm:$0xff] %vm8437_vm7, %v977_v60  ;;  %vm1031_vm8 = vmand %vm6674_vm1, %vm8438_vm6  ;;  %v1676_v19 = vmul.f32 %v3342_v13, %v1655_v9  ;;  %vm8445_vm7 = vcmp.ge.s32.totalorder %v5429_v62, 0  ;;  %v8446_v60 = vld [vmem:[#allocation72_spill] sm:$0xff]  ;;  %2858 = vmatpush.bf16.msrb.mxu2 %v3541_v36  ;;  %v8452_v9 = vld [vmem:[#allocation54_spill] sm:$0xff]  ;;  %vm8504_vm1 = vcmask 523520  }
 0x214   :  { %vm1063_vm3 = vmand %vm1031_vm8, %vm8439_vm14  ;;  %1235 = vst.msk [vmem:[#allocation2 + $0x60] sm:$0xff] %vm8444_vm12, %v1191_v57  ;;  %vm8447_vm6 = vnez %v8446_v60  ;;  %vm8448_vm14 = vcmask 785920   ;;  %v795_v4 = vadd.s32 4294967295, %v8452_v9 }
 0x215   :  { %vm882_vm0 = vmand %vm8442_vm4, %vm8440_vm5  ;;  %1718 = vrot.lane.b32.xlu1 %v1676_v19, %s3605_s26  ;;  %v2622_v39 = vld [vmem:[#allocation2 + $0x50] sm:$0xff]  ;;  %v3310_v11 = vsel %vm1063_vm3, 1.0, %v7741_v54  ;;  %1493 = vst.msk [vmem:[#allocation2 + $0x60] sm:$0xff] %vm8448_vm14, %v6566_v52  ;;  %vm8449_vm5 = vcmp.lt.s32.totalorder %v5429_v62, 7  ;;  %vm8453_vm3 = vcmask 1048320   ;;  %v8454_v52 = vrot.slane %v4368_v38, 2 }
 0x216   :  { %vm914_vm10 = vmand %vm882_vm0, %vm8443_vm13  ;;  %v2664_v30 = vpack.c.bf16 %v2622_v39, %v2619_v15  ;;  %1751 = vst.msk [vmem:[#allocation2 + $0x60] sm:$0xff] %vm8453_vm3, %v6613_v61  ;;  %vm8455_vm0 = vcmp.lt.s32.totalorder %v3830_v22, 6  ;;  %vm8456_vm13 = vcmp.ge.s32.totalorder %v5321_v10, 0  ;;  %v3540_v61 = vld [vmem:[%s7352_s5 + $0x20] sm:$0xff]  ;;  %v1160_v2 = vmul.f32 %v3310_v11, %v6573_v23  ;;  %v3539_v23 = vld [vmem:[%s7352_s5 + $0x18] sm:$0xff] }
 0x217   :  { %v3289_v56 = vsel %vm914_vm10, 1.0, %v7741_v54  ;;  %vm2337_vm8 = vmand %vm8447_vm6, %vm8445_vm7  ;;  %v1397_v13 = vsel %vm8455_vm0, %v1384_v6, %v8454_v52  ;;  %vm8457_vm10 = vnez %v8029_v8  ;;  %vm8459_vm7 = vcmp.lt.s32.totalorder %v5321_v10, 7  ;;  %v8462_v6 = vld [vmem:[#allocation22_spill] sm:$0xff]  ;;  %2859 = vmatpush.bf16.msrb.mxu2 %v3540_v61  ;;  %v8464_v15 = vld [vmem:[#allocation45_spill] sm:$0xff] }
 0x218   :  { %v978_v32 = vmul.f32 %v3289_v56, %v4704_v31  ;;  %vm6756_vm4 = vmand %vm2337_vm8, %vm8449_vm5  ;;  %2918 = vmatmul.bf16.gmra.mxu3 %v2664_v30  ;;  %vm8460_vm14 = vcmask 523520   ;;  %vm8461_vm5 = vcmp.ge.s32.totalorder %v5874_v59, 0  ;;  %v2209_v8 = vrot.slane %v5495_v21, 6  ;;  %v8466_v39 = vld [vmem:[#allocation69_spill] sm:$0xff]  ;;  %v1451_v11 = vpop.permute.xlu0 %1450  ;;  %v8475_v61 = vld [vmem:[#allocation58_spill] sm:$0xff] }
 0x219   :  { %vm2336_vm12 = vmand %vm8457_vm10, %vm8456_vm13  ;;  %v796_v36 = vadd.s32 4294967295, %v8462_v6  ;;  %v1418_v35 = vmul.f32 %v3326_v50, %v1397_v13  ;;  %1202 = vrot.lane.b32.xlu0 %v1160_v2, %s3607_s28  ;;  %vm8463_vm0 = vcmp.lt.s32.totalorder %v5874_v59, 7  ;;  %vm811_vm10 = vcmp.ge.s32.totalorder %v795_v4, 0  ;;  %v2445_v60 = vpop.permute.xlu1 %2444 }
 0x21a   :  { %994 = vst.msk [vmem:[#allocation2 + $0x78] sm:$0xff] %vm8458_vm2, %v978_v32  ;;  %vm2352_vm8 = vmand %vm2336_vm12, %vm8459_vm7  ;;  %vm827_vm12 = vcmp.lt.s32.totalorder %v795_v4, 7  ;;  %v3409_v57 = vsel %vm6756_vm4, 1.0, %v7741_v54  ;;  %vm8467_vm2 = vnez %v8466_v39  ;;  %v8470_v30 = vrot.slane %v5329_v46, 6 }
 0x21b   :  { %1236 = vst.msk [vmem:[#allocation2 + $0x78] sm:$0xff] %vm8460_vm14, %v1193_v55  ;;  %v3408_v38 = vsel %vm2352_vm8, 1.0, %v7741_v54  ;;  %vm2128_vm3 = vmand %vm8447_vm6, %vm8461_vm5  ;;  %vm8465_vm6 = vcmp.ge.s32.totalorder %v8464_v15, 0  ;;  %1460 = vrot.lane.b32.xlu2 %v1418_v35, %s3606_s27  ;;  %vm8468_vm8 = vcmp.lt.s32.totalorder %v8464_v15, 7  ;;  %vm8469_vm5 = vcmask 785920   ;;  %2860 = vmatpush.bf16.msrb.mxu2 %v3539_v23  ;;  %v8485_v23 = vld [vmem:[#allocation23_spill] sm:$0xff] }
 0x21c   :  { %v2400_v19 = vmul.f32 %v3408_v38, %v5357_v33  ;;  %vm2144_vm13 = vmand %vm2128_vm3, %vm8463_vm0  ;;  %1494 = vst.msk [vmem:[#allocation2 + $0x78] sm:$0xff] %vm8469_vm5, %v1451_v11  ;;  %vm8471_vm4 = vcmp.lt.s32.totalorder %v3830_v22, 2  ;;  %vm812_vm0 = vcmp.ge.s32.totalorder %v796_v36, 0  ;;  %v2401_v52 = vmul.f32 0.0, %v3409_v57  ;;  %v8486_v35 = vld [vmem:[#allocation55_spill] sm:$0xff] }
 0x21d   :  { %v3393_v55 = vsel %vm2144_vm13, 1.0, %v7741_v54  ;;  %vm1767_vm7 = vmand %vm8467_vm2, %vm8465_vm6  ;;  %v2213_v32 = vsel %vm8471_vm4, %v8470_v30, %v2209_v8  ;;  %vm828_vm13 = vcmp.lt.s32.totalorder %v796_v36, 7  ;;  %vm8474_vm6 = vcmask 1048320   ;;  %v3537_v57 = vld [vmem:[%s7352_s5 + $0x8] sm:$0xff] }
 0x21e   :  { %v2416_v59 = vmul.f32 %v2400_v19, %v6118_v27  ;;  %v2192_v56 = vmul.f32 0.0, %v3393_v55  ;;  %vm1783_vm14 = vmand %vm1767_vm7, %vm8468_vm8  ;;  %v6824_v27 = vpop.permute.xlu2 %1452  ;;  %1752 = vst.msk [vmem:[#allocation2 + $0x78] sm:$0xff] %vm8474_vm6, %v6631_v47  ;;  %vm8476_vm2 = vcmp.ge.s32.totalorder %v8475_v61, 0  ;;  %v8477_v4 = vrot.slane %v5329_v46, 7 }
 0x21f   :  { %v3352_v12 = vsel %vm1783_vm14, 1.0, %v7741_v54  ;;  %vm6820_vm3 = vmand %vm811_vm10, %vm827_vm12  ;;  %vm8478_vm12 = vcmp.lt.s32.totalorder %v3830_v22, 1  ;;  %vm8479_vm7 = vcmp.lt.s32.totalorder %v8475_v61, 7  ;;  %vm8482_vm14 = vcmask 261120  }
 0x220   :  { %2460 = vrot.lane.b32.xlu1 %v2416_v59, %s3605_s26  ;;  %v1847_v13 = vmul.f32 %v3352_v12, %v4704_v31  ;;  %vm1293_vm10 = vmand %vm6820_vm3, %vm8476_vm2  ;;  %v6840_v2 = vsel %vm8478_vm12, %v8477_v4, %v1647_v51  ;;  %v3538_v31 = vld [vmem:[%s7352_s5 + $0x10] sm:$0xff]  ;;  %v2241_v38 = vmul.f32 %v2213_v32, %v2192_v56  ;;  %vm7630_vm4 = vcmp.ge.s32.totalorder %v8485_v23, 0  ;;  %v1996_v32 = vpop.permute.xlu0 %1995  ;;  %v8492_v4 = vld [vmem:[#allocation73_spill] sm:$0xff] }
 0x221   :  { %vm6844_vm8 = vmand %vm1293_vm10, %vm8479_vm7  ;;  %vm7628_vm6 = vcmp.ge.s32.totalorder %v8486_v35, 0  ;;  %vm7629_vm10 = vcmp.lt.s32.totalorder %v8485_v23, 7  ;;  %vm7631_vm12 = vcmp.lt.s32.totalorder %v8486_v35, 7  ;;  %v6865_v19 = vadd.s32 4294967295, %v8485_v23  ;;  %2861 = vmatpush.bf16.msrb.mxu2 %v3538_v31 }
 0x222   :  { %1863 = vst.msk [vmem:[#allocation2 + $0x68] sm:$0xff] %vm8482_vm14, %v1847_v13  ;;  %vm6852_vm5 = vmand %vm812_vm0, %vm828_vm13  ;;  %v2417_v55 = vmul.f32 %v2401_v52, %v6840_v2  ;;  %2286 = vrot.lane.b32.xlu0 %v2241_v38, %s3606_s27  ;;  %v3330_v15 = vsel %vm6844_vm8, 1.0, %v7741_v54  ;;  %v1389_v39 = vrot.slane %v5495_v21, 2  ;;  %v8487_v59 = vrot.slane %v4976_v24, 1  ;;  %v1998_v52 = vpop.permute.xlu1 %1997 }
 0x223   :  { %vm1036_vm2 = vmand %vm6852_vm5, %vm7630_vm4  ;;  %v8488_v56 = vrot.slane %v5495_v21, 1  ;;  %vm8489_vm13 = vcmp.lt.s32.totalorder %v3830_v22, 7  ;;  %vm1520_vm14 = vcmp.ge.s32.totalorder %v8462_v6, 0  ;;  %vm7633_vm4 = vcmp.ge.s32.totalorder %v6865_v19, 0 }
 0x224   :  { %vm1068_vm0 = vmand %vm1036_vm2, %vm7629_vm10  ;;  %2462 = vrot.lane.b32.xlu2 %v2417_v55, %s3605_s26  ;;  %vm1536_vm2 = vcmp.lt.s32.totalorder %v8462_v6, 7  ;;  %v1373_v31 = vmul.f32 0.0, %v3330_v15 }
 0x225   :  { %v3315_v11 = vsel %vm1068_vm0, 1.0, %v7741_v54  ;;  %v6885_v30 = vsel %vm8489_vm13, %v8488_v56, %v8487_v59  ;;  %vm1035_vm7 = vmand %vm6820_vm3, %vm7628_vm6  ;;  %vm8490_vm0 = vcmask 523520   ;;  %vm8491_vm13 = vcmp.ge.s32.totalorder %v4495_v5, 0  ;;  %2862 = vmatpush.bf16.msrb.mxu2 %v3537_v57  ;;  %v3536_v59 = vld [vmem:[%s7352_s5] sm:$0xff] }
 0x226   :  { %v1116_v12 = vmul.f32 0.0, %v3315_v11  ;;  %vm1067_vm8 = vmand %vm1035_vm7, %vm7631_vm12  ;;  %2039 = vst.msk [vmem:[#allocation2 + $0x68] sm:$0xff] %vm8490_vm0, %v1996_v32  ;;  %vm8493_vm6 = vnez %v8492_v4  ;;  %v6903_v47 = vpop.permute.xlu2 %1698  ;;  %vm8494_vm7 = vcmask 785920   ;;  %vm8495_vm0 = vcmp.lt.s32.totalorder %v4495_v5, 7  ;;  %v8505_v32 = vld [vmem:[#allocation35_spill] sm:$0xff] }
 0x227   :  { %v3314_v13 = vsel %vm1067_vm8, 1.0, %v7741_v54  ;;  %vm1768_vm10 = vmand %vm8493_vm6, %vm8491_vm13  ;;  %2312 = vst.msk [vmem:[#allocation2 + $0x68] sm:$0xff] %vm8494_vm7, %v6692_v41  ;;  %v6911_v11 = vadd.s32 4294967295, %v8486_v35  ;;  %vm8496_vm6 = vcmask 1048320   ;;  %v8497_v57 = vrot.slane %v5329_v46, 2 }
 0x228   :  { %v1165_v38 = vmul.f32 %v6885_v30, %v1116_v12  ;;  %v1115_v55 = vmul.f32 0.0, %v3314_v13  ;;  %vm1784_vm8 = vmand %vm1768_vm10, %vm8495_vm0  ;;  %2488 = vst.msk [vmem:[#allocation2 + $0x68] sm:$0xff] %vm8496_vm6, %v2445_v60  ;;  %vm8498_vm13 = vcmp.lt.s32.totalorder %v3830_v22, 6  ;;  %vm1519_vm7 = vcmp.ge.s32.totalorder %v8452_v9, 0  ;;  %v8507_v12 = vld [vmem:[#allocation28_spill] sm:$0xff] }
 0x229   :  { %v1393_v41 = vsel %vm8498_vm13, %v8497_v57, %v1389_v39  ;;  %v3353_v15 = vsel %vm1784_vm8, 1.0, %v7741_v54  ;;  %vm6926_vm10 = vmand %vm1520_vm14, %vm1536_vm2  ;;  %vm1535_vm0 = vcmp.lt.s32.totalorder %v8452_v9, 7  ;;  %vm7634_vm8 = vcmp.lt.s32.totalorder %v6865_v19, 7  ;;  %2863 = vmatpush.bf16.msrb.mxu2 %v3536_v59 }
 0x22a   :  { %1212 = vrot.lane.b32.xlu1 %v1165_v38, %s3607_s28  ;;  %v1164_v60 = vmul.f32 %v6099_v49, %v1115_v55  ;;  %v1848_v56 = vmul.f32 %v3353_v15, %v4818_v44  ;;  %vm1568_vm14 = vmand %vm6926_vm10, %vm7633_vm4  ;;  %v1422_v6 = vmul.f32 %v1393_v41, %v1373_v31  ;;  %vm8501_vm6 = vcmask 261120   ;;  %v1711_v4 = vpop.permute.xlu1 %1710  ;;  %v8512_v38 = vld [vmem:[#allocation24_spill] sm:$0xff] }
 0x22b   :  { %vm1584_vm2 = vmand %vm1568_vm14, %vm7634_vm8  ;;  %vm7637_vm13 = vcmp.ge.s32.totalorder %v6911_v11, 0  ;;  %vm7636_vm4 = vcmp.lt.s32.totalorder %v6911_v11, 7  ;;  %vm8506_vm8 = vcmp.ge.s32.totalorder %v8505_v32, 0  ;;  %v8516_v41 = vrot.slane %v4976_v24, 7 }
 0x22c   :  { %1210 = vrot.lane.b32.xlu0 %v1164_v60, %s3607_s28  ;;  %1864 = vst.msk [vmem:[#allocation2 + $0x80] sm:$0xff] %vm8501_vm6, %v1848_v56  ;;  %vm6945_vm12 = vmand %vm1519_vm7, %vm1535_vm0  ;;  %v3347_v9 = vsel %vm1584_vm2, 1.0, %v7741_v54  ;;  %vm8508_vm6 = vcmp.ge.s32.totalorder %v8507_v12, 0  ;;  %1468 = vrot.lane.b32.xlu2 %v1422_v6, %s3606_s27  ;;  %vm8511_vm7 = vcmask 785920   ;;  %vm8513_vm0 = vcmp.ge.s32.totalorder %v8512_v38, 0  ;;  %v8521_v6 = vld [vmem:[#allocation30_spill] sm:$0xff] }
 0x22d   :  { %2040 = vst.msk [vmem:[#allocation2 + $0x80] sm:$0xff] %vm8504_vm1, %v1998_v52  ;;  %vm1567_vm14 = vmand %vm6945_vm12, %vm7637_vm13  ;;  %v2271_v52 = vpop.permute.xlu0 %2270  ;;  %v1632_v59 = vmul.f32 0.0, %v3347_v9  ;;  %v8518_v56 = vrot.slane %v4976_v24, 2 }
 0x22e   :  { %vm6960_vm15 = vmand %vm8508_vm6, %vm8506_vm8  ;;  %2313 = vst.msk [vmem:[#allocation2 + $0x80] sm:$0xff] %vm8511_vm7, %v2271_v52  ;;  %v6973_v55 = vpop.permute.xlu2 %1724  ;;  %vm8514_vm8 = vcmask 1048320   ;;  %vm8515_vm6 = vcmp.lt.s32.totalorder %v8512_v38, 7  ;;  %vm8519_vm7 = vcmp.lt.s32.totalorder %v3830_v22, 6  ;;  %v8524_v52 = vld [vmem:[#allocation57_spill] sm:$0xff] }
 0x22f   :  { %vm1583_vm1 = vmand %vm1567_vm14, %vm7636_vm4  ;;  %2489 = vst.msk [vmem:[#allocation2 + $0x80] sm:$0xff] %vm8514_vm8, %v6749_v48  ;;  %v1392_v48 = vsel %vm8519_vm7, %v1389_v39, %v8518_v56  ;;  %vm8522_vm8 = vnez %v8521_v6  ;;  %vm8526_vm7 = vcmp.lt.s32.totalorder %v6911_v11, 7 }
 0x230   :  { %v3346_v31 = vsel %vm1583_vm1, 1.0, %v7741_v54  ;;  %vm1294_vm2 = vmand %vm6852_vm5, %vm8513_vm0  ;;  %vm8517_vm1 = vcmp.lt.s32.totalorder %v3830_v22, 1  ;;  %vm8520_vm0 = vcmp.ge.s32.totalorder %v5708_v43, 0 }
 0x231   :  { %v1631_v57 = vmul.f32 0.0, %v3346_v31  ;;  %vm1326_vm14 = vmand %vm1294_vm2, %vm8515_vm6  ;;  %v6985_v15 = vsel %vm8517_vm1, %v1647_v51, %v8516_v41  ;;  %vm8523_vm6 = vcmp.lt.s32.totalorder %v5708_v43, 7 }
 0x232   :  { %v3331_v60 = vsel %vm1326_vm14, 1.0, %v7741_v54  ;;  %vm883_vm2 = vmand %vm8522_vm8, %vm8520_vm0  ;;  %vm8525_vm14 = vnez %v8524_v52  ;;  %v1681_v39 = vmul.f32 %v6985_v15, %v1632_v59  ;;  %vm8527_vm8 = vcmp.ge.s32.totalorder %v8512_v38, 0  ;;  %v2625_v59 = vld [vmem:[#allocation2 + $0x68] sm:$0xff] }
 0x233   :  { %v1680_v9 = vmul.f32 %v6840_v2, %v1631_v57  ;;  %v1374_v12 = vmul.f32 0.0, %v3331_v60  ;;  %vm915_vm4 = vmand %vm883_vm2, %vm8523_vm6  ;;  %vm8528_vm2 = vcmask 261120   ;;  %vm8529_vm6 = vcmp.lt.s32.totalorder %v8512_v38, 7 }
 0x234   :  { %v3290_v51 = vsel %vm915_vm4, 1.0, %v7741_v54  ;;  %vm2129_vm1 = vmand %vm8525_vm14, %vm7637_vm13  ;;  %1728 = vrot.lane.b32.xlu2 %v1681_v39, %s3605_s26  ;;  %v2210_v60 = vrot.slane %v4976_v24, 6 }
 0x235   :  { %1726 = vrot.lane.b32.xlu1 %v1680_v9, %s3605_s26  ;;  %v1423_v31 = vmul.f32 %v1392_v48, %v1374_v12  ;;  %v979_v41 = vmul.f32 %v3290_v51, %v4818_v44  ;;  %vm2145_vm0 = vmand %vm2129_vm1, %vm8526_vm7  ;;  %v1195_v2 = vpop.permute.xlu0 %1194  ;;  %v1441_v44 = vpop.permute.xlu1 %1440  ;;  %vm8531_vm1 = vcmp.ge.s32.totalorder %v8475_v61, 0 }
 0x236   :  { %v3394_v43 = vsel %vm2145_vm0, 1.0, %v7741_v54  ;;  %vm1890_vm4 = vmand %vm6926_vm10, %vm8527_vm8  ;;  %v2628_v57 = vld [vmem:[#allocation2 + $0x80] sm:$0xff]  ;;  %v7026_v48 = vpop.permute.xlu2 %2284  ;;  %vm8532_vm0 = vcmask 785920  }
 0x237   :  { %1470 = vrot.lane.b32.xlu0 %v1423_v31, %s3606_s27  ;;  %995 = vst.msk [vmem:[#allocation2 + $0x90] sm:$0xff] %vm8528_vm2, %v979_v41  ;;  %vm1906_vm13 = vmand %vm1890_vm4, %vm8529_vm6  ;;  %v2667_v38 = vpack.c.bf16 %v2628_v57, %v2625_v59  ;;  %v2193_v6 = vmul.f32 0.0, %v3394_v43  ;;  %vm8534_vm4 = vcmask 1048320   ;;  %vm8536_vm2 = vcmp.lt.s32.totalorder %v8505_v32, 7 }
 0x238   :  { %1237 = vst.msk [vmem:[#allocation2 + $0x90] sm:$0xff] %vm8530_vm11, %v1195_v2  ;;  %v3379_v56 = vsel %vm1906_vm13, 1.0, %v7741_v54  ;;  %vm1889_vm7 = vmand %vm6945_vm12, %vm8531_vm1  ;;  %vm8533_vm11 = vcmp.lt.s32.totalorder %v8475_v61, 7  ;;  %vm8535_vm13 = vcmp.lt.s32.totalorder %v3830_v22, 2  ;;  %vm8537_vm1 = vcmp.ge.s32.totalorder %v8485_v23, 0 }
 0x239   :  { %1495 = vst.msk [vmem:[#allocation2 + $0x90] sm:$0xff] %vm8532_vm0, %v6824_v27  ;;  %v1954_v9 = vmul.f32 0.0, %v3379_v56  ;;  %vm1905_vm8 = vmand %vm1889_vm7, %vm8533_vm11  ;;  %v2212_v12 = vsel %vm8535_vm13, %v2209_v8, %v2210_v60  ;;  %2923 = vmatmul.bf16.gmra.mxu3 %v2667_v38  ;;  %vm8540_vm11 = vcmp.lt.s32.totalorder %v8485_v23, 7  ;;  %vm8542_vm13 = vcmask 261120  }
 0x23a   :  { %1753 = vst.msk [vmem:[#allocation2 + $0x90] sm:$0xff] %vm8534_vm4, %v1711_v4  ;;  %v3378_v51 = vsel %vm1905_vm8, 1.0, %v7741_v54  ;;  %vm909_vm6 = vmand %vm6960_vm15, %vm8536_vm2  ;;  %v8538_v4 = vld [vmem:[#allocation27_spill] sm:$0xff]  ;;  %v2242_v32 = vmul.f32 %v2212_v12, %v2193_v6  ;;  %vm8541_vm15 = vcmp.ge.s32.totalorder %v8486_v35, 0  ;;  %vm8543_vm2 = vcmp.lt.s32.totalorder %v8486_v35, 7  ;;  %v8566_v6 = vld [vmem:[#allocation61_spill] sm:$0xff] }
 0x23b   :  { %v1970_v27 = vmul.f32 %v1954_v9, %v6009_v58  ;;  %v1953_v39 = vmul.f32 0.0, %v3378_v51  ;;  %v3284_v61 = vsel %vm909_vm6, 1.0, %v7741_v54  ;;  %vm8539_vm7 = vnez %v8538_v4  ;;  %vm2338_vm4 = vmand %vm8525_vm14, %vm8541_vm15  ;;  %v8567_v51 = vld [vmem:[#allocation63_spill] sm:$0xff] }
 0x23c   :  { %vm2339_vm0 = vmand %vm8539_vm7, %vm8537_vm1  ;;  %v973_v8 = vmul.f32 %v3284_v61, %v4976_v24  ;;  %2288 = vrot.lane.b32.xlu2 %v2242_v32, %s3606_s27  ;;  %vm8544_vm1 = vcmp.ge.s32.totalorder %v6865_v19, 0  ;;  %vm8545_vm14 = vcmask 523520   ;;  %vm8547_vm15 = vcmask 785920  }
 0x23d   :  { %vm2355_vm8 = vmand %vm2339_vm0, %vm8540_vm11  ;;  %2017 = vrot.lane.b32.xlu1 %v1970_v27, %s3607_s28  ;;  %v1969_v13 = vmul.f32 %v1953_v39, %v6885_v30  ;;  %v1183_v31 = vpop.permute.xlu0 %1182  ;;  %v1723_v30 = vpop.permute.xlu1 %1722  ;;  %vm8546_vm11 = vcmp.lt.s32.totalorder %v6865_v19, 7  ;;  %v8551_v56 = vrot.slane %v8127_v1, 6 }
 0x23e   :  { %989 = vst.msk [vmem:[#allocation2] sm:$0xff] %vm8542_vm13, %v973_v8  ;;  %v3411_v58 = vsel %vm2355_vm8, 1.0, %v7741_v54  ;;  %vm2354_vm6 = vmand %vm2338_vm4, %vm8543_vm2  ;;  %vm8548_vm4 = vcmp.ge.s32.totalorder %v5429_v62, 0  ;;  %vm8549_vm13 = vnez %v8179_v63  ;;  %v7077_v59 = vpop.permute.xlu2 %1712 }
 0x23f   :  { %2015 = vrot.lane.b32.xlu0 %v1969_v13, %s3607_s28  ;;  %v3410_v41 = vsel %vm2354_vm6, 1.0, %v7741_v54  ;;  %vm2130_vm0 = vmand %vm8539_vm7, %vm8544_vm1  ;;  %1231 = vst.msk [vmem:[#allocation2] sm:$0xff] %vm8545_vm14, %v1183_v31  ;;  %v2403_v43 = vmul.f32 0.0, %v3411_v58  ;;  %vm8550_vm7 = vcmask 1048320   ;;  %vm8552_vm6 = vcmp.lt.s32.totalorder %v3830_v22, 2  ;;  %v2621_v31 = vld [vmem:[#allocation2 + $0x48] sm:$0xff] }
 0x240   :  { %v2402_v52 = vmul.f32 0.0, %v3410_v41  ;;  %vm2146_vm8 = vmand %vm2130_vm0, %vm8546_vm11  ;;  %1489 = vst.msk [vmem:[#allocation2] sm:$0xff] %vm8547_vm15, %v1441_v44  ;;  %v2227_v38 = vsel %vm8552_vm6, %v2210_v60, %v8551_v56  ;;  %vm8553_vm1 = vcmp.lt.s32.totalorder %v5429_v62, 7  ;;  %vm8555_vm11 = vcmp.ge.s32.totalorder %v5321_v10, 0 }
 0x241   :  { %v3395_v2 = vsel %vm2146_vm8, 1.0, %v7741_v54  ;;  %vm1776_vm2 = vmand %vm8549_vm13, %vm8548_vm4  ;;  %1747 = vst.msk [vmem:[#allocation2] sm:$0xff] %vm8550_vm7, %v6903_v47  ;;  %vm8556_vm8 = vnez %v8186_v14  ;;  %vm8557_vm4 = vcmp.lt.s32.totalorder %v5321_v10, 7  ;;  %v2419_v22 = vmul.f32 %v2403_v43, %v6027_v7 }
 0x242   :  { %v2194_v57 = vmul.f32 0.0, %v3395_v2  ;;  %vm1792_vm0 = vmand %vm1776_vm2, %vm8553_vm1  ;;  %v2418_v44 = vmul.f32 %v2402_v52, %v6985_v15  ;;  %vm8558_vm2 = vcmp.ge.s32.totalorder %v6067_v17, 0  ;;  %vm8560_vm1 = vcmp.lt.s32.totalorder %v6067_v17, 7 }
 0x243   :  { %vm8554_vm14 = vmmov %vm8550_vm7  ;;  %v3361_v63 = vsel %vm1792_vm0, 1.0, %v7741_v54  ;;  %vm8559_vm7 = vnez %v8238_v53  ;;  %v2615_v53 = vld [vmem:[#allocation2 + $0x18] sm:$0xff] }
 0x244   :  { %1759 = vst.msk [vmem:[#allocation2 + $0x120] sm:$0xff] %vm8554_vm14, %v1723_v30  ;;  %vm1775_vm15 = vmand %vm8556_vm8, %vm8555_vm11  ;;  %v1840_v47 = vmul.f32 0.0, %v3361_v63  ;;  %v2243_v62 = vmul.f32 %v2227_v38, %v2194_v57  ;;  %2466 = vrot.lane.b32.xlu2 %v2419_v22, %s3605_s26  ;;  %vm8561_vm14 = vcmp.ge.s32.totalorder %v4883_v0, 0  ;;  %vm8562_vm11 = vnez %v8138_v16  ;;  %v8569_v16 = vld [vmem:[#allocation52_spill] sm:$0xff] }
 0x245   :  { %vm1791_vm13 = vmand %vm1775_vm15, %vm8557_vm4  ;;  %2464 = vrot.lane.b32.xlu1 %v2418_v44, %s3605_s26  ;;  %v1467_v10 = vpop.permute.xlu0 %1466  ;;  %v2014_v7 = vpop.permute.xlu1 %2013  ;;  %vm8563_vm15 = vcmask 785920   ;;  %vm8564_vm4 = vcmp.lt.s32.totalorder %v4883_v0, 7  ;;  %v2618_v30 = vld [vmem:[#allocation2 + $0x30] sm:$0xff]  ;;  %v2627_v38 = vld [vmem:[#allocation2 + $0x78] sm:$0xff] }
 0x246   :  { %v3360_v1 = vsel %vm1791_vm13, 1.0, %v7741_v54  ;;  %vm884_vm6 = vmand %vm8559_vm7, %vm8558_vm2  ;;  %v1856_v15 = vmul.f32 %v1840_v47, %v5329_v46  ;;  %1502 = vst.msk [vmem:[#allocation2 + $0x138] sm:$0xff] %vm8563_vm15, %v1467_v10  ;;  %vm8565_vm2 = vcmask 1048320   ;;  %vm8568_vm7 = vcmp.ge.s32.totalorder %v8567_v51, 0 }
 0x247   :  { %v1839_v14 = vmul.f32 %v3360_v1, %v5357_v33  ;;  %vm916_vm0 = vmand %vm884_vm6, %vm8560_vm1  ;;  %2290 = vrot.lane.b32.xlu0 %v2243_v62, %s3606_s27  ;;  %1760 = vst.msk [vmem:[#allocation2 + $0x138] sm:$0xff] %vm8565_vm2, %v6973_v55  ;;  %vm8570_vm6 = vnez %v8569_v16  ;;  %vm8574_vm15 = vcmp.ge.s32.totalorder %v6911_v11, 0  ;;  %v2273_v55 = vpop.permute.xlu2 %2272  ;;  %vm8576_vm2 = vcmp.lt.s32.totalorder %v6911_v11, 7  ;;  %v8582_v11 = vld [vmem:[#allocation25_spill] sm:$0xff] }
 0x248   :  { %v3291_v60 = vsel %vm916_vm0, 1.0, %v7741_v54  ;;  %vm1769_vm8 = vmand %vm8562_vm11, %vm8561_vm14  ;;  %v2612_v17 = vld [vmem:[#allocation2] sm:$0xff]  ;;  %vm8571_vm0 = vcmask 261120   ;;  %vm8572_vm14 = vcmp.lt.s32.totalorder %v8567_v51, 7  ;;  %v2663_v52 = vpack.c.bf16 %v2621_v31, %v2618_v30 }
 0x249   :  { %v1855_v33 = vmul.f32 %v1839_v14, %v5064_v3  ;;  %vm1785_vm13 = vmand %vm1769_vm8, %vm8564_vm4  ;;  %v980_v9 = vmul.f32 %v3291_v60, %v8566_v6  ;;  %v2660_v27 = vpack.c.bf16 %v2615_v53, %v2612_v17  ;;  %1872 = vst.msk [vmem:[#allocation2 + $0x140] sm:$0xff] %vm8571_vm0, %v1856_v15  ;;  %vm8573_vm8 = vcmask 523520   ;;  %v2630_v53 = vld [vmem:[#allocation2 + $0x90] sm:$0xff] }
 0x24a   :  { %v3354_v12 = vsel %vm1785_vm13, 1.0, %v7741_v54  ;;  %vm1770_vm1 = vmand %vm8570_vm6, %vm8568_vm7  ;;  %2048 = vst.msk [vmem:[#allocation2 + $0x140] sm:$0xff] %vm8573_vm8, %v2014_v7 }
 0x24b   :  { %v1849_v0 = vmul.f32 %v3354_v12, %v8566_v6  ;;  %vm1786_vm11 = vmand %vm1770_vm1, %vm8572_vm14  ;;  %2864 = vmatmul.bf16.vlgmr.msrb.gmra.mxu2 %v2660_v27  ;;  %vm8580_vm14 = vcmask 785920  }
 0x24c   :  { %v3355_v3 = vsel %vm1786_vm11, 1.0, %v7741_v54  ;;  %vm891_vm4 = vmand %vm6820_vm3, %vm8574_vm15  ;;  %vm8581_vm11 = vcmp.ge.s32.totalorder %v6343_v45, 0 }
 0x24d   :  { %vm8575_vm13 = vmmov %vm8571_vm0  ;;  %v1850_v39 = vmul.f32 %v3355_v3, %v5025_v26  ;;  %v2012_v8 = vpop.permute.xlu0 %2011  ;;  %v1197_v32 = vpop.permute.xlu1 %1196 }
 0x24e   :  { %1871 = vst.msk [vmem:[#allocation2 + $0x128] sm:$0xff] %vm8575_vm13, %v1855_v33  ;;  %vm923_vm7 = vmand %vm891_vm4, %vm8576_vm2  ;;  %vm8585_vm13 = vcmp.lt.s32.totalorder %v6343_v45, 7 }
 0x24f   :  { %vm8577_vm6 = vmmov %vm8571_vm0  ;;  %v3298_v61 = vsel %vm923_vm7, 1.0, %v7741_v54  ;;  %1866 = vst.msk [vmem:[#allocation2 + $0xb0] sm:$0xff] %vm8571_vm0, %v1850_v39 }
 0x250   :  { %996 = vst.msk [vmem:[#allocation2 + $0xa8] sm:$0xff] %vm8577_vm6, %v980_v9  ;;  %vm8578_vm1 = vmmov %vm8571_vm0  ;;  %v971_v4 = vmul.f32 0.0, %v3298_v61 }
 0x251   :  { %1865 = vst.msk [vmem:[#allocation2 + $0x98] sm:$0xff] %vm8578_vm1, %v1849_v0  ;;  %vm8579_vm3 = vmmov %vm8573_vm8  ;;  %vm8583_vm8 = vnez %v8582_v11  ;;  %v2645_v11 = vld [vmem:[#allocation2 + $0x108] sm:$0xff] }
 0x252   :  { %2047 = vst.msk [vmem:[#allocation2 + $0x128] sm:$0xff] %vm8579_vm3, %v2012_v8  ;;  %v987_v50 = vmul.f32 %v971_v4, %v5329_v46  ;;  %vm885_vm15 = vmand %vm8583_vm8, %vm8581_vm11  ;;  %v2451_v46 = vpop.permute.xlu2 %2450  ;;  %vm8592_vm11 = vcmp.lt.s32.totalorder %v6431_v25, 7 }
 0x253   :  { %2320 = vst.msk [vmem:[#allocation2 + $0x128] sm:$0xff] %vm8580_vm14, %v7026_v48  ;;  %vm8584_vm4 = vmmov %vm8579_vm3  ;;  %vm8590_vm3 = vcmp.ge.s32.totalorder %v6431_v25, 0 }
 0x254   :  { %1238 = vst.msk [vmem:[#allocation2 + $0xa8] sm:$0xff] %vm8584_vm4, %v1197_v32  ;;  %vm917_vm2 = vmand %vm885_vm15, %vm8585_vm13  ;;  %vm8594_vm13 = vcmp.ge.s32.totalorder %v6865_v19, 0 }
 0x255   :  { %v3292_v13 = vsel %vm917_vm2, 1.0, %v7741_v54  ;;  %vm8586_vm7 = vmmov %vm8571_vm0  ;;  %v1455_v48 = vpop.permute.xlu0 %1454  ;;  %v2449_v41 = vpop.permute.xlu1 %2448 }
 0x256   :  { %1003 = vst.msk [vmem:[#allocation2 + $0x150] sm:$0xff] %vm8586_vm7, %v987_v50  ;;  %v981_v58 = vmul.f32 %v3292_v13, %v5025_v26  ;;  %vm8587_vm6 = vmmov %vm8571_vm0  ;;  %vm8589_vm0 = vcmask 1048320   ;;  %vm8596_vm7 = vcmp.ge.s32.totalorder %v8333_v42, 0 }
 0x257   :  { %vm8588_vm1 = vmmov %vm8580_vm14 }
 0x258   :  { %997 = vst.msk [vmem:[#allocation2 + $0xc0] sm:$0xff] %vm8587_vm6, %v981_v58  ;;  %vm886_vm14 = vmand %vm6475_vm9, %vm8590_vm3  ;;  %vm8598_vm3 = vcmp.lt.s32.totalorder %v8333_v42, 7 }
 0x259   :  { %1496 = vst.msk [vmem:[#allocation2 + $0xa8] sm:$0xff] %vm8588_vm1, %v1455_v48  ;;  %vm918_vm8 = vmand %vm886_vm14, %vm8592_vm11  ;;  %v2646_v48 = vld [vmem:[#allocation2 + $0x110] sm:$0xff] }
 0x25a   :  { %1754 = vst.msk [vmem:[#allocation2 + $0xa8] sm:$0xff] %vm8589_vm0, %v7077_v59  ;;  %v3293_v26 = vsel %vm918_vm8, 1.0, %v7741_v54  ;;  %vm8593_vm15 = vmmov %vm8587_vm6  ;;  %v1457_v59 = vpop.permute.xlu2 %1456  ;;  %vm8597_vm6 = vnez %v8347_v40  ;;  %vm8600_vm8 = vcmp.ge.s32.totalorder %v5099_v18, 0 }
 0x25b   :  { %2869 = vmatmul.bf16.gmra.mxu2 %v2663_v52  ;;  %v982_v43 = vmul.f32 %v3293_v26, %v5141_v28  ;;  %vm892_vm9 = vmand %vm6852_vm5, %vm8594_vm13  ;;  %vm8601_vm5 = vnez %v8326_v34  ;;  %v2648_v26 = vld [vmem:[#allocation2 + $0x120] sm:$0xff] }
 0x25c   :  { %vm8595_vm2 = vmmov %vm8588_vm1 }
 0x25d   :  { %998 = vst.msk [vmem:[#allocation2 + $0xd8] sm:$0xff] %vm8593_vm15, %v982_v43  ;;  %v2000_v2 = vpop.permute.xlu0 %1999  ;;  %v2002_v57 = vpop.permute.xlu1 %2001  ;;  %vm1772_vm1 = vmand %vm8597_vm6, %vm8596_vm7  ;;  %vm8604_vm6 = vcmask 261120   ;;  %v2651_v43 = vld [vmem:[#allocation2 + $0x138] sm:$0xff] }
 0x25e   :  { %2041 = vst.msk [vmem:[#allocation2 + $0x98] sm:$0xff] %vm8584_vm4, %v2000_v2  ;;  %vm1788_vm14 = vmand %vm1772_vm1, %vm8598_vm3  ;;  %vm8605_vm1 = vcmp.ge.s32.totalorder %v8485_v23, 0  ;;  %vm8606_vm3 = vcmp.lt.s32.totalorder %v8485_v23, 7 }
 0x25f   :  { %2314 = vst.msk [vmem:[#allocation2 + $0x98] sm:$0xff] %vm8595_vm2, %v2273_v55  ;;  %vm8599_vm11 = vmmov %vm8584_vm4  ;;  %v3357_v25 = vsel %vm1788_vm14, 1.0, %v7741_v54  ;;  %vm8602_vm4 = vcmp.lt.s32.totalorder %v5099_v18, 7  ;;  %vm8603_vm2 = vcmp.lt.s32.totalorder %v6865_v19, 7 }
 0x260   :  { %2490 = vst.msk [vmem:[#allocation2 + $0x98] sm:$0xff] %vm8589_vm0, %v2449_v41  ;;  %vm1771_vm15 = vmand %vm8601_vm5, %vm8600_vm8  ;;  %v1852_v36 = vmul.f32 %v3357_v25, %v8354_v29  ;;  %vm8609_vm5 = vcmask 1048320   ;;  %v2643_v41 = vld [vmem:[#allocation2 + $0xf8] sm:$0xff] }
 0x261   :  { %2042 = vst.msk [vmem:[#allocation2 + $0xb0] sm:$0xff] %vm8599_vm11, %v2002_v57  ;;  %vm1787_vm13 = vmand %vm1771_vm15, %vm8602_vm4  ;;  %vm8607_vm11 = vcmask 785920   ;;  %v2633_v17 = vld [vmem:[#allocation2 + $0xa8] sm:$0xff]  ;;  %v2676_v30 = vpack.c.bf16 %v2646_v48, %v2643_v41  ;;  %v2678_v57 = vpack.c.bf16 %v2651_v43, %v2648_v26 }
 0x262   :  { %v3356_v40 = vsel %vm1787_vm13, 1.0, %v7741_v54  ;;  %vm924_vm7 = vmand %vm892_vm9, %vm8603_vm2  ;;  %1868 = vst.msk [vmem:[#allocation2 + $0xe0] sm:$0xff] %vm8604_vm6, %v1852_v36  ;;  %vm8608_vm9 = vcmp.ge.s32.totalorder %v8486_v35, 0  ;;  %v1717_v23 = vpop.permute.xlu2 %1716 }
 0x263   :  { %v1851_v42 = vmul.f32 %v3356_v40, %v5141_v28  ;;  %v3299_v56 = vsel %vm924_vm7, 1.0, %v7741_v54  ;;  %vm1778_vm0 = vmand %vm6926_vm10, %vm8605_vm1  ;;  %v2624_v28 = vld [vmem:[#allocation2 + $0x60] sm:$0xff]  ;;  %vm8610_vm10 = vcmp.lt.s32.totalorder %v8486_v35, 7  ;;  %vm8615_vm7 = vcmask 523520  }
 0x264   :  { %v972_v44 = vmul.f32 0.0, %v3299_v56  ;;  %vm1794_vm14 = vmand %vm1778_vm0, %vm8606_vm3  ;;  %v2666_v47 = vpack.c.bf16 %v2627_v38, %v2624_v28  ;;  %vm8617_vm1 = vcmp.ge.s32.totalorder %v8432_v20, 0  ;;  %vm8618_vm0 = vnez %v8419_v37 }
 0x265   :  { %v2275_v34 = vpop.permute.xlu0 %2274  ;;  %v1715_v18 = vpop.permute.xlu1 %1714  ;;  %v3363_v19 = vsel %vm1794_vm14, 1.0, %v7741_v54  ;;  %vm1777_vm8 = vmand %vm6945_vm12, %vm8608_vm9 }
 0x266   :  { %2315 = vst.msk [vmem:[#allocation2 + $0xb0] sm:$0xff] %vm8607_vm11, %v2275_v34  ;;  %v988_v5 = vmul.f32 %v972_v44, %v5495_v21  ;;  %v1842_v63 = vmul.f32 0.0, %v3363_v19  ;;  %vm1793_vm15 = vmand %vm1777_vm8, %vm8610_vm10 }
 0x267   :  { %2491 = vst.msk [vmem:[#allocation2 + $0xb0] sm:$0xff] %vm8609_vm5, %v2451_v46  ;;  %vm8611_vm4 = vmmov %vm8604_vm6  ;;  %v3362_v22 = vsel %vm1793_vm15, 1.0, %v7741_v54  ;;  %v2631_v35 = vld [vmem:[#allocation2 + $0x98] sm:$0xff] }
 0x268   :  { %1867 = vst.msk [vmem:[#allocation2 + $0xc8] sm:$0xff] %vm8611_vm4, %v1851_v42  ;;  %vm8612_vm13 = vmmov %vm8611_vm4  ;;  %v1858_v49 = vmul.f32 %v1842_v63, %v4976_v24  ;;  %v1841_v62 = vmul.f32 0.0, %v3362_v22 }
 0x269   :  { %1004 = vst.msk [vmem:[#allocation2 + $0x168] sm:$0xff] %vm8612_vm13, %v988_v5  ;;  %vm8613_vm12 = vmmov %vm8611_vm4  ;;  %v2963_v5 = vpop.f32.mrf.mxu0 }
 0x26a   :  { %1874 = vst.msk [vmem:[#allocation2 + $0x170] sm:$0xff] %vm8613_vm12, %v1858_v49  ;;  %v1857_v1 = vmul.f32 %v1841_v62, %v5495_v21  ;;  %vm8614_vm2 = vmmov %vm8611_vm4  ;;  %v2277_v21 = vpop.permute.xlu2 %2276  ;;  %v3554_v62 = vld [vmem:[%s7354_s7] sm:$0xff] }
 0x26b   :  { %2874 = vmatmul.bf16.gmra.mxu2 %v2666_v47  ;;  %vm8616_vm6 = vmmov %vm8607_vm11  ;;  %vm8620_vm11 = vcmp.lt.s32.totalorder %v8432_v20, 7  ;;  %v2669_v20 = vpack.c.bf16 %v2633_v17, %v2630_v53 }
 0x26c   :  { %1873 = vst.msk [vmem:[#allocation2 + $0x158] sm:$0xff] %vm8614_vm2, %v1857_v1  ;;  %vm887_vm3 = vmand %vm8618_vm0, %vm8617_vm1  ;;  %v2914_v1 = vpop.f32.mrf.mxu3 }
 0x26d   :  { %v1199_v15 = vpop.permute.xlu0 %1198  ;;  %v1201_v14 = vpop.permute.xlu1 %1200  ;;  %vm8619_vm14 = vmmov %vm8609_vm5 }
 0x26e   :  { %1239 = vst.msk [vmem:[#allocation2 + $0xc0] sm:$0xff] %vm8615_vm7, %v1199_v15  ;;  %v2634_v10 = vld [vmem:[#allocation2 + $0xb0] sm:$0xff]  ;;  %vm919_vm9 = vmand %vm887_vm3, %vm8620_vm11  ;;  %v7270_v15 = vld [vmem:[%s7353_s6] ss:$0 sm:$0xff] }
 0x26f   :  { %1497 = vst.msk [vmem:[#allocation2 + $0xc0] sm:$0xff] %vm8616_vm6, %v1457_v59  ;;  %v2670_v7 = vpack.c.bf16 %v2634_v10, %v2631_v35  ;;  %vm8621_vm8 = vmmov %vm8615_vm7  ;;  %v3294_v24 = vsel %vm919_vm9, 1.0, %v7741_v54 }
 0x270   :  { %1755 = vst.msk [vmem:[#allocation2 + $0xc0] sm:$0xff] %vm8619_vm14, %v1715_v18  ;;  %v983_v60 = vmul.f32 %v3294_v24, %v8354_v29  ;;  %vm8622_vm5 = vmmov %vm8614_vm2 }
 0x271   :  { %2928 = vmatmul.bf16.gmra.mxu3 %v2670_v7  ;;  %1240 = vst.msk [vmem:[#allocation2 + $0xd8] sm:$0xff] %vm8621_vm8, %v1201_v14  ;;  %vm8623_vm10 = vmmov %vm8616_vm6  ;;  %v2965_v49 = vpop.f32.mrf.mxu0 }
 0x272   :  { %999 = vst.msk [vmem:[#allocation2 + $0xf0] sm:$0xff] %vm8622_vm5, %v983_v60  ;;  %vm8624_vm15 = vmmov %vm8619_vm14  ;;  %v2455_v6 = vpop.permute.xlu2 %2454 }
 0x273   :  { %vm8625_vm4 = vmmov %vm8615_vm7 }
 0x274   :  { %vm8626_vm13 = vmmov %vm8625_vm4  ;;  %v2916_v7 = vpop.f32.mrf.mxu3 }
 0x275   :  { %v1459_v33 = vpop.permute.xlu0 %1458  ;;  %v2006_v37 = vpop.permute.xlu1 %2005  ;;  %vm8627_vm12 = vmmov %vm8616_vm6 }
 0x276   :  { %1498 = vst.msk [vmem:[#allocation2 + $0xd8] sm:$0xff] %vm8623_vm10, %v1459_v33  ;;  %vm8628_vm2 = vmmov %vm8619_vm14 }
 0x277   :  { %1756 = vst.msk [vmem:[#allocation2 + $0xd8] sm:$0xff] %vm8624_vm15, %v1717_v23  ;;  %vm8629_vm7 = vmmov %vm8616_vm6  ;;  %v2636_v16 = vld [vmem:[#allocation2 + $0xc0] sm:$0xff]  ;;  %v3555_v23 = vld [vmem:[%s7354_s7 + $0x8] sm:$0xff] }
 0x278   :  { %2044 = vst.msk [vmem:[#allocation2 + $0xe0] sm:$0xff] %vm8625_vm4, %v2006_v37  ;;  %vm8630_vm6 = vmmov %vm8628_vm2  ;;  %3077 = vmatpush.bf16.msrb.mxu1 %v3555_v23 }
 0x279   :  { %vm8631_vm1 = vmmov %vm8625_vm4  ;;  %v2968_v35 = vpop.f32.mrf.mxu0 }
 0x27a   :  { %v1461_v51 = vpop.permute.xlu2 %1460  ;;  %vm8632_vm0 = vmmov %vm8629_vm7 }
 0x27b   :  { %2879 = vmatmul.bf16.gmra.mxu2 %v2669_v20  ;;  %vm8633_vm3 = vmmov %vm8628_vm2 }
 0x27c   :  { %vm8634_vm14 = vmmov %vm8628_vm2  ;;  %3078 = vmatpush.bf16.msrb.mxu1 %v3554_v62 }
 0x27d   :  { %v2004_v9 = vpop.permute.xlu0 %2003  ;;  %v2453_v54 = vpop.permute.xlu1 %2452  ;;  %vm8635_vm11 = vmmov %vm8632_vm0 }
 0x27e   :  { %2043 = vst.msk [vmem:[#allocation2 + $0xc8] sm:$0xff] %vm8626_vm13, %v2004_v9  ;;  %v2639_v12 = vld [vmem:[#allocation2 + $0xd8] sm:$0xff]  ;;  %vm8636_vm9 = vmmov %vm8628_vm2 }
 0x27f   :  { %2316 = vst.msk [vmem:[#allocation2 + $0xc8] sm:$0xff] %vm8627_vm12, %v2277_v21  ;;  %v2672_v0 = vpack.c.bf16 %v2639_v12, %v2636_v16  ;;  %vm8637_vm8 = vmmov %vm8631_vm1 }
 0x280   :  { %2492 = vst.msk [vmem:[#allocation2 + $0xc8] sm:$0xff] %vm8628_vm2, %v2453_v54  ;;  %vm8638_vm5 = vmmov %vm8631_vm1 }
 0x281   :  { %vm8639_vm10 = vmmov %vm8632_vm0  ;;  %v2970_v33 = vpop.f32.mrf.mxu0 }
 0x282   :  { %v2463_v4 = vpop.permute.xlu2 %2462  ;;  %vm8640_vm15 = vmmov %vm8628_vm2 }
 0x283   :  { %vm8641_vm4 = vmmov %vm8632_vm0 }
 0x284   :  { %vm8642_vm13 = vmmov %vm8628_vm2 }
 0x285   :  { %v2279_v29 = vpop.permute.xlu0 %2278  ;;  %vm8643_vm12 = vmmov %vm8631_vm1 }
 0x286   :  { %2317 = vst.msk [vmem:[#allocation2 + $0xe0] sm:$0xff] %vm8629_vm7, %v2279_v29  ;;  %vm8644_vm2 = vmmov %vm8631_vm1 }
 0x287   :  { %2493 = vst.msk [vmem:[#allocation2 + $0xe0] sm:$0xff] %vm8630_vm6, %v2455_v6  ;;  %v1719_v27 = vpop.permute.xlu1 %1718  ;;  %v2637_v3 = vld [vmem:[#allocation2 + $0xc8] sm:$0xff]  ;;  %vm8645_vm7 = vmmov %vm8632_vm0 }
 0x288   :  { %vm8646_vm6 = vmmov %vm8633_vm3 }
 0x28a   :  { %v1469_v58 = vpop.permute.xlu2 %1468 }
 0x28b   :  { %2884 = vmatmul.bf16.gmra.mxu2 %v2672_v0 }
 0x28d   :  { %v1203_v55 = vpop.permute.xlu0 %1202 }
 0x28e   :  { %1241 = vst.msk [vmem:[#allocation2 + $0xf0] sm:$0xff] %vm8631_vm1, %v1203_v55  ;;  %v2640_v39 = vld [vmem:[#allocation2 + $0xe0] sm:$0xff]  ;;  %vm8647_vm1 = vmmov %vm8632_vm0 }
 0x28f   :  { %1499 = vst.msk [vmem:[#allocation2 + $0xf0] sm:$0xff] %vm8632_vm0, %v1461_v51  ;;  %v2673_v61 = vpack.c.bf16 %v2640_v39, %v2637_v3  ;;  %vm8648_vm0 = vmmov %vm8633_vm3  ;;  %v2973_v51 = vpop.f32.mrf.mxu0 }
 0x290   :  { %1757 = vst.msk [vmem:[#allocation2 + $0xf0] sm:$0xff] %vm8633_vm3, %v1719_v27  ;;  %vm8649_vm3 = vcmask 261120  }
 0x291   :  { %2933 = vmatmul.bf16.gmra.mxu3 %v2673_v61 }
 0x292   :  { %v2461_v8 = vpop.permute.xlu1 %2460  ;;  %v1729_v45 = vpop.permute.xlu2 %1728 }
 0x293   :  { %2496 = vst.msk [vmem:[#allocation2 + $0x128] sm:$0xff] %vm8634_vm14, %v2461_v8  ;;  %vm8650_vm14 = vmmov %vm8649_vm3 }
 0x295   :  { %v2287_v32 = vpop.permute.xlu0 %2286 }
 0x296   :  { %2321 = vst.msk [vmem:[#allocation2 + $0x140] sm:$0xff] %vm8635_vm11, %v2287_v32  ;;  %vm8651_vm11 = vmmov %vm8649_vm3 }
 0x297   :  { %2497 = vst.msk [vmem:[#allocation2 + $0x140] sm:$0xff] %vm8636_vm9, %v2463_v4  ;;  %v2642_v50 = vld [vmem:[#allocation2 + $0xf0] sm:$0xff]  ;;  %v2975_v8 = vpop.f32.mrf.mxu0  ;;  %vm8652_vm9 = vmmov %vm8649_vm3 }
 0x298   :  { %v2675_v13 = vpack.c.bf16 %v2645_v11, %v2642_v50 }
 0x29a   :  { %v2649_v59 = vld [vmem:[#allocation2 + $0x128] sm:$0xff]  ;;  %v2289_v40 = vpop.permute.xlu2 %2288 }
 0x29b   :  { %2889 = vmatmul.bf16.gmra.mxu2 %v2675_v13  ;;  %v2919_v53 = vpop.f32.mrf.mxu3 }
 0x29c   :  { %v1213_v46 = vpop.permute.xlu1 %1212 }
 0x29d   :  { %1246 = vst.msk [vmem:[#allocation2 + $0x168] sm:$0xff] %vm8637_vm8, %v1213_v46  ;;  %vm8653_vm8 = vmmov %vm8649_vm3 }
 0x29e   :  { %v1211_v31 = vpop.permute.xlu0 %1210  ;;  %v2652_v25 = vld [vmem:[#allocation2 + $0x140] sm:$0xff] }
 0x29f   :  { %1245 = vst.msk [vmem:[#allocation2 + $0x150] sm:$0xff] %vm8638_vm5, %v1211_v31  ;;  %v2679_v56 = vpack.c.bf16 %v2652_v25, %v2649_v59  ;;  %v2978_v41 = vpop.f32.mrf.mxu0  ;;  %vm8654_vm5 = vmmov %vm8649_vm3 }
 0x2a0   :  { %1503 = vst.msk [vmem:[#allocation2 + $0x150] sm:$0xff] %vm8639_vm10, %v1469_v58  ;;  %vm8655_vm10 = vmmov %vm8649_vm3 }
 0x2a1   :  { %2938 = vmatmul.bf16.gmra.mxu3 %v2676_v30 }
 0x2a2   :  { %v2467_v19 = vpop.permute.xlu2 %2466 }
 0x2a3   :  { %v2921_v16 = vpop.f32.mrf.mxu3 }
 0x2a7   :  { %v1727_v52 = vpop.permute.xlu1 %1726 }
 0x2a8   :  { %1761 = vst.msk [vmem:[#allocation2 + $0x150] sm:$0xff] %vm8640_vm15, %v1727_v52  ;;  %vm8656_vm15 = vmmov %vm8649_vm3 }
 0x2a9   :  { %v1471_v2 = vpop.permute.xlu0 %1470 }
 0x2aa   :  { %1504 = vst.msk [vmem:[#allocation2 + $0x168] sm:$0xff] %vm8641_vm4, %v1471_v2  ;;  %vm8689_vm4 = vmmov %vm8649_vm3 }
 0x2ab   :  { %1762 = vst.msk [vmem:[#allocation2 + $0x168] sm:$0xff] %vm8642_vm13, %v1729_v45  ;;  %2894 = vmatmul.bf16.gmra.mxu2 %v2678_v57 }
 0x2af   :  { %v2018_v36 = vpop.permute.xlu1 %2017  ;;  %v2654_v38 = vld [vmem:[#allocation2 + $0x150] sm:$0xff] }
 0x2b0   :  { %2050 = vst.msk [vmem:[#allocation2 + $0x170] sm:$0xff] %vm8643_vm12, %v2018_v36  ;;  %v2980_v36 = vpop.f32.mrf.mxu0 }
 0x2b1   :  { %v2016_v42 = vpop.permute.xlu0 %2015  ;;  %2943 = vmatmul.bf16.gmra.mxu3 %v2679_v56 }
 0x2b2   :  { %2049 = vst.msk [vmem:[#allocation2 + $0x158] sm:$0xff] %vm8644_vm2, %v2016_v42  ;;  %v2657_v18 = vld [vmem:[#allocation2 + $0x168] sm:$0xff] }
 0x2b3   :  { %2322 = vst.msk [vmem:[#allocation2 + $0x158] sm:$0xff] %vm8645_vm7, %v2289_v40  ;;  %v2681_v28 = vpack.c.bf16 %v2657_v18, %v2654_v38 }
 0x2b7   :  { %v2465_v34 = vpop.permute.xlu1 %2464 }
 0x2b8   :  { %2498 = vst.msk [vmem:[#allocation2 + $0x158] sm:$0xff] %vm8646_vm6, %v2465_v34 }
 0x2b9   :  { %v2291_v44 = vpop.permute.xlu0 %2290 }
 0x2ba   :  { %2323 = vst.msk [vmem:[#allocation2 + $0x170] sm:$0xff] %vm8647_vm1, %v2291_v44 }
 0x2bb   :  { %2499 = vst.msk [vmem:[#allocation2 + $0x170] sm:$0xff] %vm8648_vm0, %v2467_v19  ;;  %2899 = vmatmul.bf16.gmra.mxu2 %v2681_v28  ;;  %v2983_v19 = vpop.f32.mrf.mxu0 }
 0x2bc   :  { %v2924_v4 = vpop.f32.mrf.mxu3 }
 0x2bf   :  { %v2655_v63 = vld [vmem:[#allocation2 + $0x158] sm:$0xff] }
 0x2c2   :  { %v2658_v47 = vld [vmem:[#allocation2 + $0x170] sm:$0xff] }
 0x2c3   :  { %v2682_v22 = vpack.c.bf16 %v2658_v47, %v2655_v63 }
 0x2c4   :  { %v2926_v48 = vpop.f32.mrf.mxu3 }
 0x2c5   :  { %2948 = vmatmul.bf16.gmra.mxu3 %v2682_v22  ;;  %v2985_v22 = vpop.f32.mrf.mxu0 }
 0x2ce   :  { %v2865_v14 = vpop.f32.mrf.mxu2 }
 0x2cf   :  { %v2866_v10 = vadd.f32 %v7270_v15, %v2865_v14 }
 0x2d1   :  { %v2915_v24 = vadd.f32 %v2914_v1, %v2866_v10 }
 0x2d3   :  { %v2964_v17 = vadd.f32 %v2963_v5, %v2915_v24 }
 0x2d5   :  { %v3003_v6 = vmax.f32 %v2964_v17, 0.0 }
 0x2d6   :  { %v2867_v21 = vpop.f32.mrf.mxu2 }
 0x2d7   :  { %v2868_v60 = vadd.f32 %v7270_v15, %v2867_v21 }
 0x2d9   :  { %v2917_v37 = vadd.f32 %v2916_v7, %v2868_v60  ;;  %v2988_v60 = vpop.f32.mrf.mxu0 }
 0x2db   :  { %v2966_v20 = vadd.f32 %v2965_v49, %v2917_v37 }
 0x2dd   :  { %v3004_v9 = vmax.f32 %v2966_v20, 0.0 }
 0x2de   :  { %v2870_v54 = vpop.f32.mrf.mxu2 }
 0x2df   :  { %v3019_v29 = vpack.c.bf16 %v3004_v9, %v3003_v6  ;;  %v2871_v12 = vadd.f32 %v7270_v15, %v2870_v54 }
 0x2e1   :  { %3516 = vmatmul.msk.bf16.vlgmr.msrb.gmra.mxu1 %vm8649_vm3, %v3019_v29  ;;  %v2920_v27 = vadd.f32 %v2919_v53, %v2871_v12  ;;  %v2990_v54 = vpop.f32.mrf.mxu0 }
 0x2e3   :  { %v2969_v55 = vadd.f32 %v2968_v35, %v2920_v27 }
 0x2e5   :  { %v3005_v32 = vmax.f32 %v2969_v55, 0.0 }
 0x2e6   :  { %v2872_v0 = vpop.f32.mrf.mxu2 }
 0x2e7   :  { %v2873_v3 = vadd.f32 %v7270_v15, %v2872_v0 }
 0x2e9   :  { %v2922_v39 = vadd.f32 %v2921_v16, %v2873_v3 }
 0x2eb   :  { %v2971_v61 = vadd.f32 %v2970_v33, %v2922_v39 }
 0x2ed   :  { %v3006_v50 = vmax.f32 %v2971_v61, 0.0  ;;  %v2993_v61 = vpop.f32.mrf.mxu0 }
 0x2ee   :  { %v2875_v11 = vpop.f32.mrf.mxu2 }
 0x2ef   :  { %v3020_v13 = vpack.c.bf16 %v3006_v50, %v3005_v32  ;;  %v2876_v58 = vadd.f32 %v7270_v15, %v2875_v11 }
 0x2f1   :  { %3517 = vmatmul.msk.bf16.gmra.mxu1 %vm8650_vm14, %v3020_v13  ;;  %v2925_v46 = vadd.f32 %v2924_v4, %v2876_v58 }
 0x2f3   :  { %v2974_v45 = vadd.f32 %v2973_v51, %v2925_v46 }
 0x2f4   :  { %v2929_v57 = vpop.f32.mrf.mxu3 }
 0x2f5   :  { %v3007_v43 = vmax.f32 %v2974_v45, 0.0  ;;  %v2995_v58 = vpop.f32.mrf.mxu0 }
 0x2f6   :  { %v2877_v31 = vpop.f32.mrf.mxu2 }
 0x2f7   :  { %v2878_v30 = vadd.f32 %v7270_v15, %v2877_v31 }
 0x2f9   :  { %v2927_v52 = vadd.f32 %v2926_v48, %v2878_v30 }
 0x2fb   :  { %v2976_v26 = vadd.f32 %v2975_v8, %v2927_v52 }
 0x2fc   :  { %v2931_v38 = vpop.f32.mrf.mxu3 }
 0x2fd   :  { %v3008_v2 = vmax.f32 %v2976_v26, 0.0 }
 0x2fe   :  { %v2880_v59 = vpop.f32.mrf.mxu2 }
 0x2ff   :  { %v3021_v25 = vpack.c.bf16 %v3008_v2, %v3007_v43  ;;  %v2881_v40 = vadd.f32 %v7270_v15, %v2880_v59  ;;  %v2998_v43 = vpop.f32.mrf.mxu0 }
 0x301   :  { %3518 = vmatmul.msk.bf16.gmra.mxu1 %vm8651_vm11, %v3021_v25  ;;  %v2930_v42 = vadd.f32 %v2929_v57, %v2881_v40 }
 0x303   :  { %v2979_v18 = vadd.f32 %v2978_v41, %v2930_v42 }
 0x305   :  { %v3009_v5 = vmax.f32 %v2979_v18, 0.0 }
 0x306   :  { %v2882_v56 = vpop.f32.mrf.mxu2 }
 0x307   :  { %v2883_v34 = vadd.f32 %v7270_v15, %v2882_v56 }
 0x309   :  { %v2932_v44 = vadd.f32 %v2931_v38, %v2883_v34  ;;  %v3000_v34 = vpop.f32.mrf.mxu0 }
 0x30b   :  { %v2981_v28 = vadd.f32 %v2980_v36, %v2932_v44 }
 0x30d   :  { %v3010_v63 = vmax.f32 %v2981_v28, 0.0 }
 0x30e   :  { %v2885_v23 = vpop.f32.mrf.mxu2 }
 0x30f   :  { %v3022_v47 = vpack.c.bf16 %v3010_v63, %v3009_v5  ;;  %v2886_v1 = vadd.f32 %v7270_v15, %v2885_v23 }
 0x311   :  { %3519 = vmatmul.msk.bf16.gmra.mxu1 %vm8652_vm9, %v3022_v47 }
 0x314   :  { %v2934_v49 = vpop.f32.mrf.mxu3 }
 0x315   :  { %v2935_v14 = vadd.f32 %v2934_v49, %v2886_v1 }
 0x316   :  { %v2887_v62 = vpop.f32.mrf.mxu2 }
 0x317   :  { %v2888_v35 = vadd.f32 %v7270_v15, %v2887_v62  ;;  %v2984_v7 = vadd.f32 %v2983_v19, %v2935_v14 }
 0x319   :  { %v3011_v17 = vmax.f32 %v2984_v7, 0.0  ;;  %v3570_v7 = vld [vmem:[%s7355_s8] ss:$0 sm:$0xff] }
 0x31c   :  { %v2936_v10 = vpop.f32.mrf.mxu3 }
 0x31d   :  { %v2937_v24 = vadd.f32 %v2936_v10, %v2888_v35 }
 0x31e   :  { %v2890_v21 = vpop.f32.mrf.mxu2 }
 0x31f   :  { %v2986_v33 = vadd.f32 %v2985_v22, %v2937_v24  ;;  %v2891_v9 = vadd.f32 %v7270_v15, %v2890_v21 }
 0x321   :  { %v3012_v37 = vmax.f32 %v2986_v33, 0.0  ;;  %v8657_v33 = vld [vmem:[#allocation19_spill] sm:$0xff] }
 0x323   :  { %v3023_v53 = vpack.c.bf16 %v3012_v37, %v3011_v17  ;;  %v8658_v17 = vmax.f32 %v8657_v33, 0.0 }
 0x324   :  { %v2939_v20 = vpop.f32.mrf.mxu3 }
 0x325   :  { %3520 = vmatmul.msk.bf16.gmra.mxu1 %vm8653_vm8, %v3023_v53  ;;  %v2940_v29 = vadd.f32 %v2939_v20, %v2891_v9 }
 0x326   :  { %v2892_v6 = vpop.f32.mrf.mxu2 }
 0x327   :  { %v2893_v12 = vadd.f32 %v7270_v15, %v2892_v6  ;;  %v2989_v16 = vadd.f32 %v2988_v60, %v2940_v29  ;;  %v8659_v6 = vld [vmem:[#allocation18_spill] sm:$0xff] }
 0x328   :  { %v8660_v9 = vmax.f32 %v8659_v6, 0.0 }
 0x329   :  { %v3013_v55 = vmax.f32 %v2989_v16, 0.0 }
 0x32c   :  { %v2941_v51 = vpop.f32.mrf.mxu3 }
 0x32d   :  { %v2942_v27 = vadd.f32 %v2941_v51, %v2893_v12  ;;  %v8661_v12 = vld [vmem:[#allocation15_spill] sm:$0xff] }
 0x32e   :  { %v2895_v0 = vpop.f32.mrf.mxu2  ;;  %v8662_v51 = vmax.f32 %v8661_v12, 0.0 }
 0x32f   :  { %v2991_v3 = vadd.f32 %v2990_v54, %v2942_v27  ;;  %v2896_v50 = vadd.f32 %v7270_v15, %v2895_v0 }
 0x331   :  { %v3014_v39 = vmax.f32 %v2991_v3, 0.0  ;;  %v8663_v3 = vld [vmem:[#allocation14_spill] sm:$0xff] }
 0x333   :  { %v3024_v4 = vpack.c.bf16 %v3014_v39, %v3013_v55  ;;  %v8664_v55 = vmax.f32 %v8663_v3, 0.0 }
 0x334   :  { %v2944_v8 = vpop.f32.mrf.mxu3 }
 0x335   :  { %3521 = vmatmul.msk.bf16.gmra.mxu1 %vm8654_vm5, %v3024_v4  ;;  %v2945_v11 = vadd.f32 %v2944_v8, %v2896_v50  ;;  %v8665_v8 = vld [vmem:[#allocation11_spill] sm:$0xff] }
 0x336   :  { %v2897_v32 = vpop.f32.mrf.mxu2 }
 0x337   :  { %v2898_v13 = vadd.f32 %v7270_v15, %v2897_v32  ;;  %v2994_v48 = vadd.f32 %v2993_v61, %v2945_v11  ;;  %v8666_v32 = vmax.f32 %v8665_v8, 0.0 }
 0x339   :  { %v3015_v45 = vmax.f32 %v2994_v48, 0.0 }
 0x33c   :  { %v2946_v46 = vpop.f32.mrf.mxu3 }
 0x33d   :  { %v2947_v31 = vadd.f32 %v2946_v46, %v2898_v13  ;;  %v8667_v46 = vld [vmem:[#allocation10_spill] sm:$0xff] }
 0x33e   :  { %v2900_v30 = vpop.f32.mrf.mxu2  ;;  %v8668_v48 = vmax.f32 %v8667_v46, 0.0 }
 0x33f   :  { %v2996_v41 = vadd.f32 %v2995_v58, %v2947_v31  ;;  %v2901_v57 = vadd.f32 %v7270_v15, %v2900_v30 }
 0x341   :  { %v3016_v52 = vmax.f32 %v2996_v41, 0.0 }
 0x343   :  { %v3025_v26 = vpack.c.bf16 %v3016_v52, %v3015_v45  ;;  %v8669_v45 = vld [vmem:[#allocation7_spill] sm:$0xff] }
 0x344   :  { %v8670_v52 = vmax.f32 %v8669_v45, 0.0 }
 0x345   :  { %3522 = vmatmul.msk.bf16.gmra.mxu1 %vm8655_vm10, %v3025_v26 }
 0x346   :  { %v2902_v59 = vpop.f32.mrf.mxu2 }
 0x347   :  { %v2903_v36 = vadd.f32 %v7270_v15, %v2902_v59 }
 0x348   :  { %v2949_v2 = vpop.f32.mrf.mxu3 }
 0x349   :  { %v2950_v25 = vadd.f32 %v2949_v2, %v2901_v57  ;;  %v8671_v57 = vld [vmem:[#allocation6_spill] sm:$0xff] }
 0x34a   :  { %v8672_v59 = vmax.f32 %v8671_v57, 0.0 }
 0x34b   :  { %v2999_v42 = vadd.f32 %v2998_v43, %v2950_v25 }
 0x34d   :  { %v3017_v18 = vmax.f32 %v2999_v42, 0.0 }
 0x350   :  { %v2951_v40 = vpop.f32.mrf.mxu3 }
 0x351   :  { %v2952_v56 = vadd.f32 %v2951_v40, %v2903_v36 }
 0x353   :  { %v3001_v38 = vadd.f32 %v3000_v34, %v2952_v56 }
 0x355   :  { %v3018_v44 = vmax.f32 %v3001_v38, 0.0 }
 0x357   :  { %v3026_v19 = vpack.c.bf16 %v3018_v44, %v3017_v18 }
 0x359   :  { %3523 = vmatmul.msk.bf16.gmra.mxu1 %vm8656_vm15, %v3026_v19  ;;  %v8673_v19 = vld [vmem:[#allocation16_spill] sm:$0xff] }
 0x35e   :  { %v3080_v28 = vpop.f32.mrf.mxu1 }
 0x35f   :  { %v3081_v58 = vadd.f32 %v3570_v7, %v3080_v28  ;;  %v8674_v28 = vmax.f32 %v8673_v19, 0.0 }
 0x361   :  { %v3120_v25 = vadd.f32 %v3081_v58, %v8672_v59 }
 0x363   :  { %v3136_v34 = vmax.f32 %v3120_v25, 0.0 }
 0x366   :  { %v3082_v5 = vpop.f32.mrf.mxu1 }
 0x367   :  { %v3083_v4 = vadd.f32 %v3570_v7, %v3082_v5 }
 0x369   :  { %v3121_v26 = vadd.f32 %v3083_v4, %v8670_v52  ;;  %v3571_v52 = vld [vmem:[%s7358_s11] ss:$0 sm:$0xff]  ;;  %s3238_s11 = sshll.u32 %s7359_s12, 4  ;;  %s3239_s11 = int_to_ptr.hbm [resolvable:$true] %s3238_s11 }
 0x36b   :  { %v3137_v40 = vmax.f32 %v3121_v26, 0.0 }
 0x36e   :  { %v3085_v63 = vpop.f32.mrf.mxu1 }
 0x36f   :  { %v3086_v0 = vadd.f32 %v3570_v7, %v3085_v63 }
 0x371   :  { %v3122_v31 = vadd.f32 %v3086_v0, %v8668_v48 }
 0x373   :  { %v3138_v36 = vmax.f32 %v3122_v31, 0.0  ;;  %v3152_v31 = vld [vmem:[%s7356_s9] sm:$0x1]  ;;  %s3608_s9 = smov [#allocation3]  }
 0x374   :  { %s3236_s4 = sshll.u32 %s3608_s9, 4  ;;  %s3237_s4 = int_to_ptr.vmem [resolvable:$true] %s3236_s4 }
 0x376   :  { %v3087_v23 = vpop.f32.mrf.mxu1 }
 0x377   :  { %v3088_v29 = vadd.f32 %v3570_v7, %v3087_v23  ;;  %v3153_v23 = vpack.c.bf16 %v3137_v40, %v3136_v34 }
 0x379   :  { %v3123_v50 = vadd.f32 %v3088_v29, %v8666_v32  ;;  %v8687_v32 = vld [vmem:[#allocation20_spill] sm:$0xff] }
 0x37b   :  { %v3139_v43 = vmax.f32 %v3123_v50, 0.0  ;;  %v8688_v50 = vmax.f32 %v8687_v32, 0.0 }
 0x37d   :  { %v3154_v56 = vpack.c.bf16 %v3139_v43, %v3138_v36 }
 0x37e   :  { %v3090_v47 = vpop.f32.mrf.mxu1 }
 0x37f   :  { %v3091_v20 = vadd.f32 %v3570_v7, %v3090_v47 }
 0x381   :  { %v3124_v39 = vadd.f32 %v3091_v20, %v8664_v55  ;;  %v8685_v55 = vld [vmem:[#allocation21_spill] sm:$0xff] }
 0x383   :  { %v3140_v41 = vmax.f32 %v3124_v39, 0.0  ;;  %v8686_v39 = vmax.f32 %v8685_v55, 0.0 }
 0x386   :  { %v3092_v22 = vpop.f32.mrf.mxu1 }
 0x387   :  { %v3093_v60 = vadd.f32 %v3570_v7, %v3092_v22  ;;  %v8675_v22 = vld [vmem:[#allocation13_spill] sm:$0xff] }
 0x389   :  { %v3125_v16 = vadd.f32 %v3093_v60, %v8662_v51 }
 0x38b   :  { %v3141_v11 = vmax.f32 %v3125_v16, 0.0 }
 0x38d   :  { %v3155_v2 = vpack.c.bf16 %v3141_v11, %v3140_v41 }
 0x38e   :  { %v3095_v49 = vpop.f32.mrf.mxu1 }
 0x38f   :  { %v3096_v21 = vadd.f32 %v3570_v7, %v3095_v49  ;;  %v8676_v49 = vmax.f32 %v8675_v22, 0.0 }
 0x391   :  { %v3126_v54 = vadd.f32 %v3096_v21, %v8660_v9 }
 0x393   :  { %v3142_v61 = vmax.f32 %v3126_v54, 0.0 }
 0x396   :  { %v3097_v62 = vpop.f32.mrf.mxu1 }
 0x397   :  { %v3098_v24 = vadd.f32 %v3570_v7, %v3097_v62 }
 0x399   :  { %v3127_v37 = vadd.f32 %v3098_v24, %v8658_v17  ;;  %v8677_v24 = vld [vmem:[#allocation17_spill] sm:$0xff]  ;;  %v8679_v17 = vld [vmem:[#allocation12_spill] sm:$0xff] }
 0x39a   :  { %v8678_v21 = vmax.f32 %v8677_v24, 0.0 }
 0x39b   :  { %v3143_v27 = vmax.f32 %v3127_v37, 0.0  ;;  %v8680_v37 = vmax.f32 %v8679_v17, 0.0 }
 0x39d   :  { %v3156_v13 = vpack.c.bf16 %v3143_v27, %v3142_v61  ;;  %v8683_v27 = vld [vmem:[#allocation8_spill] sm:$0xff] }
 0x39e   :  { %v8684_v0 = vmax.f32 %v8683_v27, 0.0 }
 0x3a2   :  { %v3100_v1 = vpop.f32.mrf.mxu1 }
 0x3a3   :  { %v3101_v16 = vadd.f32 %v3570_v7, %v3100_v1 }
 0x3a5   :  { %v3128_v11 = vadd.f32 %v3101_v16, %v8688_v50 }
 0x3a7   :  { %v3144_v46 = vmax.f32 %v3128_v11, 0.0 }
 0x3aa   :  { %v3102_v15 = vpop.f32.mrf.mxu1 }
 0x3ab   :  { %v3103_v9 = vadd.f32 %v3570_v7, %v3102_v15  ;;  %v3556_v15 = vld [vmem:[%s7357_s10] sm:$0xff] }
 0x3ad   :  { %v3129_v61 = vadd.f32 %v3103_v9, %v8686_v39 }
 0x3af   :  { %v3145_v1 = vmax.f32 %v3129_v61, 0.0 }
 0x3b1   :  { %v3157_v48 = vpack.c.bf16 %v3145_v1, %v3144_v46 }
 0x3b2   :  { %v3105_v14 = vpop.f32.mrf.mxu1 }
 0x3b3   :  { %v3106_v33 = vadd.f32 %v3570_v7, %v3105_v14 }
 0x3b5   :  { %v3130_v3 = vadd.f32 %v3106_v33, %v8684_v0 }
 0x3b7   :  { %v3146_v58 = vmax.f32 %v3130_v3, 0.0 }
 0x3ba   :  { %v3107_v35 = vpop.f32.mrf.mxu1 }
 0x3bb   :  { %v3108_v47 = vadd.f32 %v3570_v7, %v3107_v35  ;;  %v3557_v35 = vld [vmem:[%s7357_s10 + $0x8] sm:$0xff] }
 0x3bc   :  { %3204 = vmatpush.bf16.msra.mxu3 %v3557_v35 }
 0x3c0   :  { %3205 = vmatpush.bf16.msra.mxu3 %v3556_v15 }
 0x3c2   :  { %v3110_v10 = vpop.f32.mrf.mxu1 }
 0x3c3   :  { %v3111_v44 = vadd.f32 %v3570_v7, %v3110_v10  ;;  %v8681_v10 = vld [vmem:[#allocation9_spill] sm:$0xff] }
 0x3c4   :  { %v8682_v54 = vmax.f32 %v8681_v10, 0.0 }
 0x3c5   :  { %v3132_v20 = vadd.f32 %v3111_v44, %v8680_v37 }
 0x3c6   :  { %v3131_v29 = vadd.f32 %v3108_v47, %v8682_v54 }
 0x3c7   :  { %v3148_v14 = vmax.f32 %v3132_v20, 0.0 }
 0x3c8   :  { %v3147_v4 = vmax.f32 %v3131_v29, 0.0 }
 0x3ca   :  { %v3112_v53 = vpop.f32.mrf.mxu1 }
 0x3cb   :  { %v3113_v38 = vadd.f32 %v3570_v7, %v3112_v53 }
 0x3cd   :  { %v3133_v62 = vadd.f32 %v3113_v38, %v8676_v49 }
 0x3cf   :  { %v3149_v12 = vmax.f32 %v3133_v62, 0.0 }
 0x3d1   :  { %v3159_v8 = vpack.c.bf16 %v3149_v12, %v3148_v14 }
 0x3d6   :  { %v3115_v30 = vpop.f32.mrf.mxu1 }
 0x3d7   :  { %v3116_v42 = vadd.f32 %v3570_v7, %v3115_v30 }
 0x3d9   :  { %v3134_v5 = vadd.f32 %v3116_v42, %v8674_v28 }
 0x3db   :  { %v3150_v6 = vmax.f32 %v3134_v5, 0.0 }
 0x3de   :  { %v3117_v18 = vpop.f32.mrf.mxu1 }
 0x3df   :  { %v3118_v63 = vadd.f32 %v3570_v7, %v3117_v18  ;;  %v3158_v7 = vpack.c.bf16 %v3147_v4, %v3146_v58 }
 0x3e1   :  { %v3135_v60 = vadd.f32 %v3118_v63, %v8678_v21 }
 0x3e3   :  { %v3151_v53 = vmax.f32 %v3135_v60, 0.0 }
 0x3e5   :  { %v3160_v51 = vpack.c.bf16 %v3151_v53, %v3150_v6 }
 0x3e7   :  { %3161 = vmatpush.bf16.msra.mxu2 %v3160_v51 }
 0x3eb   :  { %3162 = vmatpush.bf16.msra.mxu2 %v3159_v8 }
 0x3ef   :  { %3163 = vmatpush.bf16.msra.mxu2 %v3158_v7 }
 0x3f3   :  { %3164 = vmatpush.bf16.msra.mxu2 %v3157_v48 }
 0x3f7   :  { %3165 = vmatpush.bf16.msra.mxu2 %v3156_v13 }
 0x3fb   :  { %3166 = vmatpush.bf16.msra.mxu2 %v3155_v2 }
 0x3ff   :  { %3167 = vmatpush.bf16.msra.mxu2 %v3154_v56 }
 0x403   :  { %3168 = vmatpush.bf16.msra.mxu2 %v3153_v23 }
 0x406   :  { %3169 = vmatmul.bf16.vlgmr.msra.gmra.mxu2 %v3152_v31 }
 0x489   :  { %v3170_v41 = vpop.f32.mrf.mxu2 }
 0x48a   :  { %v3174_v30 = vpack.c.bf16 %v3170_v41, %v3170_v41 }
 0x48c   :  { %3532 = vmatmul.msk.bf16.vlgmr.msra.gmra.mxu3 %vm8689_vm4, %v3174_v30 }
 0x491   :  { %v3172_v45 = vpop.f32.mrf.mxu2 }
 0x50f   :  { %v3207_v26 = vpop.f32.mrf.mxu3 }
 0x510   :  { %v3208_v43 = vadd.f32 %v3571_v52, %v3207_v26 }
 0x512   :  { %v3533_v13 = vmul.f32 -1.442695, %v3208_v43 }
 0x514   :  { %3572 = vpow2.f32 %v3533_v13 }
 0x517   :  { %v3209_v2 = vpop.f32.mrf.mxu3 }
 0x51a   :  { %v3573_v57 = vpop.eup %3572 }
 0x51b   :  { %v3214_v59 = vadd.f32 1.0, %v3573_v57 }
 0x51d   :  { %3574 = vrcp.f32 %v3214_v59  ;;  %v3226_v42 = vand.u32 2147483648, %v3214_v59  ;;  %v3224_v34 = vand.u32 2147483647, %v3214_v59  ;;  %vm3220_vm12 = vweird.f32 %v3214_v59 }
 0x51f   :  { %v3227_v18 = vor.u32 1.1754944e-38, %v3226_v42  ;;  %vm3225_vm7 = vcmp.eq.f32.partialorder %v3224_v34, 8.507059e+37 }
 0x523   :  { %v3575_v25 = vpop.eup %3574 }
 0x524   :  { %v3216_v36 = vmul.f32 %v3575_v25, %v3214_v59  ;;  %vm3221_vm13 = vweird.f32 %v3575_v25 }
 0x525   :  { %vm3222_vm2 = vmor %vm3220_vm12, %vm3221_vm13 }
 0x526   :  { %v3217_v40 = vsub.f32 1.0, %v3216_v36 }
 0x528   :  { %v3218_v56 = vmul.f32 %v3575_v25, %v3217_v40 }
 0x52a   :  { %v3219_v38 = vadd.f32 %v3575_v25, %v3218_v56 }
 0x52c   :  { %v3223_v44 = vsel %vm3222_vm2, %v3575_v25, %v3219_v38 }
 0x52d   :  { %v3228_v19 = vsel %vm3225_vm7, %v3227_v18, %v3223_v44 }
 0x52e   :  { %3230 = vst [vmem:[#allocation3] sm:$0x3] %v3228_v19 }
 0x52f   :  { %3241 = dma.vmem_to_hbm [thread:$0]  %s3237_s4, 32, %s3239_s11, [#allocation4]  }
 0x530   :  { %3601 = dma.done.wait [#allocation4], 32  }
 0x531   :  { %3602 = vsyncadd [#allocation4], 4294967264 }
 0x532   :  { %3246 = vsyncpa [#allocation4], 1 }

</bundles_post_ra>
